<compile_context>
chip_gen: v7x
topology: tpu7x:2x2x1
jax: 0.10.0
libtpu: 0.0.40
codegen_flags: <defaults>
</compile_context>

<pallas_src>
import functools

import numpy as np
import jax
import jax.numpy as jnp
from jax import lax
from jax.experimental import pallas as pl
from jax.experimental.pallas import tpu as pltpu

jax.config.update("jax_default_matmul_precision", "highest")


# ----------------------------------------------------------------------------
# Pallas kernel: full GRU 1-step-ahead imputer recurrence in one call
# ----------------------------------------------------------------------------
def _rnni_fused_kernel(x_ref, m_ref,          # (B, S, F) inputs (batch-major, features on lanes)
                       wx_ref, wm_ref,        # (F, 3H) input weights: x-path / mask-path, gates r|z|n
                       whh_ref,               # (H, 3H) hidden weights, gates r|z|n
                       bi_ref,                # (1, 3H) fused bias: [b_ir+b_hr | b_iz+b_hz | b_in]
                       bhn_ref,               # (1, H)  b_hn (must stay inside r*(Whn h + b_hn))
                       wro_ref, bro_ref,      # (H, F), (1, F) readout Linear(H, F)
                       xhat_out_ref,          # (B, S, F) output: 1-step-ahead predictions
                       h_out_ref):            # (B, S, H) output: hidden states
    B, S, F = x_ref.shape
    H = whh_ref.shape[0]

    # Load weights/biases once, outside the recurrence.
    wx, wm, whh, wro = wx_ref[...], wm_ref[...], whh_ref[...], wro_ref[...]
    bi, bhn, bro = bi_ref[...], bhn_ref[...], bro_ref[...]

    # step 0: state_init='zero' -> h0 = 0, x_hat0 = readout(0) = readout bias.
    h0 = jnp.zeros((B, H), jnp.float32)
    xhat0 = jnp.broadcast_to(bro, (B, F))
    h_out_ref[:, 0:1, :] = h0.reshape(B, 1, H)
    xhat_out_ref[:, 0:1, :] = xhat0.reshape(B, 1, F)

    def step(s, carry):
        h, x_hat = carry
        x_t = x_ref[:, pl.ds(s, 1), :].reshape(B, F)
        m_t = m_ref[:, pl.ds(s, 1), :].reshape(B, F)

        # _preprocess_input: impute missing entries with the previous prediction.
        x_p = jnp.where(m_t != 0, x_t, x_hat)

        # All three input gates in one GEMM per operand (x-path + mask-path),
        # all three hidden gates in one GEMM.
        gi = (jnp.dot(x_p, wx, preferred_element_type=jnp.float32)
              + jnp.dot(m_t, wm, preferred_element_type=jnp.float32)
              + bi)
        gh = jnp.dot(h, whh, preferred_element_type=jnp.float32)

        r = jax.nn.sigmoid(gi[:, :H] + gh[:, :H])
        z = jax.nn.sigmoid(gi[:, H:2 * H] + gh[:, H:2 * H])
        n = jnp.tanh(gi[:, 2 * H:] + r * (gh[:, 2 * H:] + bhn))
        h_new = (1.0 - z) * n + z * h

        x_hat_new = jnp.dot(h_new, wro, preferred_element_type=jnp.float32) + bro

        # Stores stay in VMEM; the HBM writeback is one slab DMA at kernel end.
        h_out_ref[:, pl.ds(s + 1, 1), :] = h_new.reshape(B, 1, H)
        xhat_out_ref[:, pl.ds(s + 1, 1), :] = x_hat_new.reshape(B, 1, F)
        return h_new, x_hat_new

    # Short, statically-bounded recurrence: fully unroll for scheduler visibility.
    unroll = True if S <= 64 else 8
    lax.fori_loop(0, S - 1, step, (h0, xhat0), unroll=unroll)


# ----------------------------------------------------------------------------
# Wrapper
# ----------------------------------------------------------------------------
@functools.partial(jax.jit, static_argnames=("return_hidden",))
def rnn_imputer_forward(x, mask, params, return_hidden=True):
    """RNNImputerModel.forward(x, mask, return_hidden=...).

    x, mask: (B, S, N, C) float32 (mask is 0/1).
    Returns x_hat (B, S, N, C) and, if return_hidden, h (B, S, H).
    """
    # TODO(synk): exog_size > 0 (u input), cell='lstm' and state_init='noise'
    #             are not implemented; the tested config uses gru / 0 / 'zero'.
    # TODO(synk): for very long S or large n*c, chunk the time axis with a grid
    #             (or emit_pipeline) to bound VMEM; whole slabs are resident here.
    B, S, N, C = x.shape
    F = N * C
    Wih, Whh = params["Wih"], params["Whh"]          # (3H, 2F), (3H, H)
    bih, bhh = params["bih"], params["bhh"]          # (3H,), (3H,)
    Wro, bro = params["Wro"], params["bro"]          # (F, H), (F,)
    H = Whh.shape[1]

    wx = Wih[:, :F].T                                # (F, 3H)  x-path columns of weight_ih
    wm = Wih[:, F:].T                                # (F, 3H)  mask-path columns
    whh_t = Whh.T                                    # (H, 3H)
    # Exact bias fusion: only b_ir+b_hr and b_iz+b_hz fold; b_hn stays separate.
    bi = (bih + jnp.concatenate([bhh[:2 * H], jnp.zeros((H,), bhh.dtype)])).reshape(1, 3 * H)
    bhn = bhh[2 * H:].reshape(1, H)
    wro_t = Wro.T                                    # (H, F)
    bro2 = bro.reshape(1, F)

    def vmem_spec():
        return pl.BlockSpec(memory_space=pltpu.MemorySpace.VMEM)

    x_hat_f, h = pl.pallas_call(
        _rnni_fused_kernel,
        out_shape=(jax.ShapeDtypeStruct((B, S, F), jnp.float32),
                   jax.ShapeDtypeStruct((B, S, H), jnp.float32)),
        in_specs=[vmem_spec() for _ in range(9)],
        out_specs=(vmem_spec(), vmem_spec()),
    )(x.reshape(B, S, F).astype(jnp.float32),
      mask.reshape(B, S, F).astype(jnp.float32),
      wx, wm, whh_t, bi, bhn, wro_t, bro2)

    x_hat = x_hat_f.reshape(B, S, N, C)
    if return_hidden:
        return x_hat, h
    return x_hat


# ----------------------------------------------------------------------------
# Pure-JAX reference (mirrors the PyTorch module exactly)
# ----------------------------------------------------------------------------
def _rnn_imputer_ref(x, mask, params):
    B, S, N, C = x.shape
    F = N * C
    Wih, Whh = params["Wih"], params["Whh"]
    bih, bhh = params["bih"], params["bhh"]
    Wro, bro = params["Wro"], params["bro"]
    H = Whh.shape[1]
    x_f = x.reshape(B, S, F)
    m_f = mask.reshape(B, S, F)

    h = jnp.zeros((B, H), jnp.float32)
    x_hat = h @ Wro.T + bro
    hs, preds = [h], [x_hat]
    for s in range(S - 1):
        m_t = m_f[:, s]
        x_p = jnp.where(m_t != 0, x_f[:, s], x_hat)
        inp = jnp.concatenate([x_p, m_t], -1)
        gi = inp @ Wih.T + bih
        gh = h @ Whh.T + bhh
        r = jax.nn.sigmoid(gi[:, :H] + gh[:, :H])
        z = jax.nn.sigmoid(gi[:, H:2 * H] + gh[:, H:2 * H])
        n = jnp.tanh(gi[:, 2 * H:] + r * gh[:, 2 * H:])
        h = (1.0 - z) * n + z * h
        x_hat = h @ Wro.T + bro
        hs.append(h)
        preds.append(x_hat)
    return jnp.stack(preds, 1).reshape(B, S, N, C), jnp.stack(hs, 1)


# ----------------------------------------------------------------------------
# Deterministic parameter init (PyTorch-style uniform)
# ----------------------------------------------------------------------------
def _init_rnn_params(key, F, H):
    k = 1.0 / np.sqrt(H)
    ks = jax.random.split(key, 6)
    return dict(
        Wih=jax.random.uniform(ks[0], (3 * H, 2 * F), jnp.float32, -k, k),
        Whh=jax.random.uniform(ks[1], (3 * H, H), jnp.float32, -k, k),
        bih=jax.random.uniform(ks[2], (3 * H,), jnp.float32, -k, k),
        bhh=jax.random.uniform(ks[3], (3 * H,), jnp.float32, -k, k),
        Wro=jax.random.uniform(ks[4], (F, H), jnp.float32, -k, k),
        bro=jax.random.uniform(ks[5], (F,), jnp.float32, -k, k),
    )


if __name__ == "__main__":
    # small shapes: batch=2, steps=8, n_nodes=4, channels=4, hidden=32
    B, S, N, C, H = 2, 8, 4, 4, 32
    F = N * C

    key = jax.random.PRNGKey(0)
    k_x, k_m, k_p = jax.random.split(key, 3)
    x = jax.random.normal(k_x, (B, S, N, C), jnp.float32)
    mask = (jax.random.uniform(k_m, (B, S, N, C)) > 0.3).astype(jnp.float32)
    params = _init_rnn_params(k_p, F, H)

    x_hat, h = rnn_imputer_forward(x, mask, params, return_hidden=True)
    jax.block_until_ready((x_hat, h))

    # correctness check vs. pure-JAX reference of the PyTorch module
    x_hat_r, h_r = _rnn_imputer_ref(x, mask, params)
    np.testing.assert_allclose(np.asarray(x_hat), np.asarray(x_hat_r), rtol=2e-4, atol=2e-4)
    np.testing.assert_allclose(np.asarray(h), np.asarray(h_r), rtol=2e-4, atol=2e-4)

    print("KERNEL_OK")
</pallas_src>

<mosaic_0001>
module attributes {stable_mosaic.version = 11 : i64} {
  func.func @_rnni_fused_kernel(%arg0: memref<2x8x16xf32, #tpu.memory_space<vmem>>, %arg1: memref<2x8x16xf32, #tpu.memory_space<vmem>>, %arg2: memref<16x96xf32, #tpu.memory_space<vmem>>, %arg3: memref<16x96xf32, #tpu.memory_space<vmem>>, %arg4: memref<32x96xf32, #tpu.memory_space<vmem>>, %arg5: memref<1x96xf32, #tpu.memory_space<vmem>>, %arg6: memref<1x32xf32, #tpu.memory_space<vmem>>, %arg7: memref<32x16xf32, #tpu.memory_space<vmem>>, %arg8: memref<1x16xf32, #tpu.memory_space<vmem>>, %arg9: memref<2x8x16xf32, #tpu.memory_space<vmem>>, %arg10: memref<2x8x32xf32, #tpu.memory_space<vmem>>) attributes {dimension_semantics = [], scalar_prefetch = 0 : i64, scratch_operands = 0 : i64, tpu.core_type = #tpu.core_type<tc>} {
    %c0 = arith.constant 0 : index
    %c0_0 = arith.constant 0 : index
    %0 = vector.load %arg2[%c0, %c0_0] : memref<16x96xf32, #tpu.memory_space<vmem>>, vector<16x96xf32>
    %c0_1 = arith.constant 0 : index
    %c0_2 = arith.constant 0 : index
    %1 = vector.load %arg3[%c0_1, %c0_2] : memref<16x96xf32, #tpu.memory_space<vmem>>, vector<16x96xf32>
    %c0_3 = arith.constant 0 : index
    %c0_4 = arith.constant 0 : index
    %2 = vector.load %arg4[%c0_3, %c0_4] : memref<32x96xf32, #tpu.memory_space<vmem>>, vector<32x96xf32>
    %c0_5 = arith.constant 0 : index
    %c0_6 = arith.constant 0 : index
    %3 = vector.load %arg7[%c0_5, %c0_6] : memref<32x16xf32, #tpu.memory_space<vmem>>, vector<32x16xf32>
    %c0_7 = arith.constant 0 : index
    %c0_8 = arith.constant 0 : index
    %4 = vector.load %arg5[%c0_7, %c0_8] : memref<1x96xf32, #tpu.memory_space<vmem>>, vector<1x96xf32>
    %c0_9 = arith.constant 0 : index
    %c0_10 = arith.constant 0 : index
    %5 = vector.load %arg6[%c0_9, %c0_10] : memref<1x32xf32, #tpu.memory_space<vmem>>, vector<1x32xf32>
    %c0_11 = arith.constant 0 : index
    %c0_12 = arith.constant 0 : index
    %6 = vector.load %arg8[%c0_11, %c0_12] : memref<1x16xf32, #tpu.memory_space<vmem>>, vector<1x16xf32>
    %cst = arith.constant 0.000000e+00 : f32
    %7 = vector.broadcast %cst : f32 to vector<2x32xf32>
    %8 = vector.shape_cast %6 : vector<1x16xf32> to vector<1x16xf32>
    %9 = vector.broadcast %8 : vector<1x16xf32> to vector<2x16xf32>
    %10 = vector.shape_cast %7 : vector<2x32xf32> to vector<2x1x32xf32>
    %c0_13 = arith.constant 0 : index
    %c0_14 = arith.constant 0 : index
    %c0_15 = arith.constant 0 : index
    %11 = vector.load %arg10[%c0_13, %c0_14, %c0_15] : memref<2x8x32xf32, #tpu.memory_space<vmem>>, vector<2x1x32xf32>
    tpu.vector_store %arg10[%c0_13, %c0_14, %c0_15], %10 {strides = array<i32>} : memref<2x8x32xf32, #tpu.memory_space<vmem>>, vector<2x1x32xf32>,
    %12 = vector.shape_cast %9 : vector<2x16xf32> to vector<2x1x16xf32>
    %c0_16 = arith.constant 0 : index
    %c0_17 = arith.constant 0 : index
    %c0_18 = arith.constant 0 : index
    %13 = vector.load %arg9[%c0_16, %c0_17, %c0_18] : memref<2x8x16xf32, #tpu.memory_space<vmem>>, vector<2x1x16xf32>
    tpu.vector_store %arg9[%c0_16, %c0_17, %c0_18], %12 {strides = array<i32>} : memref<2x8x16xf32, #tpu.memory_space<vmem>>, vector<2x1x16xf32>,
    %c0_i32 = arith.constant 0 : i32
    %c0_19 = arith.constant 0 : index
    %14 = arith.index_cast %c0_i32 : i32 to index
    %c0_20 = arith.constant 0 : index
    %15 = vector.load %arg0[%c0_19, %14, %c0_20] : memref<2x8x16xf32, #tpu.memory_space<vmem>>, vector<2x1x16xf32>
    %16 = vector.shape_cast %15 : vector<2x1x16xf32> to vector<2x16xf32>
    %c0_21 = arith.constant 0 : index
    %17 = arith.index_cast %c0_i32 : i32 to index
    %c0_22 = arith.constant 0 : index
    %18 = vector.load %arg1[%c0_21, %17, %c0_22] : memref<2x8x16xf32, #tpu.memory_space<vmem>>, vector<2x1x16xf32>
    %19 = vector.shape_cast %18 : vector<2x1x16xf32> to vector<2x16xf32>
    %cst_23 = arith.constant 0.000000e+00 : f32
    %20 = vector.broadcast %cst_23 : f32 to vector<2x16xf32>
    %21 = arith.cmpf one, %19, %20 : vector<2x16xf32>
    %22 = arith.select %21, %16, %9 : vector<2x16xi1>, vector<2x16xf32>
    %cst_24 = arith.constant dense<0.000000e+00> : vector<2x96xf32>
    %23 = tpu.matmul %22, %0, %cst_24 {dimension_numbers = #tpu.dot_dimension_numbers<[1], [0], [0], [1], [0, 0, 1, 1], [], []>, precision = #tpu.contract_precision<fp32>} : vector<2x16xf32>, vector<16x96xf32>, vector<2x96xf32> -> vector<2x96xf32>
    %cst_25 = arith.constant dense<0.000000e+00> : vector<2x96xf32>
    %24 = tpu.matmul %19, %1, %cst_25 {dimension_numbers = #tpu.dot_dimension_numbers<[1], [0], [0], [1], [0, 0, 1, 1], [], []>, precision = #tpu.contract_precision<fp32>} : vector<2x16xf32>, vector<16x96xf32>, vector<2x96xf32> -> vector<2x96xf32>
    %25 = arith.addf %23, %24 : vector<2x96xf32>
    %26 = vector.broadcast %4 : vector<1x96xf32> to vector<2x96xf32>
    %27 = arith.addf %25, %26 : vector<2x96xf32>
    %cst_26 = arith.constant dense<0.000000e+00> : vector<2x96xf32>
    %28 = tpu.matmul %7, %2, %cst_26 {dimension_numbers = #tpu.dot_dimension_numbers<[1], [0], [0], [1], [0, 0, 1, 1], [], []>, precision = #tpu.contract_precision<fp32>} : vector<2x32xf32>, vector<32x96xf32>, vector<2x96xf32> -> vector<2x96xf32>
    %29 = vector.extract_strided_slice %27 {offsets = [0, 0], sizes = [2, 32], strides = [1, 1]} : vector<2x96xf32> to vector<2x32xf32>
    %30 = vector.extract_strided_slice %28 {offsets = [0, 0], sizes = [2, 32], strides = [1, 1]} : vector<2x96xf32> to vector<2x32xf32>
    %31 = arith.addf %29, %30 : vector<2x32xf32>
    %32 = arith.negf %31 : vector<2x32xf32>
    %33 = math.exp %32 : vector<2x32xf32>
    %cst_27 = arith.constant 1.000000e+00 : f32
    %34 = vector.broadcast %cst_27 : f32 to vector<2x32xf32>
    %35 = arith.addf %34, %33 : vector<2x32xf32>
    %36 = arith.divf %34, %35 : vector<2x32xf32>
    %37 = vector.extract_strided_slice %27 {offsets = [0, 32], sizes = [2, 32], strides = [1, 1]} : vector<2x96xf32> to vector<2x32xf32>
    %38 = vector.extract_strided_slice %28 {offsets = [0, 32], sizes = [2, 32], strides = [1, 1]} : vector<2x96xf32> to vector<2x32xf32>
    %39 = arith.addf %37, %38 : vector<2x32xf32>
    %40 = arith.negf %39 : vector<2x32xf32>
    %41 = math.exp %40 : vector<2x32xf32>
    %cst_28 = arith.constant 1.000000e+00 : f32
    %42 = vector.broadcast %cst_28 : f32 to vector<2x32xf32>
    %43 = arith.addf %42, %41 : vector<2x32xf32>
    %44 = arith.divf %42, %43 : vector<2x32xf32>
    %45 = vector.extract_strided_slice %27 {offsets = [0, 64], sizes = [2, 32], strides = [1, 1]} : vector<2x96xf32> to vector<2x32xf32>
    %46 = vector.extract_strided_slice %28 {offsets = [0, 64], sizes = [2, 32], strides = [1, 1]} : vector<2x96xf32> to vector<2x32xf32>
    %47 = vector.broadcast %5 : vector<1x32xf32> to vector<2x32xf32>
    %48 = arith.addf %46, %47 : vector<2x32xf32>
    %49 = arith.mulf %36, %48 : vector<2x32xf32>
    %50 = arith.addf %45, %49 : vector<2x32xf32>
    %51 = math.tanh %50 : vector<2x32xf32>
    %cst_29 = arith.constant 1.000000e+00 : f32
    %52 = vector.broadcast %cst_29 : f32 to vector<2x32xf32>
    %53 = arith.subf %52, %44 : vector<2x32xf32>
    %54 = arith.mulf %53, %51 : vector<2x32xf32>
    %55 = arith.mulf %44, %7 : vector<2x32xf32>
    %56 = arith.addf %54, %55 : vector<2x32xf32>
    %cst_30 = arith.constant dense<0.000000e+00> : vector<2x16xf32>
    %57 = tpu.matmul %56, %3, %cst_30 {dimension_numbers = #tpu.dot_dimension_numbers<[1], [0], [0], [1], [0, 0, 1, 1], [], []>, precision = #tpu.contract_precision<fp32>} : vector<2x32xf32>, vector<32x16xf32>, vector<2x16xf32> -> vector<2x16xf32>
    %58 = vector.broadcast %6 : vector<1x16xf32> to vector<2x16xf32>
    %59 = arith.addf %57, %58 : vector<2x16xf32>
    %60 = vector.shape_cast %56 : vector<2x32xf32> to vector<2x1x32xf32>
    %c1_i32 = arith.constant 1 : i32
    %61 = arith.addi %c0_i32, %c1_i32 : i32
    %c0_31 = arith.constant 0 : index
    %62 = arith.index_cast %61 : i32 to index
    %c0_32 = arith.constant 0 : index
    %63 = vector.load %arg10[%c0_31, %62, %c0_32] : memref<2x8x32xf32, #tpu.memory_space<vmem>>, vector<2x1x32xf32>
    tpu.vector_store %arg10[%c0_31, %62, %c0_32], %60 {strides = array<i32>} : memref<2x8x32xf32, #tpu.memory_space<vmem>>, vector<2x1x32xf32>,
    %64 = vector.shape_cast %59 : vector<2x16xf32> to vector<2x1x16xf32>
    %c1_i32_33 = arith.constant 1 : i32
    %65 = arith.addi %c0_i32, %c1_i32_33 : i32
    %c0_34 = arith.constant 0 : index
    %66 = arith.index_cast %65 : i32 to index
    %c0_35 = arith.constant 0 : index
    %67 = vector.load %arg9[%c0_34, %66, %c0_35] : memref<2x8x16xf32, #tpu.memory_space<vmem>>, vector<2x1x16xf32>
    tpu.vector_store %arg9[%c0_34, %66, %c0_35], %64 {strides = array<i32>} : memref<2x8x16xf32, #tpu.memory_space<vmem>>, vector<2x1x16xf32>,
    %c1_i32_36 = arith.constant 1 : i32
    %c0_37 = arith.constant 0 : index
    %68 = arith.index_cast %c1_i32_36 : i32 to index
    %c0_38 = arith.constant 0 : index
    %69 = vector.load %arg0[%c0_37, %68, %c0_38] : memref<2x8x16xf32, #tpu.memory_space<vmem>>, vector<2x1x16xf32>
    %70 = vector.shape_cast %69 : vector<2x1x16xf32> to vector<2x16xf32>
    %c0_39 = arith.constant 0 : index
    %71 = arith.index_cast %c1_i32_36 : i32 to index
    %c0_40 = arith.constant 0 : index
    %72 = vector.load %arg1[%c0_39, %71, %c0_40] : memref<2x8x16xf32, #tpu.memory_space<vmem>>, vector<2x1x16xf32>
    %73 = vector.shape_cast %72 : vector<2x1x16xf32> to vector<2x16xf32>
    %cst_41 = arith.constant 0.000000e+00 : f32
    %74 = vector.broadcast %cst_41 : f32 to vector<2x16xf32>
    %75 = arith.cmpf one, %73, %74 : vector<2x16xf32>
    %76 = arith.select %75, %70, %59 : vector<2x16xi1>, vector<2x16xf32>
    %cst_42 = arith.constant dense<0.000000e+00> : vector<2x96xf32>
    %77 = tpu.matmul %76, %0, %cst_42 {dimension_numbers = #tpu.dot_dimension_numbers<[1], [0], [0], [1], [0, 0, 1, 1], [], []>, precision = #tpu.contract_precision<fp32>} : vector<2x16xf32>, vector<16x96xf32>, vector<2x96xf32> -> vector<2x96xf32>
    %cst_43 = arith.constant dense<0.000000e+00> : vector<2x96xf32>
    %78 = tpu.matmul %73, %1, %cst_43 {dimension_numbers = #tpu.dot_dimension_numbers<[1], [0], [0], [1], [0, 0, 1, 1], [], []>, precision = #tpu.contract_precision<fp32>} : vector<2x16xf32>, vector<16x96xf32>, vector<2x96xf32> -> vector<2x96xf32>
    %79 = arith.addf %77, %78 : vector<2x96xf32>
    %80 = vector.broadcast %4 : vector<1x96xf32> to vector<2x96xf32>
    %81 = arith.addf %79, %80 : vector<2x96xf32>
    %cst_44 = arith.constant dense<0.000000e+00> : vector<2x96xf32>
    %82 = tpu.matmul %56, %2, %cst_44 {dimension_numbers = #tpu.dot_dimension_numbers<[1], [0], [0], [1], [0, 0, 1, 1], [], []>, precision = #tpu.contract_precision<fp32>} : vector<2x32xf32>, vector<32x96xf32>, vector<2x96xf32> -> vector<2x96xf32>
    %83 = vector.extract_strided_slice %81 {offsets = [0, 0], sizes = [2, 32], strides = [1, 1]} : vector<2x96xf32> to vector<2x32xf32>
    %84 = vector.extract_strided_slice %82 {offsets = [0, 0], sizes = [2, 32], strides = [1, 1]} : vector<2x96xf32> to vector<2x32xf32>
    %85 = arith.addf %83, %84 : vector<2x32xf32>
    %86 = arith.negf %85 : vector<2x32xf32>
    %87 = math.exp %86 : vector<2x32xf32>
    %cst_45 = arith.constant 1.000000e+00 : f32
    %88 = vector.broadcast %cst_45 : f32 to vector<2x32xf32>
    %89 = arith.addf %88, %87 : vector<2x32xf32>
    %90 = arith.divf %88, %89 : vector<2x32xf32>
    %91 = vector.extract_strided_slice %81 {offsets = [0, 32], sizes = [2, 32], strides = [1, 1]} : vector<2x96xf32> to vector<2x32xf32>
    %92 = vector.extract_strided_slice %82 {offsets = [0, 32], sizes = [2, 32], strides = [1, 1]} : vector<2x96xf32> to vector<2x32xf32>
    %93 = arith.addf %91, %92 : vector<2x32xf32>
    %94 = arith.negf %93 : vector<2x32xf32>
    %95 = math.exp %94 : vector<2x32xf32>
    %cst_46 = arith.constant 1.000000e+00 : f32
    %96 = vector.broadcast %cst_46 : f32 to vector<2x32xf32>
    %97 = arith.addf %96, %95 : vector<2x32xf32>
    %98 = arith.divf %96, %97 : vector<2x32xf32>
    %99 = vector.extract_strided_slice %81 {offsets = [0, 64], sizes = [2, 32], strides = [1, 1]} : vector<2x96xf32> to vector<2x32xf32>
    %100 = vector.extract_strided_slice %82 {offsets = [0, 64], sizes = [2, 32], strides = [1, 1]} : vector<2x96xf32> to vector<2x32xf32>
    %101 = vector.broadcast %5 : vector<1x32xf32> to vector<2x32xf32>
    %102 = arith.addf %100, %101 : vector<2x32xf32>
    %103 = arith.mulf %90, %102 : vector<2x32xf32>
    %104 = arith.addf %99, %103 : vector<2x32xf32>
    %105 = math.tanh %104 : vector<2x32xf32>
    %cst_47 = arith.constant 1.000000e+00 : f32
    %106 = vector.broadcast %cst_47 : f32 to vector<2x32xf32>
    %107 = arith.subf %106, %98 : vector<2x32xf32>
    %108 = arith.mulf %107, %105 : vector<2x32xf32>
    %109 = arith.mulf %98, %56 : vector<2x32xf32>
    %110 = arith.addf %108, %109 : vector<2x32xf32>
    %cst_48 = arith.constant dense<0.000000e+00> : vector<2x16xf32>
    %111 = tpu.matmul %110, %3, %cst_48 {dimension_numbers = #tpu.dot_dimension_numbers<[1], [0], [0], [1], [0, 0, 1, 1], [], []>, precision = #tpu.contract_precision<fp32>} : vector<2x32xf32>, vector<32x16xf32>, vector<2x16xf32> -> vector<2x16xf32>
    %112 = vector.broadcast %6 : vector<1x16xf32> to vector<2x16xf32>
    %113 = arith.addf %111, %112 : vector<2x16xf32>
    %114 = vector.shape_cast %110 : vector<2x32xf32> to vector<2x1x32xf32>
    %c1_i32_49 = arith.constant 1 : i32
    %115 = arith.addi %c1_i32_36, %c1_i32_49 : i32
    %c0_50 = arith.constant 0 : index
    %116 = arith.index_cast %115 : i32 to index
    %c0_51 = arith.constant 0 : index
    %117 = vector.load %arg10[%c0_50, %116, %c0_51] : memref<2x8x32xf32, #tpu.memory_space<vmem>>, vector<2x1x32xf32>
    tpu.vector_store %arg10[%c0_50, %116, %c0_51], %114 {strides = array<i32>} : memref<2x8x32xf32, #tpu.memory_space<vmem>>, vector<2x1x32xf32>,
    %118 = vector.shape_cast %113 : vector<2x16xf32> to vector<2x1x16xf32>
    %c1_i32_52 = arith.constant 1 : i32
    %119 = arith.addi %c1_i32_36, %c1_i32_52 : i32
    %c0_53 = arith.constant 0 : index
    %120 = arith.index_cast %119 : i32 to index
    %c0_54 = arith.constant 0 : index
    %121 = vector.load %arg9[%c0_53, %120, %c0_54] : memref<2x8x16xf32, #tpu.memory_space<vmem>>, vector<2x1x16xf32>
    tpu.vector_store %arg9[%c0_53, %120, %c0_54], %118 {strides = array<i32>} : memref<2x8x16xf32, #tpu.memory_space<vmem>>, vector<2x1x16xf32>,
    %c2_i32 = arith.constant 2 : i32
    %c0_55 = arith.constant 0 : index
    %122 = arith.index_cast %c2_i32 : i32 to index
    %c0_56 = arith.constant 0 : index
    %123 = vector.load %arg0[%c0_55, %122, %c0_56] : memref<2x8x16xf32, #tpu.memory_space<vmem>>, vector<2x1x16xf32>
    %124 = vector.shape_cast %123 : vector<2x1x16xf32> to vector<2x16xf32>
    %c0_57 = arith.constant 0 : index
    %125 = arith.index_cast %c2_i32 : i32 to index
    %c0_58 = arith.constant 0 : index
    %126 = vector.load %arg1[%c0_57, %125, %c0_58] : memref<2x8x16xf32, #tpu.memory_space<vmem>>, vector<2x1x16xf32>
    %127 = vector.shape_cast %126 : vector<2x1x16xf32> to vector<2x16xf32>
    %cst_59 = arith.constant 0.000000e+00 : f32
    %128 = vector.broadcast %cst_59 : f32 to vector<2x16xf32>
    %129 = arith.cmpf one, %127, %128 : vector<2x16xf32>
    %130 = arith.select %129, %124, %113 : vector<2x16xi1>, vector<2x16xf32>
    %cst_60 = arith.constant dense<0.000000e+00> : vector<2x96xf32>
    %131 = tpu.matmul %130, %0, %cst_60 {dimension_numbers = #tpu.dot_dimension_numbers<[1], [0], [0], [1], [0, 0, 1, 1], [], []>, precision = #tpu.contract_precision<fp32>} : vector<2x16xf32>, vector<16x96xf32>, vector<2x96xf32> -> vector<2x96xf32>
    %cst_61 = arith.constant dense<0.000000e+00> : vector<2x96xf32>
    %132 = tpu.matmul %127, %1, %cst_61 {dimension_numbers = #tpu.dot_dimension_numbers<[1], [0], [0], [1], [0, 0, 1, 1], [], []>, precision = #tpu.contract_precision<fp32>} : vector<2x16xf32>, vector<16x96xf32>, vector<2x96xf32> -> vector<2x96xf32>
    %133 = arith.addf %131, %132 : vector<2x96xf32>
    %134 = vector.broadcast %4 : vector<1x96xf32> to vector<2x96xf32>
    %135 = arith.addf %133, %134 : vector<2x96xf32>
    %cst_62 = arith.constant dense<0.000000e+00> : vector<2x96xf32>
    %136 = tpu.matmul %110, %2, %cst_62 {dimension_numbers = #tpu.dot_dimension_numbers<[1], [0], [0], [1], [0, 0, 1, 1], [], []>, precision = #tpu.contract_precision<fp32>} : vector<2x32xf32>, vector<32x96xf32>, vector<2x96xf32> -> vector<2x96xf32>
    %137 = vector.extract_strided_slice %135 {offsets = [0, 0], sizes = [2, 32], strides = [1, 1]} : vector<2x96xf32> to vector<2x32xf32>
    %138 = vector.extract_strided_slice %136 {offsets = [0, 0], sizes = [2, 32], strides = [1, 1]} : vector<2x96xf32> to vector<2x32xf32>
    %139 = arith.addf %137, %138 : vector<2x32xf32>
    %140 = arith.negf %139 : vector<2x32xf32>
    %141 = math.exp %140 : vector<2x32xf32>
    %cst_63 = arith.constant 1.000000e+00 : f32
    %142 = vector.broadcast %cst_63 : f32 to vector<2x32xf32>
    %143 = arith.addf %142, %141 : vector<2x32xf32>
    %144 = arith.divf %142, %143 : vector<2x32xf32>
    %145 = vector.extract_strided_slice %135 {offsets = [0, 32], sizes = [2, 32], strides = [1, 1]} : vector<2x96xf32> to vector<2x32xf32>
    %146 = vector.extract_strided_slice %136 {offsets = [0, 32], sizes = [2, 32], strides = [1, 1]} : vector<2x96xf32> to vector<2x32xf32>
    %147 = arith.addf %145, %146 : vector<2x32xf32>
    %148 = arith.negf %147 : vector<2x32xf32>
    %149 = math.exp %148 : vector<2x32xf32>
    %cst_64 = arith.constant 1.000000e+00 : f32
    %150 = vector.broadcast %cst_64 : f32 to vector<2x32xf32>
    %151 = arith.addf %150, %149 : vector<2x32xf32>
    %152 = arith.divf %150, %151 : vector<2x32xf32>
    %153 = vector.extract_strided_slice %135 {offsets = [0, 64], sizes = [2, 32], strides = [1, 1]} : vector<2x96xf32> to vector<2x32xf32>
    %154 = vector.extract_strided_slice %136 {offsets = [0, 64], sizes = [2, 32], strides = [1, 1]} : vector<2x96xf32> to vector<2x32xf32>
    %155 = vector.broadcast %5 : vector<1x32xf32> to vector<2x32xf32>
    %156 = arith.addf %154, %155 : vector<2x32xf32>
    %157 = arith.mulf %144, %156 : vector<2x32xf32>
    %158 = arith.addf %153, %157 : vector<2x32xf32>
    %159 = math.tanh %158 : vector<2x32xf32>
    %cst_65 = arith.constant 1.000000e+00 : f32
    %160 = vector.broadcast %cst_65 : f32 to vector<2x32xf32>
    %161 = arith.subf %160, %152 : vector<2x32xf32>
    %162 = arith.mulf %161, %159 : vector<2x32xf32>
    %163 = arith.mulf %152, %110 : vector<2x32xf32>
    %164 = arith.addf %162, %163 : vector<2x32xf32>
    %cst_66 = arith.constant dense<0.000000e+00> : vector<2x16xf32>
    %165 = tpu.matmul %164, %3, %cst_66 {dimension_numbers = #tpu.dot_dimension_numbers<[1], [0], [0], [1], [0, 0, 1, 1], [], []>, precision = #tpu.contract_precision<fp32>} : vector<2x32xf32>, vector<32x16xf32>, vector<2x16xf32> -> vector<2x16xf32>
    %166 = vector.broadcast %6 : vector<1x16xf32> to vector<2x16xf32>
    %167 = arith.addf %165, %166 : vector<2x16xf32>
    %168 = vector.shape_cast %164 : vector<2x32xf32> to vector<2x1x32xf32>
    %c1_i32_67 = arith.constant 1 : i32
    %169 = arith.addi %c2_i32, %c1_i32_67 : i32
    %c0_68 = arith.constant 0 : index
    %170 = arith.index_cast %169 : i32 to index
    %c0_69 = arith.constant 0 : index
    %171 = vector.load %arg10[%c0_68, %170, %c0_69] : memref<2x8x32xf32, #tpu.memory_space<vmem>>, vector<2x1x32xf32>
    tpu.vector_store %arg10[%c0_68, %170, %c0_69], %168 {strides = array<i32>} : memref<2x8x32xf32, #tpu.memory_space<vmem>>, vector<2x1x32xf32>,
    %172 = vector.shape_cast %167 : vector<2x16xf32> to vector<2x1x16xf32>
    %c1_i32_70 = arith.constant 1 : i32
    %173 = arith.addi %c2_i32, %c1_i32_70 : i32
    %c0_71 = arith.constant 0 : index
    %174 = arith.index_cast %173 : i32 to index
    %c0_72 = arith.constant 0 : index
    %175 = vector.load %arg9[%c0_71, %174, %c0_72] : memref<2x8x16xf32, #tpu.memory_space<vmem>>, vector<2x1x16xf32>
    tpu.vector_store %arg9[%c0_71, %174, %c0_72], %172 {strides = array<i32>} : memref<2x8x16xf32, #tpu.memory_space<vmem>>, vector<2x1x16xf32>,
    %c3_i32 = arith.constant 3 : i32
    %c0_73 = arith.constant 0 : index
    %176 = arith.index_cast %c3_i32 : i32 to index
    %c0_74 = arith.constant 0 : index
    %177 = vector.load %arg0[%c0_73, %176, %c0_74] : memref<2x8x16xf32, #tpu.memory_space<vmem>>, vector<2x1x16xf32>
    %178 = vector.shape_cast %177 : vector<2x1x16xf32> to vector<2x16xf32>
    %c0_75 = arith.constant 0 : index
    %179 = arith.index_cast %c3_i32 : i32 to index
    %c0_76 = arith.constant 0 : index
    %180 = vector.load %arg1[%c0_75, %179, %c0_76] : memref<2x8x16xf32, #tpu.memory_space<vmem>>, vector<2x1x16xf32>
    %181 = vector.shape_cast %180 : vector<2x1x16xf32> to vector<2x16xf32>
    %cst_77 = arith.constant 0.000000e+00 : f32
    %182 = vector.broadcast %cst_77 : f32 to vector<2x16xf32>
    %183 = arith.cmpf one, %181, %182 : vector<2x16xf32>
    %184 = arith.select %183, %178, %167 : vector<2x16xi1>, vector<2x16xf32>
    %cst_78 = arith.constant dense<0.000000e+00> : vector<2x96xf32>
    %185 = tpu.matmul %184, %0, %cst_78 {dimension_numbers = #tpu.dot_dimension_numbers<[1], [0], [0], [1], [0, 0, 1, 1], [], []>, precision = #tpu.contract_precision<fp32>} : vector<2x16xf32>, vector<16x96xf32>, vector<2x96xf32> -> vector<2x96xf32>
    %cst_79 = arith.constant dense<0.000000e+00> : vector<2x96xf32>
    %186 = tpu.matmul %181, %1, %cst_79 {dimension_numbers = #tpu.dot_dimension_numbers<[1], [0], [0], [1], [0, 0, 1, 1], [], []>, precision = #tpu.contract_precision<fp32>} : vector<2x16xf32>, vector<16x96xf32>, vector<2x96xf32> -> vector<2x96xf32>
    %187 = arith.addf %185, %186 : vector<2x96xf32>
    %188 = vector.broadcast %4 : vector<1x96xf32> to vector<2x96xf32>
    %189 = arith.addf %187, %188 : vector<2x96xf32>
    %cst_80 = arith.constant dense<0.000000e+00> : vector<2x96xf32>
    %190 = tpu.matmul %164, %2, %cst_80 {dimension_numbers = #tpu.dot_dimension_numbers<[1], [0], [0], [1], [0, 0, 1, 1], [], []>, precision = #tpu.contract_precision<fp32>} : vector<2x32xf32>, vector<32x96xf32>, vector<2x96xf32> -> vector<2x96xf32>
    %191 = vector.extract_strided_slice %189 {offsets = [0, 0], sizes = [2, 32], strides = [1, 1]} : vector<2x96xf32> to vector<2x32xf32>
    %192 = vector.extract_strided_slice %190 {offsets = [0, 0], sizes = [2, 32], strides = [1, 1]} : vector<2x96xf32> to vector<2x32xf32>
    %193 = arith.addf %191, %192 : vector<2x32xf32>
    %194 = arith.negf %193 : vector<2x32xf32>
    %195 = math.exp %194 : vector<2x32xf32>
    %cst_81 = arith.constant 1.000000e+00 : f32
    %196 = vector.broadcast %cst_81 : f32 to vector<2x32xf32>
    %197 = arith.addf %196, %195 : vector<2x32xf32>
    %198 = arith.divf %196, %197 : vector<2x32xf32>
    %199 = vector.extract_strided_slice %189 {offsets = [0, 32], sizes = [2, 32], strides = [1, 1]} : vector<2x96xf32> to vector<2x32xf32>
    %200 = vector.extract_strided_slice %190 {offsets = [0, 32], sizes = [2, 32], strides = [1, 1]} : vector<2x96xf32> to vector<2x32xf32>
    %201 = arith.addf %199, %200 : vector<2x32xf32>
    %202 = arith.negf %201 : vector<2x32xf32>
    %203 = math.exp %202 : vector<2x32xf32>
    %cst_82 = arith.constant 1.000000e+00 : f32
    %204 = vector.broadcast %cst_82 : f32 to vector<2x32xf32>
    %205 = arith.addf %204, %203 : vector<2x32xf32>
    %206 = arith.divf %204, %205 : vector<2x32xf32>
    %207 = vector.extract_strided_slice %189 {offsets = [0, 64], sizes = [2, 32], strides = [1, 1]} : vector<2x96xf32> to vector<2x32xf32>
    %208 = vector.extract_strided_slice %190 {offsets = [0, 64], sizes = [2, 32], strides = [1, 1]} : vector<2x96xf32> to vector<2x32xf32>
    %209 = vector.broadcast %5 : vector<1x32xf32> to vector<2x32xf32>
    %210 = arith.addf %208, %209 : vector<2x32xf32>
    %211 = arith.mulf %198, %210 : vector<2x32xf32>
    %212 = arith.addf %207, %211 : vector<2x32xf32>
    %213 = math.tanh %212 : vector<2x32xf32>
    %cst_83 = arith.constant 1.000000e+00 : f32
    %214 = vector.broadcast %cst_83 : f32 to vector<2x32xf32>
    %215 = arith.subf %214, %206 : vector<2x32xf32>
    %216 = arith.mulf %215, %213 : vector<2x32xf32>
    %217 = arith.mulf %206, %164 : vector<2x32xf32>
    %218 = arith.addf %216, %217 : vector<2x32xf32>
    %cst_84 = arith.constant dense<0.000000e+00> : vector<2x16xf32>
    %219 = tpu.matmul %218, %3, %cst_84 {dimension_numbers = #tpu.dot_dimension_numbers<[1], [0], [0], [1], [0, 0, 1, 1], [], []>, precision = #tpu.contract_precision<fp32>} : vector<2x32xf32>, vector<32x16xf32>, vector<2x16xf32> -> vector<2x16xf32>
    %220 = vector.broadcast %6 : vector<1x16xf32> to vector<2x16xf32>
    %221 = arith.addf %219, %220 : vector<2x16xf32>
    %222 = vector.shape_cast %218 : vector<2x32xf32> to vector<2x1x32xf32>
    %c1_i32_85 = arith.constant 1 : i32
    %223 = arith.addi %c3_i32, %c1_i32_85 : i32
    %c0_86 = arith.constant 0 : index
    %224 = arith.index_cast %223 : i32 to index
    %c0_87 = arith.constant 0 : index
    %225 = vector.load %arg10[%c0_86, %224, %c0_87] : memref<2x8x32xf32, #tpu.memory_space<vmem>>, vector<2x1x32xf32>
    tpu.vector_store %arg10[%c0_86, %224, %c0_87], %222 {strides = array<i32>} : memref<2x8x32xf32, #tpu.memory_space<vmem>>, vector<2x1x32xf32>,
    %226 = vector.shape_cast %221 : vector<2x16xf32> to vector<2x1x16xf32>
    %c1_i32_88 = arith.constant 1 : i32
    %227 = arith.addi %c3_i32, %c1_i32_88 : i32
    %c0_89 = arith.constant 0 : index
    %228 = arith.index_cast %227 : i32 to index
    %c0_90 = arith.constant 0 : index
    %229 = vector.load %arg9[%c0_89, %228, %c0_90] : memref<2x8x16xf32, #tpu.memory_space<vmem>>, vector<2x1x16xf32>
    tpu.vector_store %arg9[%c0_89, %228, %c0_90], %226 {strides = array<i32>} : memref<2x8x16xf32, #tpu.memory_space<vmem>>, vector<2x1x16xf32>,
    %c4_i32 = arith.constant 4 : i32
    %c0_91 = arith.constant 0 : index
    %230 = arith.index_cast %c4_i32 : i32 to index
    %c0_92 = arith.constant 0 : index
    %231 = vector.load %arg0[%c0_91, %230, %c0_92] : memref<2x8x16xf32, #tpu.memory_space<vmem>>, vector<2x1x16xf32>
    %232 = vector.shape_cast %231 : vector<2x1x16xf32> to vector<2x16xf32>
    %c0_93 = arith.constant 0 : index
    %233 = arith.index_cast %c4_i32 : i32 to index
    %c0_94 = arith.constant 0 : index
    %234 = vector.load %arg1[%c0_93, %233, %c0_94] : memref<2x8x16xf32, #tpu.memory_space<vmem>>, vector<2x1x16xf32>
    %235 = vector.shape_cast %234 : vector<2x1x16xf32> to vector<2x16xf32>
    %cst_95 = arith.constant 0.000000e+00 : f32
    %236 = vector.broadcast %cst_95 : f32 to vector<2x16xf32>
    %237 = arith.cmpf one, %235, %236 : vector<2x16xf32>
    %238 = arith.select %237, %232, %221 : vector<2x16xi1>, vector<2x16xf32>
    %cst_96 = arith.constant dense<0.000000e+00> : vector<2x96xf32>
    %239 = tpu.matmul %238, %0, %cst_96 {dimension_numbers = #tpu.dot_dimension_numbers<[1], [0], [0], [1], [0, 0, 1, 1], [], []>, precision = #tpu.contract_precision<fp32>} : vector<2x16xf32>, vector<16x96xf32>, vector<2x96xf32> -> vector<2x96xf32>
    %cst_97 = arith.constant dense<0.000000e+00> : vector<2x96xf32>
    %240 = tpu.matmul %235, %1, %cst_97 {dimension_numbers = #tpu.dot_dimension_numbers<[1], [0], [0], [1], [0, 0, 1, 1], [], []>, precision = #tpu.contract_precision<fp32>} : vector<2x16xf32>, vector<16x96xf32>, vector<2x96xf32> -> vector<2x96xf32>
    %241 = arith.addf %239, %240 : vector<2x96xf32>
    %242 = vector.broadcast %4 : vector<1x96xf32> to vector<2x96xf32>
    %243 = arith.addf %241, %242 : vector<2x96xf32>
    %cst_98 = arith.constant dense<0.000000e+00> : vector<2x96xf32>
    %244 = tpu.matmul %218, %2, %cst_98 {dimension_numbers = #tpu.dot_dimension_numbers<[1], [0], [0], [1], [0, 0, 1, 1], [], []>, precision = #tpu.contract_precision<fp32>} : vector<2x32xf32>, vector<32x96xf32>, vector<2x96xf32> -> vector<2x96xf32>
    %245 = vector.extract_strided_slice %243 {offsets = [0, 0], sizes = [2, 32], strides = [1, 1]} : vector<2x96xf32> to vector<2x32xf32>
    %246 = vector.extract_strided_slice %244 {offsets = [0, 0], sizes = [2, 32], strides = [1, 1]} : vector<2x96xf32> to vector<2x32xf32>
    %247 = arith.addf %245, %246 : vector<2x32xf32>
    %248 = arith.negf %247 : vector<2x32xf32>
    %249 = math.exp %248 : vector<2x32xf32>
    %cst_99 = arith.constant 1.000000e+00 : f32
    %250 = vector.broadcast %cst_99 : f32 to vector<2x32xf32>
    %251 = arith.addf %250, %249 : vector<2x32xf32>
    %252 = arith.divf %250, %251 : vector<2x32xf32>
    %253 = vector.extract_strided_slice %243 {offsets = [0, 32], sizes = [2, 32], strides = [1, 1]} : vector<2x96xf32> to vector<2x32xf32>
    %254 = vector.extract_strided_slice %244 {offsets = [0, 32], sizes = [2, 32], strides = [1, 1]} : vector<2x96xf32> to vector<2x32xf32>
    %255 = arith.addf %253, %254 : vector<2x32xf32>
    %256 = arith.negf %255 : vector<2x32xf32>
    %257 = math.exp %256 : vector<2x32xf32>
    %cst_100 = arith.constant 1.000000e+00 : f32
    %258 = vector.broadcast %cst_100 : f32 to vector<2x32xf32>
    %259 = arith.addf %258, %257 : vector<2x32xf32>
    %260 = arith.divf %258, %259 : vector<2x32xf32>
    %261 = vector.extract_strided_slice %243 {offsets = [0, 64], sizes = [2, 32], strides = [1, 1]} : vector<2x96xf32> to vector<2x32xf32>
    %262 = vector.extract_strided_slice %244 {offsets = [0, 64], sizes = [2, 32], strides = [1, 1]} : vector<2x96xf32> to vector<2x32xf32>
    %263 = vector.broadcast %5 : vector<1x32xf32> to vector<2x32xf32>
    %264 = arith.addf %262, %263 : vector<2x32xf32>
    %265 = arith.mulf %252, %264 : vector<2x32xf32>
    %266 = arith.addf %261, %265 : vector<2x32xf32>
    %267 = math.tanh %266 : vector<2x32xf32>
    %cst_101 = arith.constant 1.000000e+00 : f32
    %268 = vector.broadcast %cst_101 : f32 to vector<2x32xf32>
    %269 = arith.subf %268, %260 : vector<2x32xf32>
    %270 = arith.mulf %269, %267 : vector<2x32xf32>
    %271 = arith.mulf %260, %218 : vector<2x32xf32>
    %272 = arith.addf %270, %271 : vector<2x32xf32>
    %cst_102 = arith.constant dense<0.000000e+00> : vector<2x16xf32>
    %273 = tpu.matmul %272, %3, %cst_102 {dimension_numbers = #tpu.dot_dimension_numbers<[1], [0], [0], [1], [0, 0, 1, 1], [], []>, precision = #tpu.contract_precision<fp32>} : vector<2x32xf32>, vector<32x16xf32>, vector<2x16xf32> -> vector<2x16xf32>
    %274 = vector.broadcast %6 : vector<1x16xf32> to vector<2x16xf32>
    %275 = arith.addf %273, %274 : vector<2x16xf32>
    %276 = vector.shape_cast %272 : vector<2x32xf32> to vector<2x1x32xf32>
    %c1_i32_103 = arith.constant 1 : i32
    %277 = arith.addi %c4_i32, %c1_i32_103 : i32
    %c0_104 = arith.constant 0 : index
    %278 = arith.index_cast %277 : i32 to index
    %c0_105 = arith.constant 0 : index
    %279 = vector.load %arg10[%c0_104, %278, %c0_105] : memref<2x8x32xf32, #tpu.memory_space<vmem>>, vector<2x1x32xf32>
    tpu.vector_store %arg10[%c0_104, %278, %c0_105], %276 {strides = array<i32>} : memref<2x8x32xf32, #tpu.memory_space<vmem>>, vector<2x1x32xf32>,
    %280 = vector.shape_cast %275 : vector<2x16xf32> to vector<2x1x16xf32>
    %c1_i32_106 = arith.constant 1 : i32
    %281 = arith.addi %c4_i32, %c1_i32_106 : i32
    %c0_107 = arith.constant 0 : index
    %282 = arith.index_cast %281 : i32 to index
    %c0_108 = arith.constant 0 : index
    %283 = vector.load %arg9[%c0_107, %282, %c0_108] : memref<2x8x16xf32, #tpu.memory_space<vmem>>, vector<2x1x16xf32>
    tpu.vector_store %arg9[%c0_107, %282, %c0_108], %280 {strides = array<i32>} : memref<2x8x16xf32, #tpu.memory_space<vmem>>, vector<2x1x16xf32>,
    %c5_i32 = arith.constant 5 : i32
    %c0_109 = arith.constant 0 : index
    %284 = arith.index_cast %c5_i32 : i32 to index
    %c0_110 = arith.constant 0 : index
    %285 = vector.load %arg0[%c0_109, %284, %c0_110] : memref<2x8x16xf32, #tpu.memory_space<vmem>>, vector<2x1x16xf32>
    %286 = vector.shape_cast %285 : vector<2x1x16xf32> to vector<2x16xf32>
    %c0_111 = arith.constant 0 : index
    %287 = arith.index_cast %c5_i32 : i32 to index
    %c0_112 = arith.constant 0 : index
    %288 = vector.load %arg1[%c0_111, %287, %c0_112] : memref<2x8x16xf32, #tpu.memory_space<vmem>>, vector<2x1x16xf32>
    %289 = vector.shape_cast %288 : vector<2x1x16xf32> to vector<2x16xf32>
    %cst_113 = arith.constant 0.000000e+00 : f32
    %290 = vector.broadcast %cst_113 : f32 to vector<2x16xf32>
    %291 = arith.cmpf one, %289, %290 : vector<2x16xf32>
    %292 = arith.select %291, %286, %275 : vector<2x16xi1>, vector<2x16xf32>
    %cst_114 = arith.constant dense<0.000000e+00> : vector<2x96xf32>
    %293 = tpu.matmul %292, %0, %cst_114 {dimension_numbers = #tpu.dot_dimension_numbers<[1], [0], [0], [1], [0, 0, 1, 1], [], []>, precision = #tpu.contract_precision<fp32>} : vector<2x16xf32>, vector<16x96xf32>, vector<2x96xf32> -> vector<2x96xf32>
    %cst_115 = arith.constant dense<0.000000e+00> : vector<2x96xf32>
    %294 = tpu.matmul %289, %1, %cst_115 {dimension_numbers = #tpu.dot_dimension_numbers<[1], [0], [0], [1], [0, 0, 1, 1], [], []>, precision = #tpu.contract_precision<fp32>} : vector<2x16xf32>, vector<16x96xf32>, vector<2x96xf32> -> vector<2x96xf32>
    %295 = arith.addf %293, %294 : vector<2x96xf32>
    %296 = vector.broadcast %4 : vector<1x96xf32> to vector<2x96xf32>
    %297 = arith.addf %295, %296 : vector<2x96xf32>
    %cst_116 = arith.constant dense<0.000000e+00> : vector<2x96xf32>
    %298 = tpu.matmul %272, %2, %cst_116 {dimension_numbers = #tpu.dot_dimension_numbers<[1], [0], [0], [1], [0, 0, 1, 1], [], []>, precision = #tpu.contract_precision<fp32>} : vector<2x32xf32>, vector<32x96xf32>, vector<2x96xf32> -> vector<2x96xf32>
    %299 = vector.extract_strided_slice %297 {offsets = [0, 0], sizes = [2, 32], strides = [1, 1]} : vector<2x96xf32> to vector<2x32xf32>
    %300 = vector.extract_strided_slice %298 {offsets = [0, 0], sizes = [2, 32], strides = [1, 1]} : vector<2x96xf32> to vector<2x32xf32>
    %301 = arith.addf %299, %300 : vector<2x32xf32>
    %302 = arith.negf %301 : vector<2x32xf32>
    %303 = math.exp %302 : vector<2x32xf32>
    %cst_117 = arith.constant 1.000000e+00 : f32
    %304 = vector.broadcast %cst_117 : f32 to vector<2x32xf32>
    %305 = arith.addf %304, %303 : vector<2x32xf32>
    %306 = arith.divf %304, %305 : vector<2x32xf32>
    %307 = vector.extract_strided_slice %297 {offsets = [0, 32], sizes = [2, 32], strides = [1, 1]} : vector<2x96xf32> to vector<2x32xf32>
    %308 = vector.extract_strided_slice %298 {offsets = [0, 32], sizes = [2, 32], strides = [1, 1]} : vector<2x96xf32> to vector<2x32xf32>
    %309 = arith.addf %307, %308 : vector<2x32xf32>
    %310 = arith.negf %309 : vector<2x32xf32>
    %311 = math.exp %310 : vector<2x32xf32>
    %cst_118 = arith.constant 1.000000e+00 : f32
    %312 = vector.broadcast %cst_118 : f32 to vector<2x32xf32>
    %313 = arith.addf %312, %311 : vector<2x32xf32>
    %314 = arith.divf %312, %313 : vector<2x32xf32>
    %315 = vector.extract_strided_slice %297 {offsets = [0, 64], sizes = [2, 32], strides = [1, 1]} : vector<2x96xf32> to vector<2x32xf32>
    %316 = vector.extract_strided_slice %298 {offsets = [0, 64], sizes = [2, 32], strides = [1, 1]} : vector<2x96xf32> to vector<2x32xf32>
    %317 = vector.broadcast %5 : vector<1x32xf32> to vector<2x32xf32>
    %318 = arith.addf %316, %317 : vector<2x32xf32>
    %319 = arith.mulf %306, %318 : vector<2x32xf32>
    %320 = arith.addf %315, %319 : vector<2x32xf32>
    %321 = math.tanh %320 : vector<2x32xf32>
    %cst_119 = arith.constant 1.000000e+00 : f32
    %322 = vector.broadcast %cst_119 : f32 to vector<2x32xf32>
    %323 = arith.subf %322, %314 : vector<2x32xf32>
    %324 = arith.mulf %323, %321 : vector<2x32xf32>
    %325 = arith.mulf %314, %272 : vector<2x32xf32>
    %326 = arith.addf %324, %325 : vector<2x32xf32>
    %cst_120 = arith.constant dense<0.000000e+00> : vector<2x16xf32>
    %327 = tpu.matmul %326, %3, %cst_120 {dimension_numbers = #tpu.dot_dimension_numbers<[1], [0], [0], [1], [0, 0, 1, 1], [], []>, precision = #tpu.contract_precision<fp32>} : vector<2x32xf32>, vector<32x16xf32>, vector<2x16xf32> -> vector<2x16xf32>
    %328 = vector.broadcast %6 : vector<1x16xf32> to vector<2x16xf32>
    %329 = arith.addf %327, %328 : vector<2x16xf32>
    %330 = vector.shape_cast %326 : vector<2x32xf32> to vector<2x1x32xf32>
    %c1_i32_121 = arith.constant 1 : i32
    %331 = arith.addi %c5_i32, %c1_i32_121 : i32
    %c0_122 = arith.constant 0 : index
    %332 = arith.index_cast %331 : i32 to index
    %c0_123 = arith.constant 0 : index
    %333 = vector.load %arg10[%c0_122, %332, %c0_123] : memref<2x8x32xf32, #tpu.memory_space<vmem>>, vector<2x1x32xf32>
    tpu.vector_store %arg10[%c0_122, %332, %c0_123], %330 {strides = array<i32>} : memref<2x8x32xf32, #tpu.memory_space<vmem>>, vector<2x1x32xf32>,
    %334 = vector.shape_cast %329 : vector<2x16xf32> to vector<2x1x16xf32>
    %c1_i32_124 = arith.constant 1 : i32
    %335 = arith.addi %c5_i32, %c1_i32_124 : i32
    %c0_125 = arith.constant 0 : index
    %336 = arith.index_cast %335 : i32 to index
    %c0_126 = arith.constant 0 : index
    %337 = vector.load %arg9[%c0_125, %336, %c0_126] : memref<2x8x16xf32, #tpu.memory_space<vmem>>, vector<2x1x16xf32>
    tpu.vector_store %arg9[%c0_125, %336, %c0_126], %334 {strides = array<i32>} : memref<2x8x16xf32, #tpu.memory_space<vmem>>, vector<2x1x16xf32>,
    %c6_i32 = arith.constant 6 : i32
    %c0_127 = arith.constant 0 : index
    %338 = arith.index_cast %c6_i32 : i32 to index
    %c0_128 = arith.constant 0 : index
    %339 = vector.load %arg0[%c0_127, %338, %c0_128] : memref<2x8x16xf32, #tpu.memory_space<vmem>>, vector<2x1x16xf32>
    %340 = vector.shape_cast %339 : vector<2x1x16xf32> to vector<2x16xf32>
    %c0_129 = arith.constant 0 : index
    %341 = arith.index_cast %c6_i32 : i32 to index
    %c0_130 = arith.constant 0 : index
    %342 = vector.load %arg1[%c0_129, %341, %c0_130] : memref<2x8x16xf32, #tpu.memory_space<vmem>>, vector<2x1x16xf32>
    %343 = vector.shape_cast %342 : vector<2x1x16xf32> to vector<2x16xf32>
    %cst_131 = arith.constant 0.000000e+00 : f32
    %344 = vector.broadcast %cst_131 : f32 to vector<2x16xf32>
    %345 = arith.cmpf one, %343, %344 : vector<2x16xf32>
    %346 = arith.select %345, %340, %329 : vector<2x16xi1>, vector<2x16xf32>
    %cst_132 = arith.constant dense<0.000000e+00> : vector<2x96xf32>
    %347 = tpu.matmul %346, %0, %cst_132 {dimension_numbers = #tpu.dot_dimension_numbers<[1], [0], [0], [1], [0, 0, 1, 1], [], []>, precision = #tpu.contract_precision<fp32>} : vector<2x16xf32>, vector<16x96xf32>, vector<2x96xf32> -> vector<2x96xf32>
    %cst_133 = arith.constant dense<0.000000e+00> : vector<2x96xf32>
    %348 = tpu.matmul %343, %1, %cst_133 {dimension_numbers = #tpu.dot_dimension_numbers<[1], [0], [0], [1], [0, 0, 1, 1], [], []>, precision = #tpu.contract_precision<fp32>} : vector<2x16xf32>, vector<16x96xf32>, vector<2x96xf32> -> vector<2x96xf32>
    %349 = arith.addf %347, %348 : vector<2x96xf32>
    %350 = vector.broadcast %4 : vector<1x96xf32> to vector<2x96xf32>
    %351 = arith.addf %349, %350 : vector<2x96xf32>
    %cst_134 = arith.constant dense<0.000000e+00> : vector<2x96xf32>
    %352 = tpu.matmul %326, %2, %cst_134 {dimension_numbers = #tpu.dot_dimension_numbers<[1], [0], [0], [1], [0, 0, 1, 1], [], []>, precision = #tpu.contract_precision<fp32>} : vector<2x32xf32>, vector<32x96xf32>, vector<2x96xf32> -> vector<2x96xf32>
    %353 = vector.extract_strided_slice %351 {offsets = [0, 0], sizes = [2, 32], strides = [1, 1]} : vector<2x96xf32> to vector<2x32xf32>
    %354 = vector.extract_strided_slice %352 {offsets = [0, 0], sizes = [2, 32], strides = [1, 1]} : vector<2x96xf32> to vector<2x32xf32>
    %355 = arith.addf %353, %354 : vector<2x32xf32>
    %356 = arith.negf %355 : vector<2x32xf32>
    %357 = math.exp %356 : vector<2x32xf32>
    %cst_135 = arith.constant 1.000000e+00 : f32
    %358 = vector.broadcast %cst_135 : f32 to vector<2x32xf32>
    %359 = arith.addf %358, %357 : vector<2x32xf32>
    %360 = arith.divf %358, %359 : vector<2x32xf32>
    %361 = vector.extract_strided_slice %351 {offsets = [0, 32], sizes = [2, 32], strides = [1, 1]} : vector<2x96xf32> to vector<2x32xf32>
    %362 = vector.extract_strided_slice %352 {offsets = [0, 32], sizes = [2, 32], strides = [1, 1]} : vector<2x96xf32> to vector<2x32xf32>
    %363 = arith.addf %361, %362 : vector<2x32xf32>
    %364 = arith.negf %363 : vector<2x32xf32>
    %365 = math.exp %364 : vector<2x32xf32>
    %cst_136 = arith.constant 1.000000e+00 : f32
    %366 = vector.broadcast %cst_136 : f32 to vector<2x32xf32>
    %367 = arith.addf %366, %365 : vector<2x32xf32>
    %368 = arith.divf %366, %367 : vector<2x32xf32>
    %369 = vector.extract_strided_slice %351 {offsets = [0, 64], sizes = [2, 32], strides = [1, 1]} : vector<2x96xf32> to vector<2x32xf32>
    %370 = vector.extract_strided_slice %352 {offsets = [0, 64], sizes = [2, 32], strides = [1, 1]} : vector<2x96xf32> to vector<2x32xf32>
    %371 = vector.broadcast %5 : vector<1x32xf32> to vector<2x32xf32>
    %372 = arith.addf %370, %371 : vector<2x32xf32>
    %373 = arith.mulf %360, %372 : vector<2x32xf32>
    %374 = arith.addf %369, %373 : vector<2x32xf32>
    %375 = math.tanh %374 : vector<2x32xf32>
    %cst_137 = arith.constant 1.000000e+00 : f32
    %376 = vector.broadcast %cst_137 : f32 to vector<2x32xf32>
    %377 = arith.subf %376, %368 : vector<2x32xf32>
    %378 = arith.mulf %377, %375 : vector<2x32xf32>
    %379 = arith.mulf %368, %326 : vector<2x32xf32>
    %380 = arith.addf %378, %379 : vector<2x32xf32>
    %cst_138 = arith.constant dense<0.000000e+00> : vector<2x16xf32>
    %381 = tpu.matmul %380, %3, %cst_138 {dimension_numbers = #tpu.dot_dimension_numbers<[1], [0], [0], [1], [0, 0, 1, 1], [], []>, precision = #tpu.contract_precision<fp32>} : vector<2x32xf32>, vector<32x16xf32>, vector<2x16xf32> -> vector<2x16xf32>
    %382 = vector.broadcast %6 : vector<1x16xf32> to vector<2x16xf32>
    %383 = arith.addf %381, %382 : vector<2x16xf32>
    %384 = vector.shape_cast %380 : vector<2x32xf32> to vector<2x1x32xf32>
    %c1_i32_139 = arith.constant 1 : i32
    %385 = arith.addi %c6_i32, %c1_i32_139 : i32
    %c0_140 = arith.constant 0 : index
    %386 = arith.index_cast %385 : i32 to index
    %c0_141 = arith.constant 0 : index
    %387 = vector.load %arg10[%c0_140, %386, %c0_141] : memref<2x8x32xf32, #tpu.memory_space<vmem>>, vector<2x1x32xf32>
    tpu.vector_store %arg10[%c0_140, %386, %c0_141], %384 {strides = array<i32>} : memref<2x8x32xf32, #tpu.memory_space<vmem>>, vector<2x1x32xf32>,
    %388 = vector.shape_cast %383 : vector<2x16xf32> to vector<2x1x16xf32>
    %c1_i32_142 = arith.constant 1 : i32
    %389 = arith.addi %c6_i32, %c1_i32_142 : i32
    %c0_143 = arith.constant 0 : index
    %390 = arith.index_cast %389 : i32 to index
    %c0_144 = arith.constant 0 : index
    %391 = vector.load %arg9[%c0_143, %390, %c0_144] : memref<2x8x16xf32, #tpu.memory_space<vmem>>, vector<2x1x16xf32>
    tpu.vector_store %arg9[%c0_143, %390, %c0_144], %388 {strides = array<i32>} : memref<2x8x16xf32, #tpu.memory_space<vmem>>, vector<2x1x16xf32>,
    %c7_i32 = arith.constant 7 : i32
    return
  }
}

</mosaic_0001>

<bundles_post_ra>
// kernel: rnn_imputer_forward.1
= control target key start
LH: loop header
LB: loop body
LE: loop exit
PB: predicated region body
PF: predicated region fallthrough
CT: control target
= control target key end

     0   :  { %v62_v2 = vlaneseq  ;;  %v17362_v3 = vmov 0.0|0.0   ;;  %vm17363_vm0 = vmmov 0   ;;  %v17364_v6 = vmov 0.0   ;;  %s18968_s0 = inlined_call_operand.vmem [shape: f32[2,8,16], index: 0, kind: input, shape index: {}]   ;;  %s18969_s1 = inlined_call_operand.vmem [shape: f32[2,8,16], index: 1, kind: input, shape index: {}]   ;;  %s18970_s2 = inlined_call_operand.vmem [shape: f32[16,96], index: 2, kind: input, shape index: {}]   ;;  %s18971_s3 = inlined_call_operand.vmem [shape: f32[16,96], index: 3, kind: input, shape index: {}]   ;;  %s18972_s4 = inlined_call_operand.vmem [shape: f32[32,96], index: 4, kind: input, shape index: {}]   ;;  %s18973_s5 = inlined_call_operand.vmem [shape: f32[1,96], index: 5, kind: input, shape index: {}]   ;;  %s18974_s6 = inlined_call_operand.vmem [shape: f32[1,32], index: 6, kind: input, shape index: {}]   ;;  %s18975_s7 = inlined_call_operand.vmem [shape: f32[32,16], index: 7, kind: input, shape index: {}]   ;;  %s18976_s8 = inlined_call_operand.vmem [shape: f32[1,16], index: 8, kind: input, shape index: {}]   ;;  %s18977_s9 = inlined_call_operand.vmem [shape: f32[2,8,16], index: 9, kind: output, shape index: {0}]   ;;  %s18978_s10 = inlined_call_operand.hbm [shape: f32[2,8,32], index: 10, kind: output, shape index: {1}]  }
   0x1   :  { %v37_v0 = vld [vmem:[%s18971_s3] sm:$0xff]  ;;  %v38_v1 = vld [vmem:[%s18971_s3 + $0x8] sm:$0xff]  ;;  %16380 = vmatprep.subr.bf16.mxu0 %v17362_v3  ;;  %16383 = vmatprep.subr.bf16.mxu1 %v17362_v3  ;;  %v17365_v7 = vmov 1966171168   ;;  %vm97_vm1 = vcmask 1041409   ;;  %vm99_vm2 = vcmask 130048  }
   0x2   :  { %v103_v4 = vand.u32 4294901760, %v37_v0  ;;  %v106_v5 = vand.u32 4294901760, %v38_v1  ;;  %14872 = vmatprep.mubr.msk.f32.mxu0 %vm17363_vm0, %v17364_v6  ;;  %v60_v8 = vunpack.c.l.s4 %v17365_v7  ;;  %v17436_v9 = vshrl.u32 %v62_v2, 7  ;;  %14879 = vmatprep.mubr.msk.f32.mxu1 %vm17363_vm0, %v17364_v6  ;;  %v88_v13 = vld [vmem:[%s18969_s1] sm:$0x1]  ;;  %v17465_v19 = vld [vmem:[%s18970_s2 + $0x8] sm:$0xff] }
   0x3   :  { %v89_v14 = vld [vmem:[%s18969_s1 + $0x8] sm:$0x1]  ;;  %v17455_v15 = vld [vmem:[%s18970_s2] sm:$0xff] }
   0x4   :  { %v17440_v10 = vpack.c.bf16 %v106_v5, %v103_v4  ;;  %v17442_v11 = vsub.f32 %v37_v0, %v103_v4  ;;  %v17444_v12 = vsub.f32 %v38_v1, %v106_v5  ;;  %v17460_v16 = vld [vmem:[%s18976_s8] ss:$0 sm:$0xff]  ;;  %v61_v17 = vunpack.c.0.s8 %v60_v8  ;;  %v87_v22 = vld [vmem:[%s18968_s0 + $0x8] sm:$0x1] }
   0x5   :  { %v96_v18 = vrot.slane %v89_v14, 7  ;;  %vm91_vm3 = vcmp.ne.f32.partialorder %v89_v14, 0.0  ;;  %v568_v25 = vand.u32 4294901760, %v17455_v15  ;;  %v14189_v26 = vld [vmem:[%s18974_s6] ss:$0 sm:$0xff] }
   0x6   :  { %16382 = vmatpush3.bf16.msra.mxu0 %v17440_v10  ;;  %v182_v20 = vand.u32 4294901760, %v17442_v11  ;;  %v189_v21 = vand.u32 4294901760, %v17444_v12  ;;  %v17475_v23 = vsub.s32 %v61_v17, %v17436_v9 }
   0x7   :  { %16386 = vmatprep.subr.bf16.mxu0 %v17362_v3  ;;  %v98_v24 = vsel %vm97_vm1, %v96_v18, %v88_v13 }
   0x8   :  { %16 = vsyncpa [#allocation3], 0  ;;  %v183_v27 = vsub.f32 %v17442_v11, %v182_v20  ;;  %v190_v28 = vsub.f32 %v17444_v12, %v189_v21  ;;  %v86_v29 = vld [vmem:[%s18968_s0] sm:$0x1]  ;;  %vm90_vm4 = vcmp.ne.f32.partialorder %v88_v13, 0.0  ;;  %v100_v30 = vsel %vm99_vm2, %v98_v24, 0 }
   0x9   :  { %s17366_s11 = smov 64   ;;  %v65_v31 = vrot.slane %v17460_v16, %v17475_v23  ;;  %v17491_v32 = vand.u32 4294901760, %v100_v30  ;;  %v571_v33 = vand.u32 4294901760, %v17465_v19  ;;  %v17497_v34 = vsub.f32 %v17455_v15, %v568_v25  ;;  %v39_v62 = vld [vmem:[%s18972_s4] sm:$0xff]  ;;  %v40_v63 = vld [vmem:[%s18972_s4 + $0x8] sm:$0xff]  ;;  %v41_v7 = vld [vmem:[%s18972_s4 + $0x10] sm:$0xff] }
   0xa   :  { %1534 = vrot.lane.b32.xlu0 %v14189_v26, %s17366_s11  ;;  %v184_v35 = vand.u32 4294901760, %v183_v27  ;;  %v191_v36 = vand.u32 4294901760, %v190_v28  ;;  %vm83_vm5 = vcmask 122880   ;;  %v93_v37 = vsel %vm91_vm3, %v87_v22, %v17460_v16  ;;  %v42_v8 = vld [vmem:[%s18972_s4 + $0x18] sm:$0xff]  ;;  %s17367_s23 = smov 96  }
   0xb   :  { %v66_v38 = vcombine.high %v65_v31, %v65_v31  ;;  %v73_v39 = vrot.slane %v65_v31, %v17475_v23  ;;  %v92_v40 = vsel %vm90_vm4, %v86_v29, %v17460_v16  ;;  %v170_v41 = vsub.f32 %v100_v30, %v17491_v32 }
   0xc   :  { %v17504_v42 = vpack.c.bf16 %v191_v36, %v184_v35  ;;  %v647_v43 = vand.u32 4294901760, %v17497_v34  ;;  %v17508_v44 = vsub.f32 %v17465_v19, %v571_v33  ;;  %v563_v45 = vrot.slane %v93_v37, 7 }
   0xd   :  { %v80_v46 = vrot.slane %v66_v38, %v17475_v23  ;;  %84 = vst.msk [vmem:[%s18977_s9] sm:$0x1] %vm83_vm5, %v73_v39  ;;  %v171_v47 = vand.u32 4294901760, %v170_v41  ;;  %v17529_v53 = vpack.c.bf16 %v17444_v12, %v17442_v11  ;;  %v17543_v60 = vpack.c.bf16 %v189_v21, %v182_v20 }
   0xe   :  { %16385 = vmatpush3.bf16.msra.mxu1 %v17504_v42  ;;  %v648_v48 = vsub.f32 %v17497_v34, %v647_v43  ;;  %v654_v49 = vand.u32 4294901760, %v17508_v44  ;;  %v564_v50 = vsel %vm97_vm1, %v563_v45, %v92_v40  ;;  %v17563_v2 = vpack.c.bf16 %v571_v33, %v568_v25 }
   0xf   :  { %85 = vst.msk [vmem:[%s18977_s9 + $0x8] sm:$0x1] %vm83_vm5, %v80_v46  ;;  %v172_v51 = vsub.f32 %v170_v41, %v171_v47  ;;  %16389 = vmatprep.subr.bf16.mxu1 %v17362_v3  ;;  %v565_v52 = vsel %vm99_vm2, %v564_v50, 0  ;;  %v1038_v4 = vand.u32 4294901760, %v39_v62  ;;  %v1041_v5 = vand.u32 4294901760, %v40_v63 }
  0x10   :  { %v655_v54 = vsub.f32 %v17508_v44, %v654_v49  ;;  %v17532_v55 = vand.u32 4294901760, %v565_v52  ;;  %v649_v57 = vand.u32 4294901760, %v648_v48  ;;  %v1044_v12 = vand.u32 4294901760, %v41_v7 }
  0x11   :  { %v173_v56 = vand.u32 4294901760, %v172_v51  ;;  %14880 = vmatmul.mubr.f32.vlgmr.msra.gmra.mrb[0].mxu1 %v17491_v32  ;;  %v17583_v13 = vpack.c.bf16 %v17508_v44, %v17497_v34  ;;  %v1047_v14 = vand.u32 4294901760, %v42_v8  ;;  %v17585_v15 = vsub.f32 %v39_v62, %v1038_v4 }
  0x12   :  { %16391 = vmatpush3.bf16.msra.mxu1 %v17440_v10  ;;  %14893 = vmatprep.mubr.msk.f32.mxu1 %vm17363_vm0, %v17364_v6  ;;  %v656_v58 = vand.u32 4294901760, %v655_v54  ;;  %v635_v59 = vsub.f32 %v565_v52, %v17532_v55  ;;  %v17587_v17 = vsub.f32 %v40_v63, %v1041_v5  ;;  %v17596_v18 = vpack.c.bf16 %v654_v49, %v647_v43 }
  0x13   :  { %14873 = vmatmul.mubr.f32.vlgmr.msra.gmra.mrb[0].mxu0 %v173_v56  ;;  %16395 = vmatprep.subr.bf16.mxu1 %v17362_v3  ;;  %v1119_v19 = vand.u32 4294901760, %v17585_v15  ;;  %v1132_v21 = vsub.f32 %v41_v7, %v1044_v12  ;;  %v1139_v22 = vsub.f32 %v42_v8, %v1047_v14  ;;  %v17608_v24 = vpack.c.bf16 %v1041_v5, %v1038_v4 }
  0x14   :  { %16388 = vmatpush3.bf16.msra.mxu0 %v17529_v53  ;;  %14886 = vmatprep.mubr.msk.f32.mxu0 %vm17363_vm0, %v17364_v6  ;;  %v636_v61 = vand.u32 4294901760, %v635_v59  ;;  %v17555_v0 = vpack.c.bf16 %v656_v58, %v649_v57  ;;  %v1126_v20 = vand.u32 4294901760, %v17587_v17  ;;  %v17621_v29 = vpack.c.bf16 %v1047_v14, %v1044_v12 }
  0x15   :  { %16392 = vmatprep.subr.bf16.mxu0 %v17362_v3  ;;  %14894 = vmatmul.mubr.f32.vlgmr.msra.gmra.mrb[2].mxu1 %v171_v47  ;;  %v1120_v25 = vsub.f32 %v17585_v15, %v1119_v19  ;;  %v1133_v27 = vand.u32 4294901760, %v1132_v21  ;;  %v1140_v28 = vand.u32 4294901760, %v1139_v22  ;;  %v17641_v38 = vpack.c.bf16 %v17587_v17, %v17585_v15 }
  0x16   :  { %16397 = vmatpush3.bf16.msra.mxu1 %v17440_v10  ;;  %14907 = vmatprep.mubr.msk.f32.mxu1 %vm17363_vm0, %v17364_v6  ;;  %v637_v1 = vsub.f32 %v635_v59, %v636_v61  ;;  %v1127_v26 = vsub.f32 %v17587_v17, %v1126_v20  ;;  %v17646_v39 = vpack.c.bf16 %v1139_v22, %v1132_v21  ;;  %vm1033_vm6 = vcmask 261120  }
  0x17   :  { %14887 = vmatmul.mubr.f32.vlgmr.msra.gmra.mrb[2].mxu0 %v170_v41  ;;  %16401 = vmatprep.subr.bf16.mxu1 %v17362_v3  ;;  %v1121_v30 = vand.u32 4294901760, %v1120_v25  ;;  %v1141_v33 = vsub.f32 %v1139_v22, %v1140_v28  ;;  %v17659_v40 = vpack.c.bf16 %v1126_v20, %v1119_v19  ;;  %v17664_v41 = vpack.c.bf16 %v1140_v28, %v1133_v27 }
  0x18   :  { %16394 = vmatpush3.bf16.msra.mxu0 %v17543_v60  ;;  %14900 = vmatprep.mubr.msk.f32.mxu0 %vm17363_vm0, %v17364_v6  ;;  %v638_v11 = vand.u32 4294901760, %v637_v1  ;;  %v1128_v31 = vand.u32 4294901760, %v1127_v26 }
  0x19   :  { %16398 = vmatprep.subr.bf16.mxu0 %v17362_v3  ;;  %14908 = vmatmul.mubr.f32.vlgmr.msra.gmra.mrb[4].mxu1 %v17491_v32  ;;  %v1142_v36 = vand.u32 4294901760, %v1141_v33 }
  0x1a   :  { %16403 = vmatpush3.bf16.msra.mxu1 %v17555_v0  ;;  %14921 = vmatprep.mubr.msk.f32.mxu1 %vm17363_vm0, %v17364_v6  ;;  %v17628_v34 = vpack.c.bf16 %v1128_v31, %v1121_v30 }
  0x1b   :  { %14901 = vmatmul.mubr.f32.vlgmr.msra.gmra.mrb[4].mxu0 %v17491_v32  ;;  %16407 = vmatprep.subr.bf16.mxu1 %v17362_v3  ;;  %v1134_v32 = vsub.f32 %v1132_v21, %v1133_v27 }
  0x1c   :  { %16400 = vmatpush3.bf16.msra.mxu0 %v17563_v2  ;;  %14914 = vmatprep.mubr.msk.f32.mxu0 %vm17363_vm0, %v17364_v6 }
  0x1d   :  { %16404 = vmatprep.subr.bf16.mxu0 %v17362_v3  ;;  %14922 = vmatmul.mubr.f32.vlgmr.msra.gmra.mrb[6].mxu1 %v17532_v55  ;;  %v1135_v35 = vand.u32 4294901760, %v1134_v32  ;;  %v17690_v32 = vld [vmem:[%s18973_s5] ss:$0 sm:$0xff] }
  0x1e   :  { %16409 = vmatpush3.bf16.msra.mxu1 %v17563_v2  ;;  %14935 = vmatprep.mubr.msk.f32.mxu1 %vm17363_vm0, %v17364_v6 }
  0x1f   :  { %14915 = vmatmul.mubr.f32.vlgmr.msra.gmra.mrb[6].mxu0 %v638_v11  ;;  %16413 = vmatprep.subr.bf16.mxu1 %v17362_v3  ;;  %v17633_v37 = vpack.c.bf16 %v1142_v36, %v1135_v35 }
  0x20   :  { %16406 = vmatpush3.bf16.msra.mxu0 %v17583_v13  ;;  %14928 = vmatprep.mubr.msk.f32.mxu0 %vm17363_vm0, %v17364_v6 }
  0x21   :  { %16410 = vmatprep.subr.bf16.mxu0 %v17362_v3  ;;  %14936 = vmatmul.mubr.f32.vlgmr.msra.gmra.mrb[8].mxu1 %v636_v61 }
  0x22   :  { %16415 = vmatpush3.bf16.msra.mxu1 %v17563_v2  ;;  %14949 = vmatprep.mubr.msk.f32.mxu1 %vm17363_vm0, %v17364_v6 }
  0x23   :  { %14929 = vmatmul.mubr.f32.vlgmr.msra.gmra.mrb[8].mxu0 %v635_v59  ;;  %16452 = vmatprep.subr.bf16.mxu1 %v17362_v3 }
  0x24   :  { %16412 = vmatpush3.bf16.msra.mxu0 %v17596_v18  ;;  %14942 = vmatprep.mubr.msk.f32.mxu0 %vm17363_vm0, %v17364_v6 }
  0x25   :  { %16416 = vmatprep.subr.bf16.mxu0 %v17362_v3  ;;  %14950 = vmatmul.mubr.f32.vlgmr.msra.gmra.mrb[10].mxu1 %v17532_v55 }
  0x26   :  { %15026 = vmatprep.mubr.msk.f32.mxu1 %vm17363_vm0, %v17364_v6 }
  0x27   :  { %14943 = vmatmul.mubr.f32.vlgmr.msra.gmra.mrb[10].mxu0 %v17532_v55 }
  0x28   :  { %16418 = vmatpush3.bf16.msra.mxu0 %v17608_v24  ;;  %14960 = vmatprep.mubr.msk.f32.mxu0 %vm17363_vm0, %v17364_v6 }
  0x29   :  { %16419 = vmatprep.subr.bf16.mxu0 %v17362_v3 }
  0x2c   :  { %16421 = vmatpush3.bf16.msra.mxu0 %v17621_v29 }
  0x2d   :  { %16422 = vmatprep.subr.bf16.mxu0 %v17362_v3 }
  0x2f   :  { %14961 = vmatmul.mubr.f32.vlgmr.msra.gmra.mrb[12].mxu0 %v17364_v6 }
  0x30   :  { %16424 = vmatpush3.bf16.msra.mxu0 %v17628_v34  ;;  %14971 = vmatprep.mubr.msk.f32.mxu0 %vm17363_vm0, %v17364_v6 }
  0x31   :  { %16425 = vmatprep.subr.bf16.mxu0 %v17362_v3 }
  0x34   :  { %16427 = vmatpush3.bf16.msra.mxu0 %v17633_v37 }
  0x35   :  { %16428 = vmatprep.subr.bf16.mxu0 %v17362_v3 }
  0x37   :  { %14972 = vmatmul.mubr.f32.vlgmr.msra.gmra.mrb[12].mxu0 %v17364_v6 }
  0x38   :  { %16430 = vmatpush3.bf16.msra.mxu0 %v17641_v38  ;;  %14982 = vmatprep.mubr.msk.f32.mxu0 %vm17363_vm0, %v17364_v6 }
  0x39   :  { %16431 = vmatprep.subr.bf16.mxu0 %v17362_v3 }
  0x3c   :  { %16433 = vmatpush3.bf16.msra.mxu0 %v17646_v39 }
  0x3d   :  { %16434 = vmatprep.subr.bf16.mxu0 %v17362_v3 }
  0x3f   :  { %14983 = vmatmul.mubr.f32.vlgmr.msra.gmra.mrb[12].mxu0 %v17364_v6 }
  0x40   :  { %16436 = vmatpush3.bf16.msra.mxu0 %v17608_v24  ;;  %14993 = vmatprep.mubr.msk.f32.mxu0 %vm17363_vm0, %v17364_v6 }
  0x41   :  { %16437 = vmatprep.subr.bf16.mxu0 %v17362_v3 }
  0x44   :  { %16439 = vmatpush3.bf16.msra.mxu0 %v17621_v29 }
  0x45   :  { %16440 = vmatprep.subr.bf16.mxu0 %v17362_v3 }
  0x47   :  { %14994 = vmatmul.mubr.f32.vlgmr.msra.gmra.mrb[12].mxu0 %v17364_v6 }
  0x48   :  { %16442 = vmatpush3.bf16.msra.mxu0 %v17659_v40  ;;  %15004 = vmatprep.mubr.msk.f32.mxu0 %vm17363_vm0, %v17364_v6 }
  0x49   :  { %16443 = vmatprep.subr.bf16.mxu0 %v17362_v3 }
  0x4c   :  { %16445 = vmatpush3.bf16.msra.mxu0 %v17664_v41 }
  0x4d   :  { %16446 = vmatprep.subr.bf16.mxu0 %v17362_v3 }
  0x4f   :  { %15005 = vmatmul.mubr.f32.vlgmr.msra.gmra.mrb[12].mxu0 %v17364_v6 }
  0x50   :  { %16448 = vmatpush3.bf16.msra.mxu0 %v17608_v24  ;;  %15015 = vmatprep.mubr.msk.f32.mxu0 %vm17363_vm0, %v17364_v6 }
  0x51   :  { %16449 = vmatprep.subr.bf16.mxu0 %v17362_v3 }
  0x54   :  { %16451 = vmatpush3.bf16.msra.mxu0 %v17621_v29 }
  0x55   :  { %16488 = vmatprep.subr.bf16.mxu0 %v17362_v3 }
  0x57   :  { %15016 = vmatmul.mubr.f32.vlgmr.msra.gmra.mrb[12].mxu0 %v17364_v6 }
  0x58   :  { %16490 = vmatpush3.bf16.msra.mxu0 %v17440_v10  ;;  %15088 = vmatprep.mubr.msk.f32.mxu0 %vm17363_vm0, %v17364_v6 }
  0x59   :  { %16494 = vmatprep.subr.bf16.mxu0 %v17362_v3 }
  0x7c   :  { %v17683_v27 = vpop.permute.xlu0 %1534 }
  0xe4   :  { %v256_v43 = vpop.f32.mrb[0].mxu1 }
  0xe5   :  { %v14881_v44 = vpop.f32.mrb[1].mxu1 }
  0xe6   :  { %v175_v45 = vpop.f32.mrb[0].mxu0 }
  0xe7   :  { %v14874_v46 = vpop.f32.mrb[1].mxu0  ;;  %v257_v47 = vadd.f32 %v256_v43, %v175_v45 }
  0xe8   :  { %v407_v48 = vpop.f32.mrb[2].mxu1 }
  0xe9   :  { %v14895_v49 = vpop.f32.mrb[3].mxu1 }
  0xea   :  { %v332_v50 = vpop.f32.mrb[2].mxu0 }
  0xeb   :  { %v333_v51 = vadd.f32 %v332_v50, %v257_v47  ;;  %v14888_v52 = vpop.f32.mrb[3].mxu0 }
  0xec   :  { %v557_v54 = vpop.f32.mrb[4].mxu1  ;;  %v44_v52 = vld [vmem:[%s18975_s7 + $0x8] sm:$0xff] }
  0xed   :  { %v408_v55 = vadd.f32 %v407_v48, %v333_v51  ;;  %v14909_v56 = vpop.f32.mrb[5].mxu1  ;;  %v43_v51 = vld [vmem:[%s18975_s7] sm:$0xff] }
  0xee   :  { %v484_v57 = vpop.f32.mrb[4].mxu0 }
  0xef   :  { %v485_v58 = vadd.f32 %v484_v57, %v408_v55  ;;  %v14902_v59 = vpop.f32.mrb[5].mxu0  ;;  %v1566_v55 = vand.u32 4294901760, %v44_v52 }
  0xf0   :  { %v721_v61 = vpop.f32.mrb[6].mxu1  ;;  %v45_v59 = vld [vmem:[%s18975_s7 + $0x10] sm:$0xff] }
  0xf1   :  { %v558_v62 = vadd.f32 %v557_v54, %v485_v58  ;;  %v14923_v63 = vpop.f32.mrb[7].mxu1  ;;  %v1563_v54 = vand.u32 4294901760, %v43_v51  ;;  %v1650_v58 = vsub.f32 %v44_v52, %v1566_v55 }
  0xf2   :  { %v640_v1 = vpop.f32.mrb[6].mxu0 }
  0xf3   :  { %v641_v4 = vadd.f32 %v640_v1, %v558_v62  ;;  %v14916_v5 = vpop.f32.mrb[7].mxu0  ;;  %v17701_v56 = vpack.c.bf16 %v1566_v55, %v1563_v54  ;;  %v1643_v57 = vsub.f32 %v43_v51, %v1563_v54  ;;  %v1569_v62 = vand.u32 4294901760, %v45_v59  ;;  %v2115_v55 = vld [vmem:[%s18969_s1 + $0x9] sm:$0x1] }
  0xf4   :  { %v872_v7 = vpop.f32.mrb[8].mxu1  ;;  %vm2117_vm8 = vcmp.ne.f32.partialorder %v2115_v55, 0.0 }
  0xf5   :  { %v722_v8 = vadd.f32 %v721_v61, %v641_v4  ;;  %v14937_v11 = vpop.f32.mrb[9].mxu1  ;;  %v46_v61 = vld [vmem:[%s18975_s7 + $0x18] sm:$0xff]  ;;  %16454 = vmatpush3.bf16.msra.mxu1 %v17701_v56  ;;  %v1644_v1 = vand.u32 4294901760, %v1643_v57  ;;  %v1651_v4 = vand.u32 4294901760, %v1650_v58 }
  0xf6   :  { %v797_v12 = vpop.f32.mrb[8].mxu0  ;;  %v1572_v63 = vand.u32 4294901760, %v46_v61  ;;  %16455 = vmatprep.subr.bf16.mxu1 %v17362_v3  ;;  %v1657_v11 = vsub.f32 %v45_v59, %v1569_v62 }
  0xf7   :  { %v798_v14 = vadd.f32 %v797_v12, %v722_v8  ;;  %v14930_v15 = vpop.f32.mrb[9].mxu0  ;;  %v1652_v8 = vsub.f32 %v1650_v58, %v1651_v4 }
  0xf8   :  { %v1022_v17 = vpop.f32.mrb[10].mxu1  ;;  %v17711_v5 = vpack.c.bf16 %v1572_v63, %v1569_v62 }
  0xf9   :  { %v873_v19 = vadd.f32 %v872_v7, %v798_v14  ;;  %v14951_v20 = vpop.f32.mrb[11].mxu1  ;;  %v1645_v7 = vsub.f32 %v1643_v57, %v1644_v1  ;;  %v1664_v14 = vsub.f32 %v46_v61, %v1572_v63 }
  0xfa   :  { %v949_v21 = vpop.f32.mrb[10].mxu0  ;;  %16457 = vmatpush3.bf16.msra.mxu1 %v17711_v5  ;;  %v1658_v20 = vand.u32 4294901760, %v1657_v11 }
  0xfb   :  { %v950_v22 = vadd.f32 %v949_v21, %v873_v19  ;;  %v14944_v25 = vpop.f32.mrb[11].mxu0  ;;  %v1653_v19 = vand.u32 4294901760, %v1652_v8  ;;  %16458 = vmatprep.subr.bf16.mxu1 %v17362_v3 }
  0xfc   :  { %v1665_v25 = vand.u32 4294901760, %v1664_v14 }
  0xfd   :  { %v1023_v26 = vadd.f32 %v1022_v17, %v950_v22  ;;  %v1646_v17 = vand.u32 4294901760, %v1645_v7 }
  0xff   :  { %v1032_v33 = vadd.f32 %v17690_v32, %v1023_v26  ;;  %v17715_v26 = vpack.c.bf16 %v1653_v19, %v1646_v17 }
 0x12a   :  { %v1518_v28 = vpop.f32.mrb[12].mxu0 }
 0x12b   :  { %v1537_v30 = vadd.f32 %v17683_v27, %v1518_v28  ;;  %v15017_v31 = vpop.f32.mrb[13].mxu0  ;;  %v1522_v35 = vadd.f32 %v1518_v28, %v1032_v33  ;;  %v1659_v28 = vsub.f32 %v1657_v11, %v1658_v20 }
 0x12c   :  { %v1666_v31 = vsub.f32 %v1664_v14, %v1665_v25 }
 0x12d   :  { %1539 = vrot.lane.b32.xlu0 %v1537_v30, %s17366_s11  ;;  %v14188_v36 = vmul.f32 -1.442695, %v1522_v35 }
 0x12e   :  { %v1667_v35 = vand.u32 4294901760, %v1666_v31 }
 0x12f   :  { %17292 = vpow2.f32 %v14188_v36 }
 0x139   :  { %v17293_v43 = vpop.eup %17292 }
 0x13a   :  { %v1526_v44 = vadd.f32 1.0, %v17293_v43  ;;  %v17723_v43 = vpack.c.bf16 %v1650_v58, %v1643_v57  ;;  %v2125_v57 = vrot.slane %v2115_v55, 7  ;;  %v2114_v58 = vld [vmem:[%s18969_s1 + $0x1] sm:$0x1] }
 0x13b   :  { %vm2116_vm7 = vcmp.ne.f32.partialorder %v2114_v58, 0.0 }
 0x13c   :  { %17294 = vrcp.f32 %v1526_v44  ;;  %v17725_v44 = vpack.c.bf16 %v1664_v14, %v1657_v11  ;;  %v2126_v59 = vsel %vm97_vm1, %v2125_v57, %v2114_v58  ;;  %v2112_v11 = vld [vmem:[%s18968_s0 + $0x1] sm:$0x1] }
 0x13d   :  { %v2127_v61 = vsel %vm99_vm2, %v2126_v59, 0 }
 0x13e   :  { %v2196_v62 = vand.u32 4294901760, %v2127_v61 }
 0x140   :  { %v2197_v63 = vsub.f32 %v2127_v61, %v2196_v62 }
 0x146   :  { %v17295_v45 = vpop.eup %17294 }
 0x147   :  { %v1549_v12 = vsub.f32 1.0, %v17295_v45  ;;  %v1555_v21 = vmul.f32 0.0, %v17295_v45 }
 0x19f   :  { %v1540_v46 = vpop.permute.xlu0 %1539 }
 0x1a0   :  { %v1542_v47 = vmul.f32 %v17295_v45, %v1540_v46  ;;  %v17727_v45 = vpack.c.bf16 %v1651_v4, %v1644_v1  ;;  %v17729_v46 = vpack.c.bf16 %v1665_v25, %v1658_v20  ;;  %v2198_v1 = vand.u32 4294901760, %v2197_v63 }
 0x1a2   :  { %1544 = vrot.lane.b32.xlu1 %v1542_v47, %s17366_s11  ;;  %v2199_v4 = vsub.f32 %v2197_v63, %v2198_v1 }
 0x1a4   :  { %v2200_v7 = vand.u32 4294901760, %v2199_v4 }
 0x1a6   :  { %15089 = vmatmul.mubr.f32.vlgmr.msra.gmra.mrb[14].mxu0 %v2200_v7 }
 0x1a7   :  { %16496 = vmatpush3.bf16.msra.mxu0 %v17529_v53  ;;  %15102 = vmatprep.mubr.msk.f32.mxu0 %vm17363_vm0, %v17364_v6 }
 0x1a8   :  { %16500 = vmatprep.subr.bf16.mxu0 %v17362_v3 }
 0x1aa   :  { %15103 = vmatmul.mubr.f32.vlgmr.msra.gmra.mrb[16].mxu0 %v2197_v63 }
 0x1ab   :  { %16502 = vmatpush3.bf16.msra.mxu0 %v17543_v60  ;;  %15116 = vmatprep.mubr.msk.f32.mxu0 %vm17363_vm0, %v17364_v6 }
 0x1ac   :  { %16506 = vmatprep.subr.bf16.mxu0 %v17362_v3 }
 0x1ae   :  { %15117 = vmatmul.mubr.f32.vlgmr.msra.gmra.mrb[18].mxu0 %v2196_v62 }
 0x1af   :  { %16508 = vmatpush3.bf16.msra.mxu0 %v17563_v2  ;;  %15130 = vmatprep.mubr.msk.f32.mxu0 %vm17363_vm0, %v17364_v6 }
 0x1b0   :  { %16512 = vmatprep.subr.bf16.mxu0 %v17362_v3 }
 0x214   :  { %v1545_v48 = vpop.permute.xlu1 %1544 }
 0x215   :  { %v1547_v49 = vadd.f32 %v1545_v48, %v1032_v33  ;;  %v1660_v33 = vand.u32 4294901760, %v1659_v28 }
 0x217   :  { %17296 = vtanh.f32 %v1547_v49  ;;  %v17721_v36 = vpack.c.bf16 %v1667_v35, %v1660_v33 }
 0x221   :  { %v17297_v50 = vpop.eup %17296 }
 0x222   :  { %1551 = vrot.lane.b32.xlu1 %v17297_v50, %s17367_s23 }
 0x279   :  { %v2202_v58 = vpop.f32.mrb[14].mxu0 }
 0x294   :  { %v1552_v15 = vpop.permute.xlu1 %1551 }
 0x295   :  { %v1554_v22 = vmul.f32 %v1552_v15, %v1549_v12  ;;  %v2113_v15 = vld [vmem:[%s18968_s0 + $0x9] sm:$0x1] }
 0x297   :  { %v17717_v30 = vadd.f32 %v1555_v21, %v1554_v22 }
 0x299   :  { %1558 = vrot.lane.b32.xlu0 %v17717_v30, %s17367_s23 }
 0x30b   :  { %v1559_v47 = vpop.permute.xlu0 %1558 }
 0x30c   :  { %v1560_v48 = vsel %vm1033_vm6, %v1559_v47, 0 }
 0x30d   :  { %v17732_v49 = vand.u32 4294901760, %v1560_v48 }
 0x30f   :  { %v17735_v50 = vsub.f32 %v1560_v48, %v17732_v49 }
 0x311   :  { %v17738_v51 = vand.u32 4294901760, %v17735_v50 }
 0x313   :  { %v1634_v52 = vsub.f32 %v17735_v50, %v17738_v51 }
 0x315   :  { %v17742_v54 = vand.u32 4294901760, %v1634_v52 }
 0x317   :  { %15027 = vmatmul.mubr.f32.vlgmr.msra.gmra.mrb[12].mxu1 %v17742_v54 }
 0x318   :  { %16460 = vmatpush3.bf16.msra.mxu1 %v17715_v26  ;;  %15037 = vmatprep.mubr.msk.f32.mxu1 %vm17363_vm0, %v17364_v6 }
 0x319   :  { %16461 = vmatprep.subr.bf16.mxu1 %v17362_v3 }
 0x31c   :  { %16463 = vmatpush3.bf16.msra.mxu1 %v17721_v36 }
 0x31d   :  { %16464 = vmatprep.subr.bf16.mxu1 %v17362_v3 }
 0x31f   :  { %15038 = vmatmul.mubr.f32.vlgmr.msra.gmra.mrb[12].mxu1 %v17732_v49 }
 0x320   :  { %16466 = vmatpush3.bf16.msra.mxu1 %v17723_v43  ;;  %15048 = vmatprep.mubr.msk.f32.mxu1 %vm17363_vm0, %v17364_v6 }
 0x321   :  { %16467 = vmatprep.subr.bf16.mxu1 %v17362_v3 }
 0x324   :  { %16469 = vmatpush3.bf16.msra.mxu1 %v17725_v44 }
 0x325   :  { %16470 = vmatprep.subr.bf16.mxu1 %v17362_v3 }
 0x327   :  { %15049 = vmatmul.mubr.f32.vlgmr.msra.gmra.mrb[12].mxu1 %v17735_v50 }
 0x328   :  { %16472 = vmatpush3.bf16.msra.mxu1 %v17701_v56  ;;  %15059 = vmatprep.mubr.msk.f32.mxu1 %vm17363_vm0, %v17364_v6 }
 0x329   :  { %16473 = vmatprep.subr.bf16.mxu1 %v17362_v3 }
 0x32c   :  { %16475 = vmatpush3.bf16.msra.mxu1 %v17711_v5 }
 0x32d   :  { %16476 = vmatprep.subr.bf16.mxu1 %v17362_v3 }
 0x32f   :  { %15060 = vmatmul.mubr.f32.vlgmr.msra.gmra.mrb[12].mxu1 %v17738_v51 }
 0x330   :  { %16478 = vmatpush3.bf16.msra.mxu1 %v17727_v45  ;;  %15070 = vmatprep.mubr.msk.f32.mxu1 %vm17363_vm0, %v17364_v6 }
 0x331   :  { %16479 = vmatprep.subr.bf16.mxu1 %v17362_v3 }
 0x334   :  { %16481 = vmatpush3.bf16.msra.mxu1 %v17729_v46 }
 0x335   :  { %16482 = vmatprep.subr.bf16.mxu1 %v17362_v3 }
 0x337   :  { %15071 = vmatmul.mubr.f32.vlgmr.msra.gmra.mrb[12].mxu1 %v17732_v49 }
 0x338   :  { %16484 = vmatpush3.bf16.msra.mxu1 %v17701_v56  ;;  %15081 = vmatprep.mubr.msk.f32.mxu1 %vm17363_vm0, %v17364_v6 }
 0x339   :  { %16485 = vmatprep.subr.bf16.mxu1 %v17362_v3 }
 0x33c   :  { %16487 = vmatpush3.bf16.msra.mxu1 %v17711_v5 }
 0x33d   :  { %16491 = vmatprep.subr.bf16.mxu1 %v17362_v3 }
 0x33f   :  { %15082 = vmatmul.mubr.f32.vlgmr.msra.gmra.mrb[12].mxu1 %v17732_v49 }
 0x340   :  { %16493 = vmatpush3.bf16.msra.mxu1 %v17504_v42  ;;  %15095 = vmatprep.mubr.msk.f32.mxu1 %vm17363_vm0, %v17364_v6 }
 0x341   :  { %16497 = vmatprep.subr.bf16.mxu1 %v17362_v3 }
 0x343   :  { %15096 = vmatmul.mubr.f32.vlgmr.msra.gmra.mrb[14].mxu1 %v2196_v62 }
 0x344   :  { %16499 = vmatpush3.bf16.msra.mxu1 %v17440_v10  ;;  %15109 = vmatprep.mubr.msk.f32.mxu1 %vm17363_vm0, %v17364_v6 }
 0x345   :  { %16503 = vmatprep.subr.bf16.mxu1 %v17362_v3 }
 0x347   :  { %15110 = vmatmul.mubr.f32.vlgmr.msra.gmra.mrb[16].mxu1 %v2198_v1 }
 0x348   :  { %16505 = vmatpush3.bf16.msra.mxu1 %v17440_v10  ;;  %15123 = vmatprep.mubr.msk.f32.mxu1 %vm17363_vm0, %v17364_v6 }
 0x349   :  { %16509 = vmatprep.subr.bf16.mxu1 %v17362_v3 }
 0x34b   :  { %15124 = vmatmul.mubr.f32.vlgmr.msra.gmra.mrb[18].mxu1 %v2196_v62  ;;  %v15090_v62 = vpop.f32.mrb[15].mxu0 }
 0x34c   :  { %16511 = vmatpush3.bf16.msra.mxu1 %v17555_v0  ;;  %15137 = vmatprep.mubr.msk.f32.mxu1 %vm17363_vm0, %v17364_v6  ;;  %v2359_v1 = vpop.f32.mrb[16].mxu0 }
 0x34d   :  { %16515 = vmatprep.subr.bf16.mxu1 %v17362_v3  ;;  %v15104_v7 = vpop.f32.mrb[17].mxu0 }
 0x412   :  { %v2043_v8 = vpop.f32.mrb[12].mxu1 }
 0x413   :  { %v17136_v12 = vadd.f32 %v17460_v16, %v2043_v8  ;;  %v15083_v14 = vpop.f32.mrb[13].mxu1  ;;  %v2511_v8 = vpop.f32.mrb[18].mxu0 }
 0x415   :  { %v2092_v17 = vrot.slane %v17136_v12, %v17475_v23  ;;  %v2118_v19 = vrot.slane %v17136_v12, 1  ;;  %v2121_v20 = vsel %vm2116_vm7, %v2112_v11, %v17136_v12  ;;  %v15118_v12 = vpop.f32.mrb[19].mxu0 }
 0x417   :  { %v2093_v21 = vcombine.high %v2092_v17, %v2092_v17  ;;  %v2100_v22 = vrot.slane %v2092_v17, %v17475_v23  ;;  %v2122_v25 = vsel %vm2117_vm8, %v2113_v15, %v2118_v19 }
 0x418   :  { %v2590_v28 = vrot.slane %v2122_v25, 7 }
 0x419   :  { %v2107_v31 = vrot.slane %v2093_v21, %v17475_v23  ;;  %2110 = vst.msk [vmem:[%s18977_s9 + $0x1] sm:$0x1] %vm83_vm5, %v2100_v22 }
 0x41a   :  { %v2591_v16 = vsel %vm97_vm1, %v2590_v28, %v2121_v20 }
 0x41b   :  { %2111 = vst.msk [vmem:[%s18977_s9 + $0x9] sm:$0x1] %vm83_vm5, %v2107_v31  ;;  %v2592_v33 = vsel %vm99_vm2, %v2591_v16, 0 }
 0x41c   :  { %v2661_v35 = vand.u32 4294901760, %v2592_v33 }
 0x41e   :  { %15138 = vmatmul.mubr.f32.vlgmr.msra.gmra.mrb[20].mxu1 %v2661_v35  ;;  %v2662_v47 = vsub.f32 %v2592_v33, %v2661_v35 }
 0x41f   :  { %16517 = vmatpush3.bf16.msra.mxu1 %v17563_v2  ;;  %15151 = vmatprep.mubr.msk.f32.mxu1 %vm17363_vm0, %v17364_v6 }
 0x420   :  { %v2663_v48 = vand.u32 4294901760, %v2662_v47  ;;  %16521 = vmatprep.subr.bf16.mxu1 %v17362_v3 }
 0x422   :  { %15152 = vmatmul.mubr.f32.vlgmr.msra.gmra.mrb[22].mxu1 %v2663_v48  ;;  %v2664_v52 = vsub.f32 %v2662_v47, %v2663_v48 }
 0x423   :  { %16523 = vmatpush3.bf16.msra.mxu1 %v17563_v2  ;;  %15165 = vmatprep.mubr.msk.f32.mxu1 %vm17363_vm0, %v17364_v6 }
 0x424   :  { %v2665_v55 = vand.u32 4294901760, %v2664_v52  ;;  %16560 = vmatprep.subr.bf16.mxu1 %v17362_v3 }
 0x426   :  { %15131 = vmatmul.mubr.f32.vlgmr.msra.gmra.mrb[20].mxu0 %v2665_v55  ;;  %15166 = vmatmul.mubr.f32.vlgmr.msra.gmra.mrb[24].mxu1 %v2661_v35 }
 0x427   :  { %16514 = vmatpush3.bf16.msra.mxu0 %v17583_v13  ;;  %15144 = vmatprep.mubr.msk.f32.mxu0 %vm17363_vm0, %v17364_v6 }
 0x428   :  { %16518 = vmatprep.subr.bf16.mxu0 %v17362_v3  ;;  %16562 = vmatpush3.bf16.msra.mxu1 %v17701_v56 }
 0x429   :  { %16563 = vmatprep.subr.bf16.mxu1 %v17362_v3  ;;  %15242 = vmatprep.mubr.msk.f32.mxu1 %vm17363_vm0, %v17364_v6 }
 0x42a   :  { %15145 = vmatmul.mubr.f32.vlgmr.msra.gmra.mrb[22].mxu0 %v2662_v47 }
 0x42b   :  { %16520 = vmatpush3.bf16.msra.mxu0 %v17596_v18  ;;  %15158 = vmatprep.mubr.msk.f32.mxu0 %vm17363_vm0, %v17364_v6 }
 0x42c   :  { %16524 = vmatprep.subr.bf16.mxu0 %v17362_v3  ;;  %16565 = vmatpush3.bf16.msra.mxu1 %v17711_v5 }
 0x42d   :  { %16566 = vmatprep.subr.bf16.mxu1 %v17362_v3 }
 0x42e   :  { %15159 = vmatmul.mubr.f32.vlgmr.msra.gmra.mrb[24].mxu0 %v2661_v35 }
 0x42f   :  { %16526 = vmatpush3.bf16.msra.mxu0 %v17608_v24  ;;  %15176 = vmatprep.mubr.msk.f32.mxu0 %vm17363_vm0, %v17364_v6 }
 0x430   :  { %16527 = vmatprep.subr.bf16.mxu0 %v17362_v3 }
 0x433   :  { %16529 = vmatpush3.bf16.msra.mxu0 %v17621_v29 }
 0x434   :  { %16530 = vmatprep.subr.bf16.mxu0 %v17362_v3 }
 0x436   :  { %15177 = vmatmul.mubr.f32.vlgmr.msra.gmra.mrb[26].mxu0 %v17742_v54 }
 0x437   :  { %16532 = vmatpush3.bf16.msra.mxu0 %v17628_v34  ;;  %15187 = vmatprep.mubr.msk.f32.mxu0 %vm17363_vm0, %v17364_v6 }
 0x438   :  { %16533 = vmatprep.subr.bf16.mxu0 %v17362_v3 }
 0x43b   :  { %16535 = vmatpush3.bf16.msra.mxu0 %v17633_v37 }
 0x43c   :  { %16536 = vmatprep.subr.bf16.mxu0 %v17362_v3 }
 0x43e   :  { %15188 = vmatmul.mubr.f32.vlgmr.msra.gmra.mrb[26].mxu0 %v17732_v49 }
 0x43f   :  { %16538 = vmatpush3.bf16.msra.mxu0 %v17641_v38  ;;  %15198 = vmatprep.mubr.msk.f32.mxu0 %vm17363_vm0, %v17364_v6 }
 0x440   :  { %16539 = vmatprep.subr.bf16.mxu0 %v17362_v3 }
 0x443   :  { %16541 = vmatpush3.bf16.msra.mxu0 %v17646_v39 }
 0x444   :  { %16542 = vmatprep.subr.bf16.mxu0 %v17362_v3 }
 0x446   :  { %15199 = vmatmul.mubr.f32.vlgmr.msra.gmra.mrb[26].mxu0 %v17735_v50  ;;  %v2283_v50 = vpop.f32.mrb[14].mxu1 }
 0x447   :  { %16544 = vmatpush3.bf16.msra.mxu0 %v17608_v24  ;;  %15209 = vmatprep.mubr.msk.f32.mxu0 %vm17363_vm0, %v17364_v6  ;;  %v2284_v61 = vadd.f32 %v2283_v50, %v2202_v58 }
 0x448   :  { %16545 = vmatprep.subr.bf16.mxu0 %v17362_v3 }
 0x449   :  { %v2360_v4 = vadd.f32 %v2359_v1, %v2284_v61 }
 0x44b   :  { %16547 = vmatpush3.bf16.msra.mxu0 %v17621_v29 }
 0x44c   :  { %16548 = vmatprep.subr.bf16.mxu0 %v17362_v3 }
 0x44e   :  { %15210 = vmatmul.mubr.f32.vlgmr.msra.gmra.mrb[26].mxu0 %v17738_v51  ;;  %v15097_v51 = vpop.f32.mrb[15].mxu1 }
 0x44f   :  { %16550 = vmatpush3.bf16.msra.mxu0 %v17659_v40  ;;  %15220 = vmatprep.mubr.msk.f32.mxu0 %vm17363_vm0, %v17364_v6  ;;  %v2434_v54 = vpop.f32.mrb[16].mxu1 }
 0x450   :  { %16551 = vmatprep.subr.bf16.mxu0 %v17362_v3  ;;  %v15111_v57 = vpop.f32.mrb[17].mxu1 }
 0x451   :  { %v2584_v59 = vpop.f32.mrb[18].mxu1 }
 0x452   :  { %v15125_v63 = vpop.f32.mrb[19].mxu1 }
 0x453   :  { %16553 = vmatpush3.bf16.msra.mxu0 %v17664_v41 }
 0x454   :  { %16554 = vmatprep.subr.bf16.mxu0 %v17362_v3 }
 0x456   :  { %15221 = vmatmul.mubr.f32.vlgmr.msra.gmra.mrb[26].mxu0 %v17732_v49 }
 0x457   :  { %16556 = vmatpush3.bf16.msra.mxu0 %v17608_v24  ;;  %15231 = vmatprep.mubr.msk.f32.mxu0 %vm17363_vm0, %v17364_v6 }
 0x458   :  { %16557 = vmatprep.subr.bf16.mxu0 %v17362_v3 }
 0x45b   :  { %16559 = vmatpush3.bf16.msra.mxu0 %v17621_v29 }
 0x45c   :  { %16596 = vmatprep.subr.bf16.mxu0 %v17362_v3 }
 0x45e   :  { %15232 = vmatmul.mubr.f32.vlgmr.msra.gmra.mrb[26].mxu0 %v17732_v49  ;;  %v2435_v49 = vadd.f32 %v2434_v54, %v2360_v4 }
 0x45f   :  { %16598 = vmatpush3.bf16.msra.mxu0 %v17440_v10  ;;  %15304 = vmatprep.mubr.msk.f32.mxu0 %vm17363_vm0, %v17364_v6 }
 0x460   :  { %16602 = vmatprep.subr.bf16.mxu0 %v17362_v3  ;;  %v2512_v11 = vadd.f32 %v2511_v8, %v2435_v49 }
 0x462   :  { %v2585_v14 = vadd.f32 %v2584_v59, %v2512_v11 }
 0x4f1   :  { %v2748_v15 = vpop.f32.mrb[20].mxu1 }
 0x4f2   :  { %v15139_v17 = vpop.f32.mrb[21].mxu1 }
 0x4f5   :  { %v2899_v19 = vpop.f32.mrb[22].mxu1 }
 0x4f6   :  { %v15153_v20 = vpop.f32.mrb[23].mxu1 }
 0x4f9   :  { %v2667_v21 = vpop.f32.mrb[20].mxu0  ;;  %v3049_v22 = vpop.f32.mrb[24].mxu1 }
 0x4fa   :  { %v2668_v25 = vadd.f32 %v2667_v21, %v2585_v14  ;;  %v15132_v28 = vpop.f32.mrb[21].mxu0  ;;  %v15167_v31 = vpop.f32.mrb[25].mxu1 }
 0x4fc   :  { %v2749_v16 = vadd.f32 %v2748_v15, %v2668_v25 }
 0x4fd   :  { %v2824_v33 = vpop.f32.mrb[22].mxu0 }
 0x4fe   :  { %v2825_v35 = vadd.f32 %v2824_v33, %v2749_v16  ;;  %v15146_v47 = vpop.f32.mrb[23].mxu0 }
 0x500   :  { %v2900_v48 = vadd.f32 %v2899_v19, %v2825_v35  ;;  %v4124_v35 = vld [vmem:[%s18969_s1 + $0xa] sm:$0x1] }
 0x501   :  { %v2976_v52 = vpop.f32.mrb[24].mxu0  ;;  %v4134_v47 = vrot.slane %v4124_v35, 7  ;;  %vm4126_vm10 = vcmp.ne.f32.partialorder %v4124_v35, 0.0 }
 0x502   :  { %v2977_v55 = vadd.f32 %v2976_v52, %v2900_v48  ;;  %v15160_v50 = vpop.f32.mrb[25].mxu0  ;;  %v4123_v48 = vld [vmem:[%s18969_s1 + $0x2] sm:$0x1] }
 0x503   :  { %v4135_v52 = vsel %vm97_vm1, %v4134_v47, %v4123_v48  ;;  %vm4125_vm9 = vcmp.ne.f32.partialorder %v4123_v48, 0.0 }
 0x504   :  { %v3050_v51 = vadd.f32 %v3049_v22, %v2977_v55  ;;  %v4136_v55 = vsel %vm99_vm2, %v4135_v52, 0 }
 0x505   :  { %v4205_v50 = vand.u32 4294901760, %v4136_v55 }
 0x506   :  { %v3053_v59 = vadd.f32 %v17690_v32, %v3050_v51 }
 0x507   :  { %v4206_v51 = vsub.f32 %v4136_v55, %v4205_v50 }
 0x531   :  { %v3535_v54 = vpop.f32.mrb[26].mxu0 }
 0x532   :  { %v3546_v57 = vadd.f32 %v3535_v54, %v17683_v27  ;;  %v15233_v58 = vpop.f32.mrb[27].mxu0  ;;  %v3539_v61 = vadd.f32 %v3535_v54, %v3053_v59  ;;  %v4207_v54 = vand.u32 4294901760, %v4206_v51 }
 0x534   :  { %3548 = vrot.lane.b32.xlu1 %v3546_v57, %s17366_s11  ;;  %v14190_v62 = vmul.f32 -1.442695, %v3539_v61  ;;  %v4208_v57 = vsub.f32 %v4206_v51, %v4207_v54  ;;  %v4121_v61 = vld [vmem:[%s18968_s0 + $0x2] sm:$0x1] }
 0x536   :  { %17298 = vpow2.f32 %v14190_v62  ;;  %v4209_v58 = vand.u32 4294901760, %v4208_v57  ;;  %v18005_v62 = vld [vmem:[%s18976_s8] ss:$0 sm:$0xff] }
 0x538   :  { %15305 = vmatmul.mubr.f32.vlgmr.msra.gmra.mrb[28].mxu0 %v4209_v58 }
 0x539   :  { %16604 = vmatpush3.bf16.msra.mxu0 %v17529_v53  ;;  %15318 = vmatprep.mubr.msk.f32.mxu0 %vm17363_vm0, %v17364_v6 }
 0x53a   :  { %16608 = vmatprep.subr.bf16.mxu0 %v17362_v3 }
 0x53c   :  { %15319 = vmatmul.mubr.f32.vlgmr.msra.gmra.mrb[30].mxu0 %v4206_v51 }
 0x53d   :  { %16610 = vmatpush3.bf16.msra.mxu0 %v17543_v60  ;;  %15332 = vmatprep.mubr.msk.f32.mxu0 %vm17363_vm0, %v17364_v6 }
 0x53e   :  { %16614 = vmatprep.subr.bf16.mxu0 %v17362_v3 }
 0x540   :  { %v17299_v63 = vpop.eup %17298  ;;  %15333 = vmatmul.mubr.f32.vlgmr.msra.gmra.mrb[32].mxu0 %v4205_v50 }
 0x541   :  { %v3543_v1 = vadd.f32 1.0, %v17299_v63  ;;  %16616 = vmatpush3.bf16.msra.mxu0 %v17563_v2  ;;  %15346 = vmatprep.mubr.msk.f32.mxu0 %vm17363_vm0, %v17364_v6 }
 0x542   :  { %16620 = vmatprep.subr.bf16.mxu0 %v17362_v3 }
 0x543   :  { %17300 = vrcp.f32 %v3543_v1 }
 0x54d   :  { %v17301_v4 = vpop.eup %17300 }
 0x54e   :  { %v3558_v14 = vsub.f32 1.0, %v17301_v4  ;;  %v3564_v17 = vmul.f32 %v17301_v4, %v17717_v30 }
 0x5a6   :  { %v3549_v7 = vpop.permute.xlu1 %3548 }
 0x5a7   :  { %v3551_v49 = vmul.f32 %v17301_v4, %v3549_v7  ;;  %v4122_v4 = vld [vmem:[%s18968_s0 + $0xa] sm:$0x1] }
 0x5a9   :  { %3553 = vrot.lane.b32.xlu0 %v3551_v49, %s17366_s11 }
 0x60b   :  { %v4211_v55 = vpop.f32.mrb[28].mxu0 }
 0x61b   :  { %v3554_v8 = vpop.permute.xlu0 %3553 }
 0x61c   :  { %v3556_v11 = vadd.f32 %v3554_v8, %v3053_v59 }
 0x61e   :  { %17302 = vtanh.f32 %v3556_v11 }
 0x628   :  { %v17303_v12 = vpop.eup %17302 }
 0x629   :  { %3560 = vrot.lane.b32.xlu1 %v17303_v12, %s17367_s23 }
 0x69b   :  { %v3561_v15 = vpop.permute.xlu1 %3560 }
 0x69c   :  { %v3563_v19 = vmul.f32 %v3561_v15, %v3558_v14 }
 0x69e   :  { %v17910_v20 = vadd.f32 %v3564_v17, %v3563_v19 }
 0x6a0   :  { %3567 = vrot.lane.b32.xlu0 %v17910_v20, %s17367_s23 }
 0x712   :  { %v3568_v21 = vpop.permute.xlu0 %3567 }
 0x713   :  { %v3569_v22 = vsel %vm1033_vm6, %v3568_v21, 0 }
 0x714   :  { %v17915_v25 = vand.u32 4294901760, %v3569_v22 }
 0x716   :  { %v17918_v28 = vsub.f32 %v3569_v22, %v17915_v25 }
 0x718   :  { %v17921_v31 = vand.u32 4294901760, %v17918_v28 }
 0x71a   :  { %v3643_v16 = vsub.f32 %v17918_v28, %v17921_v31 }
 0x71c   :  { %v17925_v33 = vand.u32 4294901760, %v3643_v16 }
 0x71e   :  { %15243 = vmatmul.mubr.f32.vlgmr.msra.gmra.mrb[26].mxu1 %v17925_v33 }
 0x71f   :  { %16568 = vmatpush3.bf16.msra.mxu1 %v17715_v26  ;;  %15253 = vmatprep.mubr.msk.f32.mxu1 %vm17363_vm0, %v17364_v6 }
 0x720   :  { %16569 = vmatprep.subr.bf16.mxu1 %v17362_v3 }
 0x723   :  { %16571 = vmatpush3.bf16.msra.mxu1 %v17721_v36 }
 0x724   :  { %16572 = vmatprep.subr.bf16.mxu1 %v17362_v3 }
 0x726   :  { %15254 = vmatmul.mubr.f32.vlgmr.msra.gmra.mrb[26].mxu1 %v17915_v25 }
 0x727   :  { %16574 = vmatpush3.bf16.msra.mxu1 %v17723_v43  ;;  %15264 = vmatprep.mubr.msk.f32.mxu1 %vm17363_vm0, %v17364_v6 }
 0x728   :  { %16575 = vmatprep.subr.bf16.mxu1 %v17362_v3 }
 0x72b   :  { %16577 = vmatpush3.bf16.msra.mxu1 %v17725_v44 }
 0x72c   :  { %16578 = vmatprep.subr.bf16.mxu1 %v17362_v3 }
 0x72e   :  { %15265 = vmatmul.mubr.f32.vlgmr.msra.gmra.mrb[26].mxu1 %v17918_v28 }
 0x72f   :  { %16580 = vmatpush3.bf16.msra.mxu1 %v17701_v56  ;;  %15275 = vmatprep.mubr.msk.f32.mxu1 %vm17363_vm0, %v17364_v6 }
 0x730   :  { %16581 = vmatprep.subr.bf16.mxu1 %v17362_v3 }
 0x733   :  { %16583 = vmatpush3.bf16.msra.mxu1 %v17711_v5 }
 0x734   :  { %16584 = vmatprep.subr.bf16.mxu1 %v17362_v3 }
 0x736   :  { %15276 = vmatmul.mubr.f32.vlgmr.msra.gmra.mrb[26].mxu1 %v17921_v31 }
 0x737   :  { %16586 = vmatpush3.bf16.msra.mxu1 %v17727_v45  ;;  %15286 = vmatprep.mubr.msk.f32.mxu1 %vm17363_vm0, %v17364_v6 }
 0x738   :  { %16587 = vmatprep.subr.bf16.mxu1 %v17362_v3 }
 0x73b   :  { %16589 = vmatpush3.bf16.msra.mxu1 %v17729_v46 }
 0x73c   :  { %16590 = vmatprep.subr.bf16.mxu1 %v17362_v3 }
 0x73e   :  { %15287 = vmatmul.mubr.f32.vlgmr.msra.gmra.mrb[26].mxu1 %v17915_v25 }
 0x73f   :  { %16592 = vmatpush3.bf16.msra.mxu1 %v17701_v56  ;;  %15297 = vmatprep.mubr.msk.f32.mxu1 %vm17363_vm0, %v17364_v6 }
 0x740   :  { %16593 = vmatprep.subr.bf16.mxu1 %v17362_v3 }
 0x743   :  { %16595 = vmatpush3.bf16.msra.mxu1 %v17711_v5 }
 0x744   :  { %16599 = vmatprep.subr.bf16.mxu1 %v17362_v3 }
 0x746   :  { %15298 = vmatmul.mubr.f32.vlgmr.msra.gmra.mrb[26].mxu1 %v17915_v25 }
 0x747   :  { %16601 = vmatpush3.bf16.msra.mxu1 %v17504_v42  ;;  %15311 = vmatprep.mubr.msk.f32.mxu1 %vm17363_vm0, %v17364_v6 }
 0x748   :  { %16605 = vmatprep.subr.bf16.mxu1 %v17362_v3 }
 0x74a   :  { %15312 = vmatmul.mubr.f32.vlgmr.msra.gmra.mrb[28].mxu1 %v4205_v50 }
 0x74b   :  { %16607 = vmatpush3.bf16.msra.mxu1 %v17440_v10  ;;  %15325 = vmatprep.mubr.msk.f32.mxu1 %vm17363_vm0, %v17364_v6 }
 0x74c   :  { %16611 = vmatprep.subr.bf16.mxu1 %v17362_v3 }
 0x74e   :  { %15326 = vmatmul.mubr.f32.vlgmr.msra.gmra.mrb[30].mxu1 %v4207_v54  ;;  %v15306_v54 = vpop.f32.mrb[29].mxu0 }
 0x74f   :  { %16613 = vmatpush3.bf16.msra.mxu1 %v17440_v10  ;;  %15339 = vmatprep.mubr.msk.f32.mxu1 %vm17363_vm0, %v17364_v6  ;;  %v4368_v58 = vpop.f32.mrb[30].mxu0 }
 0x750   :  { %16617 = vmatprep.subr.bf16.mxu1 %v17362_v3 }
 0x752   :  { %15340 = vmatmul.mubr.f32.vlgmr.msra.gmra.mrb[32].mxu1 %v4205_v50 }
 0x753   :  { %16619 = vmatpush3.bf16.msra.mxu1 %v17555_v0  ;;  %15353 = vmatprep.mubr.msk.f32.mxu1 %vm17363_vm0, %v17364_v6 }
 0x754   :  { %16623 = vmatprep.subr.bf16.mxu1 %v17362_v3 }
 0x819   :  { %v4052_v59 = vpop.f32.mrb[26].mxu1 }
 0x81a   :  { %v17137_v63 = vadd.f32 %v18005_v62, %v4052_v59  ;;  %v15299_v1 = vpop.f32.mrb[27].mxu1 }
 0x81c   :  { %v4101_v7 = vrot.slane %v17137_v63, %v17475_v23  ;;  %v4127_v49 = vrot.slane %v17137_v63, 1  ;;  %v4130_v8 = vsel %vm4125_vm9, %v4121_v61, %v17137_v63  ;;  %v15320_v61 = vpop.f32.mrb[31].mxu0 }
 0x81d   :  { %v4520_v63 = vpop.f32.mrb[32].mxu0 }
 0x81e   :  { %v4102_v11 = vcombine.high %v4101_v7, %v4101_v7  ;;  %v4109_v12 = vrot.slane %v4101_v7, %v17475_v23  ;;  %v4131_v14 = vsel %vm4126_vm10, %v4122_v4, %v4127_v49  ;;  %v15334_v4 = vpop.f32.mrb[33].mxu0 }
 0x81f   :  { %v4599_v15 = vrot.slane %v4131_v14, 7 }
 0x820   :  { %v4116_v17 = vrot.slane %v4102_v11, %v17475_v23  ;;  %4119 = vst.msk [vmem:[%s18977_s9 + $0x2] sm:$0x1] %vm83_vm5, %v4109_v12 }
 0x821   :  { %v4600_v19 = vsel %vm97_vm1, %v4599_v15, %v4130_v8 }
 0x822   :  { %4120 = vst.msk [vmem:[%s18977_s9 + $0xa] sm:$0x1] %vm83_vm5, %v4116_v17  ;;  %v4601_v21 = vsel %vm99_vm2, %v4600_v19, 0 }
 0x823   :  { %v4670_v22 = vand.u32 4294901760, %v4601_v21 }
 0x825   :  { %15354 = vmatmul.mubr.f32.vlgmr.msra.gmra.mrb[34].mxu1 %v4670_v22  ;;  %v4671_v16 = vsub.f32 %v4601_v21, %v4670_v22 }
 0x826   :  { %16625 = vmatpush3.bf16.msra.mxu1 %v17563_v2  ;;  %15367 = vmatprep.mubr.msk.f32.mxu1 %vm17363_vm0, %v17364_v6 }
 0x827   :  { %v4672_v35 = vand.u32 4294901760, %v4671_v16  ;;  %16629 = vmatprep.subr.bf16.mxu1 %v17362_v3 }
 0x829   :  { %15368 = vmatmul.mubr.f32.vlgmr.msra.gmra.mrb[36].mxu1 %v4672_v35  ;;  %v4673_v47 = vsub.f32 %v4671_v16, %v4672_v35 }
 0x82a   :  { %16631 = vmatpush3.bf16.msra.mxu1 %v17563_v2  ;;  %15381 = vmatprep.mubr.msk.f32.mxu1 %vm17363_vm0, %v17364_v6 }
 0x82b   :  { %v4674_v48 = vand.u32 4294901760, %v4673_v47  ;;  %16668 = vmatprep.subr.bf16.mxu1 %v17362_v3 }
 0x82d   :  { %15347 = vmatmul.mubr.f32.vlgmr.msra.gmra.mrb[34].mxu0 %v4674_v48  ;;  %15382 = vmatmul.mubr.f32.vlgmr.msra.gmra.mrb[38].mxu1 %v4670_v22 }
 0x82e   :  { %16622 = vmatpush3.bf16.msra.mxu0 %v17583_v13  ;;  %15360 = vmatprep.mubr.msk.f32.mxu0 %vm17363_vm0, %v17364_v6 }
 0x82f   :  { %16626 = vmatprep.subr.bf16.mxu0 %v17362_v3  ;;  %16670 = vmatpush3.bf16.msra.mxu1 %v17701_v56 }
 0x830   :  { %16671 = vmatprep.subr.bf16.mxu1 %v17362_v3  ;;  %15458 = vmatprep.mubr.msk.f32.mxu1 %vm17363_vm0, %v17364_v6 }
 0x831   :  { %15361 = vmatmul.mubr.f32.vlgmr.msra.gmra.mrb[36].mxu0 %v4671_v16 }
 0x832   :  { %16628 = vmatpush3.bf16.msra.mxu0 %v17596_v18  ;;  %15374 = vmatprep.mubr.msk.f32.mxu0 %vm17363_vm0, %v17364_v6 }
 0x833   :  { %16632 = vmatprep.subr.bf16.mxu0 %v17362_v3  ;;  %16673 = vmatpush3.bf16.msra.mxu1 %v17711_v5 }
 0x834   :  { %16674 = vmatprep.subr.bf16.mxu1 %v17362_v3 }
 0x835   :  { %15375 = vmatmul.mubr.f32.vlgmr.msra.gmra.mrb[38].mxu0 %v4670_v22 }
 0x836   :  { %16634 = vmatpush3.bf16.msra.mxu0 %v17608_v24  ;;  %15392 = vmatprep.mubr.msk.f32.mxu0 %vm17363_vm0, %v17364_v6 }
 0x837   :  { %16635 = vmatprep.subr.bf16.mxu0 %v17362_v3 }
 0x83a   :  { %16637 = vmatpush3.bf16.msra.mxu0 %v17621_v29 }
 0x83b   :  { %16638 = vmatprep.subr.bf16.mxu0 %v17362_v3 }
 0x83d   :  { %15393 = vmatmul.mubr.f32.vlgmr.msra.gmra.mrb[40].mxu0 %v17925_v33 }
 0x83e   :  { %16640 = vmatpush3.bf16.msra.mxu0 %v17628_v34  ;;  %15403 = vmatprep.mubr.msk.f32.mxu0 %vm17363_vm0, %v17364_v6 }
 0x83f   :  { %16641 = vmatprep.subr.bf16.mxu0 %v17362_v3 }
 0x842   :  { %16643 = vmatpush3.bf16.msra.mxu0 %v17633_v37 }
 0x843   :  { %16644 = vmatprep.subr.bf16.mxu0 %v17362_v3 }
 0x845   :  { %15404 = vmatmul.mubr.f32.vlgmr.msra.gmra.mrb[40].mxu0 %v17915_v25 }
 0x846   :  { %16646 = vmatpush3.bf16.msra.mxu0 %v17641_v38  ;;  %15414 = vmatprep.mubr.msk.f32.mxu0 %vm17363_vm0, %v17364_v6 }
 0x847   :  { %16647 = vmatprep.subr.bf16.mxu0 %v17362_v3 }
 0x84a   :  { %16649 = vmatpush3.bf16.msra.mxu0 %v17646_v39 }
 0x84b   :  { %16650 = vmatprep.subr.bf16.mxu0 %v17362_v3 }
 0x84d   :  { %15415 = vmatmul.mubr.f32.vlgmr.msra.gmra.mrb[40].mxu0 %v17918_v28  ;;  %v4292_v28 = vpop.f32.mrb[28].mxu1 }
 0x84e   :  { %16652 = vmatpush3.bf16.msra.mxu0 %v17608_v24  ;;  %15425 = vmatprep.mubr.msk.f32.mxu0 %vm17363_vm0, %v17364_v6  ;;  %v4293_v51 = vadd.f32 %v4292_v28, %v4211_v55 }
 0x84f   :  { %16653 = vmatprep.subr.bf16.mxu0 %v17362_v3 }
 0x850   :  { %v4369_v59 = vadd.f32 %v4368_v58, %v4293_v51 }
 0x852   :  { %16655 = vmatpush3.bf16.msra.mxu0 %v17621_v29 }
 0x853   :  { %16656 = vmatprep.subr.bf16.mxu0 %v17362_v3 }
 0x855   :  { %15426 = vmatmul.mubr.f32.vlgmr.msra.gmra.mrb[40].mxu0 %v17921_v31  ;;  %v15313_v31 = vpop.f32.mrb[29].mxu1 }
 0x856   :  { %16658 = vmatpush3.bf16.msra.mxu0 %v17659_v40  ;;  %15436 = vmatprep.mubr.msk.f32.mxu0 %vm17363_vm0, %v17364_v6  ;;  %v4443_v33 = vpop.f32.mrb[30].mxu1 }
 0x857   :  { %16659 = vmatprep.subr.bf16.mxu0 %v17362_v3  ;;  %v15327_v52 = vpop.f32.mrb[31].mxu1 }
 0x858   :  { %v4593_v50 = vpop.f32.mrb[32].mxu1 }
 0x859   :  { %v15341_v57 = vpop.f32.mrb[33].mxu1 }
 0x85a   :  { %16661 = vmatpush3.bf16.msra.mxu0 %v17664_v41 }
 0x85b   :  { %16662 = vmatprep.subr.bf16.mxu0 %v17362_v3 }
 0x85d   :  { %15437 = vmatmul.mubr.f32.vlgmr.msra.gmra.mrb[40].mxu0 %v17915_v25 }
 0x85e   :  { %16664 = vmatpush3.bf16.msra.mxu0 %v17608_v24  ;;  %15447 = vmatprep.mubr.msk.f32.mxu0 %vm17363_vm0, %v17364_v6 }
 0x85f   :  { %16665 = vmatprep.subr.bf16.mxu0 %v17362_v3 }
 0x862   :  { %16667 = vmatpush3.bf16.msra.mxu0 %v17621_v29 }
 0x863   :  { %16704 = vmatprep.subr.bf16.mxu0 %v17362_v3 }
 0x865   :  { %15448 = vmatmul.mubr.f32.vlgmr.msra.gmra.mrb[40].mxu0 %v17915_v25  ;;  %v4444_v25 = vadd.f32 %v4443_v33, %v4369_v59 }
 0x866   :  { %16706 = vmatpush3.bf16.msra.mxu0 %v17440_v10  ;;  %15520 = vmatprep.mubr.msk.f32.mxu0 %vm17363_vm0, %v17364_v6 }
 0x867   :  { %16710 = vmatprep.subr.bf16.mxu0 %v17362_v3  ;;  %v4521_v1 = vadd.f32 %v4520_v63, %v4444_v25 }
 0x869   :  { %v4594_v7 = vadd.f32 %v4593_v50, %v4521_v1 }
 0x8f8   :  { %v4757_v49 = vpop.f32.mrb[34].mxu1 }
 0x8f9   :  { %v15355_v8 = vpop.f32.mrb[35].mxu1 }
 0x8fc   :  { %v4908_v11 = vpop.f32.mrb[36].mxu1 }
 0x8fd   :  { %v15369_v12 = vpop.f32.mrb[37].mxu1 }
 0x900   :  { %v4676_v14 = vpop.f32.mrb[34].mxu0  ;;  %v5058_v15 = vpop.f32.mrb[38].mxu1 }
 0x901   :  { %v4677_v17 = vadd.f32 %v4676_v14, %v4594_v7  ;;  %v15348_v19 = vpop.f32.mrb[35].mxu0  ;;  %v15383_v21 = vpop.f32.mrb[39].mxu1 }
 0x903   :  { %v4758_v22 = vadd.f32 %v4757_v49, %v4677_v17 }
 0x904   :  { %v4833_v16 = vpop.f32.mrb[36].mxu0 }
 0x905   :  { %v4834_v35 = vadd.f32 %v4833_v16, %v4758_v22  ;;  %v15362_v47 = vpop.f32.mrb[37].mxu0 }
 0x906   :  { %v6133_v47 = vld [vmem:[%s18969_s1 + $0xb] sm:$0x1] }
 0x907   :  { %v4909_v48 = vadd.f32 %v4908_v11, %v4834_v35  ;;  %vm6135_vm12 = vcmp.ne.f32.partialorder %v6133_v47, 0.0 }
 0x908   :  { %v4985_v28 = vpop.f32.mrb[38].mxu0 }
 0x909   :  { %v4986_v31 = vadd.f32 %v4985_v28, %v4909_v48  ;;  %v15376_v33 = vpop.f32.mrb[39].mxu0  ;;  %v6143_v48 = vrot.slane %v6133_v47, 7  ;;  %v6132_v28 = vld [vmem:[%s18969_s1 + $0x3] sm:$0x1] }
 0x90a   :  { %vm6134_vm11 = vcmp.ne.f32.partialorder %v6132_v28, 0.0 }
 0x90b   :  { %v5059_v52 = vadd.f32 %v5058_v15, %v4986_v31  ;;  %v6144_v31 = vsel %vm97_vm1, %v6143_v48, %v6132_v28 }
 0x90c   :  { %v6145_v33 = vsel %vm99_vm2, %v6144_v31, 0 }
 0x90d   :  { %v5062_v54 = vadd.f32 %v17690_v32, %v5059_v52  ;;  %v6214_v52 = vand.u32 4294901760, %v6145_v33 }
 0x938   :  { %v5544_v55 = vpop.f32.mrb[40].mxu0 }
 0x939   :  { %v5555_v50 = vadd.f32 %v5544_v55, %v17683_v27  ;;  %v15449_v51 = vpop.f32.mrb[41].mxu0  ;;  %v5548_v57 = vadd.f32 %v5544_v55, %v5062_v54  ;;  %v6215_v55 = vsub.f32 %v6145_v33, %v6214_v52 }
 0x93b   :  { %5557 = vrot.lane.b32.xlu1 %v5555_v50, %s17366_s11  ;;  %v14191_v58 = vmul.f32 -1.442695, %v5548_v57  ;;  %v6216_v50 = vand.u32 4294901760, %v6215_v55 }
 0x93d   :  { %17304 = vpow2.f32 %v14191_v58  ;;  %v6217_v51 = vsub.f32 %v6215_v55, %v6216_v50  ;;  %v6130_v58 = vld [vmem:[%s18968_s0 + $0x3] sm:$0x1] }
 0x947   :  { %v17305_v59 = vpop.eup %17304 }
 0x948   :  { %v5552_v61 = vadd.f32 1.0, %v17305_v59 }
 0x94a   :  { %17306 = vrcp.f32 %v5552_v61 }
 0x954   :  { %v17307_v25 = vpop.eup %17306 }
 0x955   :  { %v5567_v8 = vsub.f32 1.0, %v17307_v25  ;;  %v5573_v32 = vmul.f32 %v17307_v25, %v17910_v20 }
 0x9ad   :  { %v5558_v63 = vpop.permute.xlu1 %5557 }
 0x9ae   :  { %v5560_v1 = vmul.f32 %v17307_v25, %v5558_v63  ;;  %v6131_v25 = vld [vmem:[%s18968_s0 + $0xb] sm:$0x1] }
 0x9b0   :  { %5562 = vrot.lane.b32.xlu0 %v5560_v1, %s17366_s11 }
 0xa22   :  { %v5563_v4 = vpop.permute.xlu0 %5562 }
 0xa23   :  { %v5565_v7 = vadd.f32 %v5563_v4, %v5062_v54  ;;  %v6218_v54 = vand.u32 4294901760, %v6217_v51 }
 0xa25   :  { %17308 = vtanh.f32 %v5565_v7  ;;  %15521 = vmatmul.mubr.f32.vlgmr.msra.gmra.mrb[42].mxu0 %v6218_v54 }
 0xa26   :  { %16712 = vmatpush3.bf16.msra.mxu0 %v17529_v53  ;;  %15534 = vmatprep.mubr.msk.f32.mxu0 %vm17363_vm0, %v17364_v6 }
 0xa27   :  { %16716 = vmatprep.subr.bf16.mxu0 %v17362_v3 }
 0xa29   :  { %15535 = vmatmul.mubr.f32.vlgmr.msra.gmra.mrb[44].mxu0 %v6215_v55 }
 0xa2a   :  { %16718 = vmatpush3.bf16.msra.mxu0 %v17543_v60  ;;  %15548 = vmatprep.mubr.msk.f32.mxu0 %vm17363_vm0, %v17364_v6 }
 0xa2b   :  { %16722 = vmatprep.subr.bf16.mxu0 %v17362_v3 }
 0xa2d   :  { %15549 = vmatmul.mubr.f32.vlgmr.msra.gmra.mrb[46].mxu0 %v6214_v52 }
 0xa2e   :  { %16724 = vmatpush3.bf16.msra.mxu0 %v17563_v2  ;;  %15562 = vmatprep.mubr.msk.f32.mxu0 %vm17363_vm0, %v17364_v6 }
 0xa2f   :  { %v17309_v49 = vpop.eup %17308  ;;  %16728 = vmatprep.subr.bf16.mxu0 %v17362_v3 }
 0xa30   :  { %5569 = vrot.lane.b32.xlu1 %v17309_v49, %s17367_s23 }
 0xaa2   :  { %v5570_v11 = vpop.permute.xlu1 %5569 }
 0xaa3   :  { %v5572_v12 = vmul.f32 %v5570_v11, %v5567_v8 }
 0xaa5   :  { %v18098_v14 = vadd.f32 %v5573_v32, %v5572_v12 }
 0xaa7   :  { %5576 = vrot.lane.b32.xlu0 %v18098_v14, %s17367_s23 }
 0xaf8   :  { %v6220_v33 = vpop.f32.mrb[42].mxu0 }
 0xb19   :  { %v5577_v15 = vpop.permute.xlu0 %5576 }
 0xb1a   :  { %v5578_v17 = vsel %vm1033_vm6, %v5577_v15, 0 }
 0xb1b   :  { %v18103_v19 = vand.u32 4294901760, %v5578_v17 }
 0xb1d   :  { %v18106_v21 = vsub.f32 %v5578_v17, %v18103_v19 }
 0xb1f   :  { %v18109_v22 = vand.u32 4294901760, %v18106_v21 }
 0xb21   :  { %v5652_v16 = vsub.f32 %v18106_v21, %v18109_v22 }
 0xb23   :  { %v18113_v35 = vand.u32 4294901760, %v5652_v16 }
 0xb25   :  { %15459 = vmatmul.mubr.f32.vlgmr.msra.gmra.mrb[40].mxu1 %v18113_v35 }
 0xb26   :  { %16676 = vmatpush3.bf16.msra.mxu1 %v17715_v26  ;;  %15469 = vmatprep.mubr.msk.f32.mxu1 %vm17363_vm0, %v17364_v6 }
 0xb27   :  { %16677 = vmatprep.subr.bf16.mxu1 %v17362_v3 }
 0xb2a   :  { %16679 = vmatpush3.bf16.msra.mxu1 %v17721_v36 }
 0xb2b   :  { %16680 = vmatprep.subr.bf16.mxu1 %v17362_v3 }
 0xb2d   :  { %15470 = vmatmul.mubr.f32.vlgmr.msra.gmra.mrb[40].mxu1 %v18103_v19 }
 0xb2e   :  { %16682 = vmatpush3.bf16.msra.mxu1 %v17723_v43  ;;  %15480 = vmatprep.mubr.msk.f32.mxu1 %vm17363_vm0, %v17364_v6 }
 0xb2f   :  { %16683 = vmatprep.subr.bf16.mxu1 %v17362_v3 }
 0xb32   :  { %16685 = vmatpush3.bf16.msra.mxu1 %v17725_v44 }
 0xb33   :  { %16686 = vmatprep.subr.bf16.mxu1 %v17362_v3 }
 0xb35   :  { %15481 = vmatmul.mubr.f32.vlgmr.msra.gmra.mrb[40].mxu1 %v18106_v21 }
 0xb36   :  { %16688 = vmatpush3.bf16.msra.mxu1 %v17701_v56  ;;  %15491 = vmatprep.mubr.msk.f32.mxu1 %vm17363_vm0, %v17364_v6 }
 0xb37   :  { %16689 = vmatprep.subr.bf16.mxu1 %v17362_v3 }
 0xb3a   :  { %16691 = vmatpush3.bf16.msra.mxu1 %v17711_v5 }
 0xb3b   :  { %16692 = vmatprep.subr.bf16.mxu1 %v17362_v3 }
 0xb3d   :  { %15492 = vmatmul.mubr.f32.vlgmr.msra.gmra.mrb[40].mxu1 %v18109_v22 }
 0xb3e   :  { %16694 = vmatpush3.bf16.msra.mxu1 %v17727_v45  ;;  %15502 = vmatprep.mubr.msk.f32.mxu1 %vm17363_vm0, %v17364_v6 }
 0xb3f   :  { %16695 = vmatprep.subr.bf16.mxu1 %v17362_v3 }
 0xb42   :  { %16697 = vmatpush3.bf16.msra.mxu1 %v17729_v46 }
 0xb43   :  { %16698 = vmatprep.subr.bf16.mxu1 %v17362_v3 }
 0xb45   :  { %15503 = vmatmul.mubr.f32.vlgmr.msra.gmra.mrb[40].mxu1 %v18103_v19 }
 0xb46   :  { %16700 = vmatpush3.bf16.msra.mxu1 %v17701_v56  ;;  %15513 = vmatprep.mubr.msk.f32.mxu1 %vm17363_vm0, %v17364_v6 }
 0xb47   :  { %16701 = vmatprep.subr.bf16.mxu1 %v17362_v3 }
 0xb4a   :  { %16703 = vmatpush3.bf16.msra.mxu1 %v17711_v5 }
 0xb4b   :  { %16707 = vmatprep.subr.bf16.mxu1 %v17362_v3 }
 0xb4d   :  { %15514 = vmatmul.mubr.f32.vlgmr.msra.gmra.mrb[40].mxu1 %v18103_v19 }
 0xb4e   :  { %16709 = vmatpush3.bf16.msra.mxu1 %v17504_v42  ;;  %15527 = vmatprep.mubr.msk.f32.mxu1 %vm17363_vm0, %v17364_v6 }
 0xb4f   :  { %16713 = vmatprep.subr.bf16.mxu1 %v17362_v3 }
 0xb51   :  { %15528 = vmatmul.mubr.f32.vlgmr.msra.gmra.mrb[42].mxu1 %v6214_v52 }
 0xb52   :  { %16715 = vmatpush3.bf16.msra.mxu1 %v17440_v10  ;;  %15541 = vmatprep.mubr.msk.f32.mxu1 %vm17363_vm0, %v17364_v6 }
 0xb53   :  { %16719 = vmatprep.subr.bf16.mxu1 %v17362_v3 }
 0xb55   :  { %15542 = vmatmul.mubr.f32.vlgmr.msra.gmra.mrb[44].mxu1 %v6216_v50  ;;  %v15522_v50 = vpop.f32.mrb[43].mxu0 }
 0xb56   :  { %16721 = vmatpush3.bf16.msra.mxu1 %v17440_v10  ;;  %15555 = vmatprep.mubr.msk.f32.mxu1 %vm17363_vm0, %v17364_v6  ;;  %v6377_v54 = vpop.f32.mrb[44].mxu0  ;;  %v18280_v50 = vld [vmem:[%s18973_s5] ss:$0 sm:$0xff] }
 0xb57   :  { %16725 = vmatprep.subr.bf16.mxu1 %v17362_v3 }
 0xb59   :  { %15556 = vmatmul.mubr.f32.vlgmr.msra.gmra.mrb[46].mxu1 %v6214_v52 }
 0xb5a   :  { %16727 = vmatpush3.bf16.msra.mxu1 %v17555_v0  ;;  %15569 = vmatprep.mubr.msk.f32.mxu1 %vm17363_vm0, %v17364_v6 }
 0xb5b   :  { %16731 = vmatprep.subr.bf16.mxu1 %v17362_v3 }
 0xc20   :  { %v6061_v57 = vpop.f32.mrb[40].mxu1 }
 0xc21   :  { %v17138_v59 = vadd.f32 %v18005_v62, %v6061_v57  ;;  %v15515_v61 = vpop.f32.mrb[41].mxu1 }
 0xc23   :  { %v6110_v63 = vrot.slane %v17138_v59, %v17475_v23  ;;  %v6136_v1 = vrot.slane %v17138_v59, 1  ;;  %v6139_v4 = vsel %vm6134_vm11, %v6130_v58, %v17138_v59  ;;  %v15536_v58 = vpop.f32.mrb[45].mxu0 }
 0xc24   :  { %v6529_v59 = vpop.f32.mrb[46].mxu0 }
 0xc25   :  { %v6111_v7 = vcombine.high %v6110_v63, %v6110_v63  ;;  %v6118_v49 = vrot.slane %v6110_v63, %v17475_v23  ;;  %v6140_v8 = vsel %vm6135_vm12, %v6131_v25, %v6136_v1  ;;  %v15550_v25 = vpop.f32.mrb[47].mxu0 }
 0xc26   :  { %v6608_v11 = vrot.slane %v6140_v8, 7 }
 0xc27   :  { %v6125_v32 = vrot.slane %v6111_v7, %v17475_v23  ;;  %6128 = vst.msk [vmem:[%s18977_s9 + $0x3] sm:$0x1] %vm83_vm5, %v6118_v49 }
 0xc28   :  { %v6609_v12 = vsel %vm97_vm1, %v6608_v11, %v6139_v4 }
 0xc29   :  { %6129 = vst.msk [vmem:[%s18977_s9 + $0xb] sm:$0x1] %vm83_vm5, %v6125_v32  ;;  %v6610_v15 = vsel %vm99_vm2, %v6609_v12, 0 }
 0xc2a   :  { %v6679_v17 = vand.u32 4294901760, %v6610_v15 }
 0xc2c   :  { %15570 = vmatmul.mubr.f32.vlgmr.msra.gmra.mrb[48].mxu1 %v6679_v17  ;;  %v6680_v16 = vsub.f32 %v6610_v15, %v6679_v17 }
 0xc2d   :  { %16733 = vmatpush3.bf16.msra.mxu1 %v17563_v2  ;;  %15583 = vmatprep.mubr.msk.f32.mxu1 %vm17363_vm0, %v17364_v6 }
 0xc2e   :  { %v6681_v47 = vand.u32 4294901760, %v6680_v16  ;;  %16737 = vmatprep.subr.bf16.mxu1 %v17362_v3 }
 0xc30   :  { %15584 = vmatmul.mubr.f32.vlgmr.msra.gmra.mrb[50].mxu1 %v6681_v47  ;;  %v6682_v48 = vsub.f32 %v6680_v16, %v6681_v47 }
 0xc31   :  { %16739 = vmatpush3.bf16.msra.mxu1 %v17563_v2  ;;  %15597 = vmatprep.mubr.msk.f32.mxu1 %vm17363_vm0, %v17364_v6 }
 0xc32   :  { %v6683_v28 = vand.u32 4294901760, %v6682_v48  ;;  %16776 = vmatprep.subr.bf16.mxu1 %v17362_v3 }
 0xc34   :  { %15563 = vmatmul.mubr.f32.vlgmr.msra.gmra.mrb[48].mxu0 %v6683_v28  ;;  %15598 = vmatmul.mubr.f32.vlgmr.msra.gmra.mrb[52].mxu1 %v6679_v17 }
 0xc35   :  { %16730 = vmatpush3.bf16.msra.mxu0 %v17583_v13  ;;  %15576 = vmatprep.mubr.msk.f32.mxu0 %vm17363_vm0, %v17364_v6 }
 0xc36   :  { %16734 = vmatprep.subr.bf16.mxu0 %v17362_v3  ;;  %16778 = vmatpush3.bf16.msra.mxu1 %v17701_v56 }
 0xc37   :  { %16779 = vmatprep.subr.bf16.mxu1 %v17362_v3  ;;  %15674 = vmatprep.mubr.msk.f32.mxu1 %vm17363_vm0, %v17364_v6 }
 0xc38   :  { %15577 = vmatmul.mubr.f32.vlgmr.msra.gmra.mrb[50].mxu0 %v6680_v16 }
 0xc39   :  { %16736 = vmatpush3.bf16.msra.mxu0 %v17596_v18  ;;  %15590 = vmatprep.mubr.msk.f32.mxu0 %vm17363_vm0, %v17364_v6 }
 0xc3a   :  { %16740 = vmatprep.subr.bf16.mxu0 %v17362_v3  ;;  %16781 = vmatpush3.bf16.msra.mxu1 %v17711_v5 }
 0xc3b   :  { %16782 = vmatprep.subr.bf16.mxu1 %v17362_v3 }
 0xc3c   :  { %15591 = vmatmul.mubr.f32.vlgmr.msra.gmra.mrb[52].mxu0 %v6679_v17 }
 0xc3d   :  { %16742 = vmatpush3.bf16.msra.mxu0 %v17608_v24  ;;  %15608 = vmatprep.mubr.msk.f32.mxu0 %vm17363_vm0, %v17364_v6 }
 0xc3e   :  { %16743 = vmatprep.subr.bf16.mxu0 %v17362_v3 }
 0xc41   :  { %16745 = vmatpush3.bf16.msra.mxu0 %v17621_v29 }
 0xc42   :  { %16746 = vmatprep.subr.bf16.mxu0 %v17362_v3 }
 0xc44   :  { %15609 = vmatmul.mubr.f32.vlgmr.msra.gmra.mrb[54].mxu0 %v18113_v35 }
 0xc45   :  { %16748 = vmatpush3.bf16.msra.mxu0 %v17628_v34  ;;  %15619 = vmatprep.mubr.msk.f32.mxu0 %vm17363_vm0, %v17364_v6 }
 0xc46   :  { %16749 = vmatprep.subr.bf16.mxu0 %v17362_v3 }
 0xc49   :  { %16751 = vmatpush3.bf16.msra.mxu0 %v17633_v37 }
 0xc4a   :  { %16752 = vmatprep.subr.bf16.mxu0 %v17362_v3 }
 0xc4c   :  { %15620 = vmatmul.mubr.f32.vlgmr.msra.gmra.mrb[54].mxu0 %v18103_v19 }
 0xc4d   :  { %16754 = vmatpush3.bf16.msra.mxu0 %v17641_v38  ;;  %15630 = vmatprep.mubr.msk.f32.mxu0 %vm17363_vm0, %v17364_v6 }
 0xc4e   :  { %16755 = vmatprep.subr.bf16.mxu0 %v17362_v3 }
 0xc51   :  { %16757 = vmatpush3.bf16.msra.mxu0 %v17646_v39 }
 0xc52   :  { %16758 = vmatprep.subr.bf16.mxu0 %v17362_v3 }
 0xc54   :  { %15631 = vmatmul.mubr.f32.vlgmr.msra.gmra.mrb[54].mxu0 %v18106_v21  ;;  %v6301_v21 = vpop.f32.mrb[42].mxu1 }
 0xc55   :  { %16760 = vmatpush3.bf16.msra.mxu0 %v17608_v24  ;;  %15641 = vmatprep.mubr.msk.f32.mxu0 %vm17363_vm0, %v17364_v6  ;;  %v6302_v55 = vadd.f32 %v6301_v21, %v6220_v33 }
 0xc56   :  { %16761 = vmatprep.subr.bf16.mxu0 %v17362_v3 }
 0xc57   :  { %v6378_v57 = vadd.f32 %v6377_v54, %v6302_v55 }
 0xc59   :  { %16763 = vmatpush3.bf16.msra.mxu0 %v17621_v29 }
 0xc5a   :  { %16764 = vmatprep.subr.bf16.mxu0 %v17362_v3 }
 0xc5c   :  { %15642 = vmatmul.mubr.f32.vlgmr.msra.gmra.mrb[54].mxu0 %v18109_v22  ;;  %v15529_v22 = vpop.f32.mrb[43].mxu1 }
 0xc5d   :  { %16766 = vmatpush3.bf16.msra.mxu0 %v17659_v40  ;;  %15652 = vmatprep.mubr.msk.f32.mxu0 %vm17363_vm0, %v17364_v6  ;;  %v6452_v35 = vpop.f32.mrb[44].mxu1 }
 0xc5e   :  { %16767 = vmatprep.subr.bf16.mxu0 %v17362_v3  ;;  %v15543_v31 = vpop.f32.mrb[45].mxu1 }
 0xc5f   :  { %v6602_v52 = vpop.f32.mrb[46].mxu1 }
 0xc60   :  { %v15557_v51 = vpop.f32.mrb[47].mxu1 }
 0xc61   :  { %16769 = vmatpush3.bf16.msra.mxu0 %v17664_v41 }
 0xc62   :  { %16770 = vmatprep.subr.bf16.mxu0 %v17362_v3 }
 0xc64   :  { %15653 = vmatmul.mubr.f32.vlgmr.msra.gmra.mrb[54].mxu0 %v18103_v19 }
 0xc65   :  { %16772 = vmatpush3.bf16.msra.mxu0 %v17608_v24  ;;  %15663 = vmatprep.mubr.msk.f32.mxu0 %vm17363_vm0, %v17364_v6 }
 0xc66   :  { %16773 = vmatprep.subr.bf16.mxu0 %v17362_v3 }
 0xc69   :  { %16775 = vmatpush3.bf16.msra.mxu0 %v17621_v29 }
 0xc6a   :  { %16812 = vmatprep.subr.bf16.mxu0 %v17362_v3 }
 0xc6c   :  { %15664 = vmatmul.mubr.f32.vlgmr.msra.gmra.mrb[54].mxu0 %v18103_v19  ;;  %v6453_v19 = vadd.f32 %v6452_v35, %v6378_v57 }
 0xc6d   :  { %16814 = vmatpush3.bf16.msra.mxu0 %v17440_v10  ;;  %15736 = vmatprep.mubr.msk.f32.mxu0 %vm17363_vm0, %v17364_v6 }
 0xc6e   :  { %16818 = vmatprep.subr.bf16.mxu0 %v17362_v3  ;;  %v6530_v61 = vadd.f32 %v6529_v59, %v6453_v19 }
 0xc70   :  { %v6603_v63 = vadd.f32 %v6602_v52, %v6530_v61 }
 0xcff   :  { %v6766_v1 = vpop.f32.mrb[48].mxu1 }
 0xd00   :  { %v15571_v4 = vpop.f32.mrb[49].mxu1 }
 0xd03   :  { %v6917_v7 = vpop.f32.mrb[50].mxu1 }
 0xd04   :  { %v15585_v49 = vpop.f32.mrb[51].mxu1 }
 0xd07   :  { %v6685_v8 = vpop.f32.mrb[48].mxu0  ;;  %v7067_v11 = vpop.f32.mrb[52].mxu1 }
 0xd08   :  { %v6686_v32 = vadd.f32 %v6685_v8, %v6603_v63  ;;  %v15564_v12 = vpop.f32.mrb[49].mxu0  ;;  %v15599_v15 = vpop.f32.mrb[53].mxu1 }
 0xd0a   :  { %v6767_v17 = vadd.f32 %v6766_v1, %v6686_v32 }
 0xd0b   :  { %v6842_v16 = vpop.f32.mrb[50].mxu0 }
 0xd0c   :  { %v6843_v47 = vadd.f32 %v6842_v16, %v6767_v17  ;;  %v15578_v48 = vpop.f32.mrb[51].mxu0 }
 0xd0e   :  { %v6918_v28 = vadd.f32 %v6917_v7, %v6843_v47 }
 0xd0f   :  { %v6994_v21 = vpop.f32.mrb[52].mxu0 }
 0xd10   :  { %v6995_v22 = vadd.f32 %v6994_v21, %v6918_v28  ;;  %v15592_v35 = vpop.f32.mrb[53].mxu0  ;;  %v8142_v21 = vld [vmem:[%s18969_s1 + $0xc] sm:$0x1] }
 0xd11   :  { %v8141_v35 = vld [vmem:[%s18969_s1 + $0x4] sm:$0x1]  ;;  %vm8144_vm14 = vcmp.ne.f32.partialorder %v8142_v21, 0.0 }
 0xd12   :  { %v7068_v31 = vadd.f32 %v7067_v11, %v6995_v22  ;;  %v8152_v22 = vrot.slane %v8142_v21, 7  ;;  %vm8143_vm13 = vcmp.ne.f32.partialorder %v8141_v35, 0.0 }
 0xd14   :  { %v7071_v51 = vadd.f32 %v18280_v50, %v7068_v31  ;;  %v8153_v31 = vsel %vm97_vm1, %v8152_v22, %v8141_v35 }
 0xd3f   :  { %v7553_v33 = vpop.f32.mrb[54].mxu0 }
 0xd40   :  { %v7564_v52 = vadd.f32 %v7553_v33, %v17683_v27  ;;  %v15665_v55 = vpop.f32.mrb[55].mxu0  ;;  %v7557_v54 = vadd.f32 %v7553_v33, %v7071_v51  ;;  %v8154_v33 = vsel %vm99_vm2, %v8153_v31, 0 }
 0xd42   :  { %7566 = vrot.lane.b32.xlu1 %v7564_v52, %s17366_s11  ;;  %v14192_v57 = vmul.f32 -1.442695, %v7557_v54  ;;  %v8223_v52 = vand.u32 4294901760, %v8154_v33 }
 0xd44   :  { %17310 = vpow2.f32 %v14192_v57  ;;  %v8224_v55 = vsub.f32 %v8154_v33, %v8223_v52 }
 0xd4e   :  { %v17311_v58 = vpop.eup %17310 }
 0xd4f   :  { %v7561_v19 = vadd.f32 1.0, %v17311_v58 }
 0xd51   :  { %17312 = vrcp.f32 %v7561_v19  ;;  %v8139_v19 = vld [vmem:[%s18968_s0 + $0x4] sm:$0x1] }
 0xd5b   :  { %v17313_v59 = vpop.eup %17312 }
 0xd5c   :  { %v7576_v7 = vsub.f32 1.0, %v17313_v59  ;;  %v7582_v8 = vmul.f32 %v17313_v59, %v18098_v14 }
 0xdb4   :  { %v7567_v61 = vpop.permute.xlu1 %7566 }
 0xdb5   :  { %v7569_v25 = vmul.f32 %v17313_v59, %v7567_v61 }
 0xdb7   :  { %7571 = vrot.lane.b32.xlu0 %v7569_v25, %s17366_s11  ;;  %v8140_v25 = vld [vmem:[%s18968_s0 + $0xc] sm:$0x1] }
 0xe29   :  { %v7572_v63 = vpop.permute.xlu0 %7571 }
 0xe2a   :  { %v7574_v1 = vadd.f32 %v7572_v63, %v7071_v51  ;;  %v8225_v51 = vand.u32 4294901760, %v8224_v55 }
 0xe2c   :  { %17314 = vtanh.f32 %v7574_v1  ;;  %v8226_v54 = vsub.f32 %v8224_v55, %v8225_v51 }
 0xe2e   :  { %v8227_v57 = vand.u32 4294901760, %v8226_v54 }
 0xe30   :  { %15737 = vmatmul.mubr.f32.vlgmr.msra.gmra.mrb[56].mxu0 %v8227_v57 }
 0xe31   :  { %16820 = vmatpush3.bf16.msra.mxu0 %v17529_v53  ;;  %15750 = vmatprep.mubr.msk.f32.mxu0 %vm17363_vm0, %v17364_v6 }
 0xe32   :  { %16824 = vmatprep.subr.bf16.mxu0 %v17362_v3 }
 0xe34   :  { %15751 = vmatmul.mubr.f32.vlgmr.msra.gmra.mrb[58].mxu0 %v8224_v55 }
 0xe35   :  { %16826 = vmatpush3.bf16.msra.mxu0 %v17543_v60  ;;  %15764 = vmatprep.mubr.msk.f32.mxu0 %vm17363_vm0, %v17364_v6 }
 0xe36   :  { %v17315_v4 = vpop.eup %17314  ;;  %16830 = vmatprep.subr.bf16.mxu0 %v17362_v3 }
 0xe37   :  { %7578 = vrot.lane.b32.xlu1 %v17315_v4, %s17367_s23 }
 0xe38   :  { %15765 = vmatmul.mubr.f32.vlgmr.msra.gmra.mrb[60].mxu0 %v8223_v52 }
 0xe39   :  { %16832 = vmatpush3.bf16.msra.mxu0 %v17563_v2  ;;  %15778 = vmatprep.mubr.msk.f32.mxu0 %vm17363_vm0, %v17364_v6 }
 0xe3a   :  { %16836 = vmatprep.subr.bf16.mxu0 %v17362_v3 }
 0xea9   :  { %v7579_v49 = vpop.permute.xlu1 %7578 }
 0xeaa   :  { %v7581_v11 = vmul.f32 %v7579_v49, %v7576_v7 }
 0xeac   :  { %v18286_v32 = vadd.f32 %v7582_v8, %v7581_v11 }
 0xeae   :  { %7585 = vrot.lane.b32.xlu0 %v18286_v32, %s17367_s23 }
 0xf20   :  { %v7586_v12 = vpop.permute.xlu0 %7585 }
 0xf21   :  { %v7587_v15 = vsel %vm1033_vm6, %v7586_v12, 0 }
 0xf22   :  { %v18291_v17 = vand.u32 4294901760, %v7587_v15 }
 0xf24   :  { %v18294_v16 = vsub.f32 %v7587_v15, %v18291_v17 }
 0xf26   :  { %v18297_v47 = vand.u32 4294901760, %v18294_v16 }
 0xf28   :  { %v7661_v48 = vsub.f32 %v18294_v16, %v18297_v47 }
 0xf2a   :  { %v18301_v28 = vand.u32 4294901760, %v7661_v48 }
 0xf2c   :  { %15675 = vmatmul.mubr.f32.vlgmr.msra.gmra.mrb[54].mxu1 %v18301_v28 }
 0xf2d   :  { %16784 = vmatpush3.bf16.msra.mxu1 %v17715_v26  ;;  %15685 = vmatprep.mubr.msk.f32.mxu1 %vm17363_vm0, %v17364_v6 }
 0xf2e   :  { %16785 = vmatprep.subr.bf16.mxu1 %v17362_v3 }
 0xf31   :  { %16787 = vmatpush3.bf16.msra.mxu1 %v17721_v36 }
 0xf32   :  { %16788 = vmatprep.subr.bf16.mxu1 %v17362_v3 }
 0xf34   :  { %15686 = vmatmul.mubr.f32.vlgmr.msra.gmra.mrb[54].mxu1 %v18291_v17 }
 0xf35   :  { %16790 = vmatpush3.bf16.msra.mxu1 %v17723_v43  ;;  %15696 = vmatprep.mubr.msk.f32.mxu1 %vm17363_vm0, %v17364_v6 }
 0xf36   :  { %16791 = vmatprep.subr.bf16.mxu1 %v17362_v3 }
 0xf39   :  { %16793 = vmatpush3.bf16.msra.mxu1 %v17725_v44 }
 0xf3a   :  { %16794 = vmatprep.subr.bf16.mxu1 %v17362_v3 }
 0xf3c   :  { %15697 = vmatmul.mubr.f32.vlgmr.msra.gmra.mrb[54].mxu1 %v18294_v16 }
 0xf3d   :  { %16796 = vmatpush3.bf16.msra.mxu1 %v17701_v56  ;;  %15707 = vmatprep.mubr.msk.f32.mxu1 %vm17363_vm0, %v17364_v6 }
 0xf3e   :  { %16797 = vmatprep.subr.bf16.mxu1 %v17362_v3 }
 0xf41   :  { %16799 = vmatpush3.bf16.msra.mxu1 %v17711_v5 }
 0xf42   :  { %16800 = vmatprep.subr.bf16.mxu1 %v17362_v3 }
 0xf44   :  { %15708 = vmatmul.mubr.f32.vlgmr.msra.gmra.mrb[54].mxu1 %v18297_v47 }
 0xf45   :  { %16802 = vmatpush3.bf16.msra.mxu1 %v17727_v45  ;;  %15718 = vmatprep.mubr.msk.f32.mxu1 %vm17363_vm0, %v17364_v6 }
 0xf46   :  { %16803 = vmatprep.subr.bf16.mxu1 %v17362_v3 }
 0xf49   :  { %16805 = vmatpush3.bf16.msra.mxu1 %v17729_v46 }
 0xf4a   :  { %16806 = vmatprep.subr.bf16.mxu1 %v17362_v3 }
 0xf4c   :  { %15719 = vmatmul.mubr.f32.vlgmr.msra.gmra.mrb[54].mxu1 %v18291_v17 }
 0xf4d   :  { %16808 = vmatpush3.bf16.msra.mxu1 %v17701_v56  ;;  %15729 = vmatprep.mubr.msk.f32.mxu1 %vm17363_vm0, %v17364_v6 }
 0xf4e   :  { %16809 = vmatprep.subr.bf16.mxu1 %v17362_v3 }
 0xf51   :  { %16811 = vmatpush3.bf16.msra.mxu1 %v17711_v5 }
 0xf52   :  { %16815 = vmatprep.subr.bf16.mxu1 %v17362_v3 }
 0xf54   :  { %15730 = vmatmul.mubr.f32.vlgmr.msra.gmra.mrb[54].mxu1 %v18291_v17 }
 0xf55   :  { %16817 = vmatpush3.bf16.msra.mxu1 %v17504_v42  ;;  %15743 = vmatprep.mubr.msk.f32.mxu1 %vm17363_vm0, %v17364_v6 }
 0xf56   :  { %16821 = vmatprep.subr.bf16.mxu1 %v17362_v3 }
 0xf58   :  { %15744 = vmatmul.mubr.f32.vlgmr.msra.gmra.mrb[56].mxu1 %v8223_v52 }
 0xf59   :  { %16823 = vmatpush3.bf16.msra.mxu1 %v17440_v10  ;;  %15757 = vmatprep.mubr.msk.f32.mxu1 %vm17363_vm0, %v17364_v6 }
 0xf5a   :  { %16827 = vmatprep.subr.bf16.mxu1 %v17362_v3 }
 0xf5c   :  { %15758 = vmatmul.mubr.f32.vlgmr.msra.gmra.mrb[58].mxu1 %v8225_v51 }
 0xf5d   :  { %16829 = vmatpush3.bf16.msra.mxu1 %v17440_v10  ;;  %15771 = vmatprep.mubr.msk.f32.mxu1 %vm17363_vm0, %v17364_v6 }
 0xf5e   :  { %16833 = vmatprep.subr.bf16.mxu1 %v17362_v3 }
 0xf60   :  { %15772 = vmatmul.mubr.f32.vlgmr.msra.gmra.mrb[60].mxu1 %v8223_v52  ;;  %v8229_v52 = vpop.f32.mrb[56].mxu0 }
 0xf61   :  { %16835 = vmatpush3.bf16.msra.mxu1 %v17555_v0  ;;  %15785 = vmatprep.mubr.msk.f32.mxu1 %vm17363_vm0, %v17364_v6  ;;  %v15738_v54 = vpop.f32.mrb[57].mxu0 }
 0xf62   :  { %16839 = vmatprep.subr.bf16.mxu1 %v17362_v3 }
0x1027   :  { %v8070_v58 = vpop.f32.mrb[54].mxu1 }
0x1028   :  { %v17139_v59 = vadd.f32 %v18005_v62, %v8070_v58  ;;  %v15731_v61 = vpop.f32.mrb[55].mxu1  ;;  %v8386_v58 = vpop.f32.mrb[58].mxu0 }
0x102a   :  { %v8119_v63 = vrot.slane %v17139_v59, %v17475_v23  ;;  %v8145_v1 = vrot.slane %v17139_v59, 1  ;;  %v8148_v4 = vsel %vm8143_vm13, %v8139_v19, %v17139_v59  ;;  %v15752_v59 = vpop.f32.mrb[59].mxu0 }
0x102b   :  { %v8538_v61 = vpop.f32.mrb[60].mxu0 }
0x102c   :  { %v8120_v7 = vcombine.high %v8119_v63, %v8119_v63  ;;  %v8127_v49 = vrot.slane %v8119_v63, %v17475_v23  ;;  %v8149_v8 = vsel %vm8144_vm14, %v8140_v25, %v8145_v1  ;;  %v15766_v63 = vpop.f32.mrb[61].mxu0 }
0x102d   :  { %v8617_v11 = vrot.slane %v8149_v8, 7 }
0x102e   :  { %v8134_v12 = vrot.slane %v8120_v7, %v17475_v23  ;;  %8137 = vst.msk [vmem:[%s18977_s9 + $0x4] sm:$0x1] %vm83_vm5, %v8127_v49 }
0x102f   :  { %v8618_v62 = vsel %vm97_vm1, %v8617_v11, %v8148_v4 }
0x1030   :  { %8138 = vst.msk [vmem:[%s18977_s9 + $0xc] sm:$0x1] %vm83_vm5, %v8134_v12  ;;  %v8619_v15 = vsel %vm99_vm2, %v8618_v62, 0 }
0x1031   :  { %v8688_v48 = vand.u32 4294901760, %v8619_v15 }
0x1033   :  { %15786 = vmatmul.mubr.f32.vlgmr.msra.gmra.mrb[62].mxu1 %v8688_v48  ;;  %v8689_v21 = vsub.f32 %v8619_v15, %v8688_v48 }
0x1034   :  { %16841 = vmatpush3.bf16.msra.mxu1 %v17563_v2  ;;  %15799 = vmatprep.mubr.msk.f32.mxu1 %vm17363_vm0, %v17364_v6 }
0x1035   :  { %v8690_v22 = vand.u32 4294901760, %v8689_v21  ;;  %16845 = vmatprep.subr.bf16.mxu1 %v17362_v3 }
0x1037   :  { %15800 = vmatmul.mubr.f32.vlgmr.msra.gmra.mrb[64].mxu1 %v8690_v22  ;;  %v8691_v35 = vsub.f32 %v8689_v21, %v8690_v22 }
0x1038   :  { %16847 = vmatpush3.bf16.msra.mxu1 %v17563_v2  ;;  %15813 = vmatprep.mubr.msk.f32.mxu1 %vm17363_vm0, %v17364_v6 }
0x1039   :  { %v8692_v31 = vand.u32 4294901760, %v8691_v35  ;;  %16884 = vmatprep.subr.bf16.mxu1 %v17362_v3 }
0x103b   :  { %15779 = vmatmul.mubr.f32.vlgmr.msra.gmra.mrb[62].mxu0 %v8692_v31  ;;  %15814 = vmatmul.mubr.f32.vlgmr.msra.gmra.mrb[66].mxu1 %v8688_v48 }
0x103c   :  { %16838 = vmatpush3.bf16.msra.mxu0 %v17583_v13  ;;  %15792 = vmatprep.mubr.msk.f32.mxu0 %vm17363_vm0, %v17364_v6 }
0x103d   :  { %16842 = vmatprep.subr.bf16.mxu0 %v17362_v3  ;;  %16886 = vmatpush3.bf16.msra.mxu1 %v17701_v56 }
0x103e   :  { %16887 = vmatprep.subr.bf16.mxu1 %v17362_v3  ;;  %15890 = vmatprep.mubr.msk.f32.mxu1 %vm17363_vm0, %v17364_v6 }
0x103f   :  { %15793 = vmatmul.mubr.f32.vlgmr.msra.gmra.mrb[64].mxu0 %v8689_v21 }
0x1040   :  { %16844 = vmatpush3.bf16.msra.mxu0 %v17596_v18  ;;  %15806 = vmatprep.mubr.msk.f32.mxu0 %vm17363_vm0, %v17364_v6 }
0x1041   :  { %16848 = vmatprep.subr.bf16.mxu0 %v17362_v3  ;;  %16889 = vmatpush3.bf16.msra.mxu1 %v17711_v5 }
0x1042   :  { %16890 = vmatprep.subr.bf16.mxu1 %v17362_v3 }
0x1043   :  { %15807 = vmatmul.mubr.f32.vlgmr.msra.gmra.mrb[66].mxu0 %v8688_v48 }
0x1044   :  { %16850 = vmatpush3.bf16.msra.mxu0 %v17608_v24  ;;  %15824 = vmatprep.mubr.msk.f32.mxu0 %vm17363_vm0, %v17364_v6 }
0x1045   :  { %16851 = vmatprep.subr.bf16.mxu0 %v17362_v3 }
0x1048   :  { %16853 = vmatpush3.bf16.msra.mxu0 %v17621_v29 }
0x1049   :  { %16854 = vmatprep.subr.bf16.mxu0 %v17362_v3 }
0x104b   :  { %15825 = vmatmul.mubr.f32.vlgmr.msra.gmra.mrb[68].mxu0 %v18301_v28 }
0x104c   :  { %16856 = vmatpush3.bf16.msra.mxu0 %v17628_v34  ;;  %15835 = vmatprep.mubr.msk.f32.mxu0 %vm17363_vm0, %v17364_v6 }
0x104d   :  { %16857 = vmatprep.subr.bf16.mxu0 %v17362_v3 }
0x1050   :  { %16859 = vmatpush3.bf16.msra.mxu0 %v17633_v37 }
0x1051   :  { %16860 = vmatprep.subr.bf16.mxu0 %v17362_v3 }
0x1053   :  { %15836 = vmatmul.mubr.f32.vlgmr.msra.gmra.mrb[68].mxu0 %v18291_v17 }
0x1054   :  { %16862 = vmatpush3.bf16.msra.mxu0 %v17641_v38  ;;  %15846 = vmatprep.mubr.msk.f32.mxu0 %vm17363_vm0, %v17364_v6 }
0x1055   :  { %16863 = vmatprep.subr.bf16.mxu0 %v17362_v3 }
0x1058   :  { %16865 = vmatpush3.bf16.msra.mxu0 %v17646_v39 }
0x1059   :  { %16866 = vmatprep.subr.bf16.mxu0 %v17362_v3 }
0x105b   :  { %15847 = vmatmul.mubr.f32.vlgmr.msra.gmra.mrb[68].mxu0 %v18294_v16  ;;  %v8310_v16 = vpop.f32.mrb[56].mxu1 }
0x105c   :  { %16868 = vmatpush3.bf16.msra.mxu0 %v17608_v24  ;;  %15857 = vmatprep.mubr.msk.f32.mxu0 %vm17363_vm0, %v17364_v6  ;;  %v8311_v51 = vadd.f32 %v8310_v16, %v8229_v52 }
0x105d   :  { %16869 = vmatprep.subr.bf16.mxu0 %v17362_v3 }
0x105e   :  { %v8387_v19 = vadd.f32 %v8386_v58, %v8311_v51 }
0x1060   :  { %16871 = vmatpush3.bf16.msra.mxu0 %v17621_v29 }
0x1061   :  { %16872 = vmatprep.subr.bf16.mxu0 %v17362_v3 }
0x1063   :  { %15858 = vmatmul.mubr.f32.vlgmr.msra.gmra.mrb[68].mxu0 %v18297_v47  ;;  %v15745_v47 = vpop.f32.mrb[57].mxu1 }
0x1064   :  { %16874 = vmatpush3.bf16.msra.mxu0 %v17659_v40  ;;  %15868 = vmatprep.mubr.msk.f32.mxu0 %vm17363_vm0, %v17364_v6  ;;  %v8461_v28 = vpop.f32.mrb[58].mxu1 }
0x1065   :  { %16875 = vmatprep.subr.bf16.mxu0 %v17362_v3  ;;  %v15759_v33 = vpop.f32.mrb[59].mxu1 }
0x1066   :  { %v8611_v55 = vpop.f32.mrb[60].mxu1 }
0x1067   :  { %v15773_v57 = vpop.f32.mrb[61].mxu1 }
0x1068   :  { %16877 = vmatpush3.bf16.msra.mxu0 %v17664_v41 }
0x1069   :  { %16878 = vmatprep.subr.bf16.mxu0 %v17362_v3 }
0x106b   :  { %15869 = vmatmul.mubr.f32.vlgmr.msra.gmra.mrb[68].mxu0 %v18291_v17 }
0x106c   :  { %16880 = vmatpush3.bf16.msra.mxu0 %v17608_v24  ;;  %15879 = vmatprep.mubr.msk.f32.mxu0 %vm17363_vm0, %v17364_v6 }
0x106d   :  { %16881 = vmatprep.subr.bf16.mxu0 %v17362_v3 }
0x1070   :  { %16883 = vmatpush3.bf16.msra.mxu0 %v17621_v29 }
0x1071   :  { %16920 = vmatprep.subr.bf16.mxu0 %v17362_v3 }
0x1073   :  { %15880 = vmatmul.mubr.f32.vlgmr.msra.gmra.mrb[68].mxu0 %v18291_v17  ;;  %v8462_v17 = vadd.f32 %v8461_v28, %v8387_v19 }
0x1074   :  { %16922 = vmatpush3.bf16.msra.mxu0 %v17440_v10  ;;  %15952 = vmatprep.mubr.msk.f32.mxu0 %vm17363_vm0, %v17364_v6 }
0x1075   :  { %16926 = vmatprep.subr.bf16.mxu0 %v17362_v3  ;;  %v8539_v25 = vadd.f32 %v8538_v61, %v8462_v17 }
0x1077   :  { %v8612_v1 = vadd.f32 %v8611_v55, %v8539_v25 }
0x1106   :  { %v8775_v4 = vpop.f32.mrb[62].mxu1 }
0x1107   :  { %v15787_v7 = vpop.f32.mrb[63].mxu1 }
0x110a   :  { %v8926_v49 = vpop.f32.mrb[64].mxu1 }
0x110b   :  { %v15801_v8 = vpop.f32.mrb[65].mxu1 }
0x110e   :  { %v8694_v11 = vpop.f32.mrb[62].mxu0  ;;  %v9076_v12 = vpop.f32.mrb[66].mxu1 }
0x110f   :  { %v8695_v62 = vadd.f32 %v8694_v11, %v8612_v1  ;;  %v15780_v15 = vpop.f32.mrb[63].mxu0  ;;  %v15815_v48 = vpop.f32.mrb[67].mxu1 }
0x1111   :  { %v8776_v21 = vadd.f32 %v8775_v4, %v8695_v62 }
0x1112   :  { %v8851_v22 = vpop.f32.mrb[64].mxu0 }
0x1113   :  { %v8852_v35 = vadd.f32 %v8851_v22, %v8776_v21  ;;  %v15794_v31 = vpop.f32.mrb[65].mxu0 }
0x1115   :  { %v8927_v16 = vadd.f32 %v8926_v49, %v8852_v35 }
0x1116   :  { %v9003_v47 = vpop.f32.mrb[66].mxu0 }
0x1117   :  { %v9004_v28 = vadd.f32 %v9003_v47, %v8927_v16  ;;  %v15808_v33 = vpop.f32.mrb[67].mxu0  ;;  %v10151_v47 = vld [vmem:[%s18969_s1 + $0xd] sm:$0x1] }
0x1118   :  { %v10150_v33 = vld [vmem:[%s18969_s1 + $0x5] sm:$0x1]  ;;  %vm10153_vm3 = vcmp.ne.f32.partialorder %v10151_v47, 0.0 }
0x1119   :  { %v9077_v52 = vadd.f32 %v9076_v12, %v9004_v28  ;;  %v10161_v28 = vrot.slane %v10151_v47, 7  ;;  %vm10152_vm15 = vcmp.ne.f32.partialorder %v10150_v33, 0.0 }
0x111b   :  { %v9080_v57 = vadd.f32 %v18280_v50, %v9077_v52  ;;  %v10162_v52 = vsel %vm97_vm1, %v10161_v28, %v10150_v33 }
0x1146   :  { %v9562_v51 = vpop.f32.mrb[68].mxu0 }
0x1147   :  { %v9573_v55 = vadd.f32 %v9562_v51, %v17683_v27  ;;  %v15881_v54 = vpop.f32.mrb[69].mxu0  ;;  %v9566_v58 = vadd.f32 %v9562_v51, %v9080_v57  ;;  %v10163_v51 = vsel %vm99_vm2, %v10162_v52, 0 }
0x1149   :  { %9575 = vrot.lane.b32.xlu1 %v9573_v55, %s17366_s11  ;;  %v14193_v19 = vmul.f32 -1.442695, %v9566_v58  ;;  %v10232_v55 = vand.u32 4294901760, %v10163_v51 }
0x114b   :  { %17316 = vpow2.f32 %v14193_v19  ;;  %v10233_v54 = vsub.f32 %v10163_v51, %v10232_v55 }
0x1155   :  { %v17317_v59 = vpop.eup %17316 }
0x1156   :  { %v9570_v17 = vadd.f32 1.0, %v17317_v59 }
0x1158   :  { %17318 = vrcp.f32 %v9570_v17  ;;  %v10148_v17 = vld [vmem:[%s18968_s0 + $0x5] sm:$0x1] }
0x1162   :  { %v17319_v61 = vpop.eup %17318 }
0x1163   :  { %v9585_v49 = vsub.f32 1.0, %v17319_v61  ;;  %v9591_v11 = vmul.f32 %v17319_v61, %v18286_v32 }
0x11bb   :  { %v9576_v25 = vpop.permute.xlu1 %9575 }
0x11bc   :  { %v9578_v63 = vmul.f32 %v17319_v61, %v9576_v25  ;;  %v18564_v61 = vld [vmem:[%s18976_s8] ss:$0 sm:$0xff] }
0x11be   :  { %9580 = vrot.lane.b32.xlu0 %v9578_v63, %s17366_s11 }
0x1230   :  { %v9581_v1 = vpop.permute.xlu0 %9580 }
0x1231   :  { %v9583_v4 = vadd.f32 %v9581_v1, %v9080_v57  ;;  %v10234_v57 = vand.u32 4294901760, %v10233_v54  ;;  %v10149_v1 = vld [vmem:[%s18968_s0 + $0xd] sm:$0x1] }
0x1233   :  { %17320 = vtanh.f32 %v9583_v4  ;;  %v10235_v58 = vsub.f32 %v10233_v54, %v10234_v57 }
0x1235   :  { %v10236_v19 = vand.u32 4294901760, %v10235_v58 }
0x1237   :  { %15953 = vmatmul.mubr.f32.vlgmr.msra.gmra.mrb[70].mxu0 %v10236_v19 }
0x1238   :  { %16928 = vmatpush3.bf16.msra.mxu0 %v17529_v53  ;;  %15966 = vmatprep.mubr.msk.f32.mxu0 %vm17363_vm0, %v17364_v6 }
0x1239   :  { %16932 = vmatprep.subr.bf16.mxu0 %v17362_v3 }
0x123b   :  { %15967 = vmatmul.mubr.f32.vlgmr.msra.gmra.mrb[72].mxu0 %v10233_v54 }
0x123c   :  { %16934 = vmatpush3.bf16.msra.mxu0 %v17543_v60  ;;  %15980 = vmatprep.mubr.msk.f32.mxu0 %vm17363_vm0, %v17364_v6 }
0x123d   :  { %v17321_v7 = vpop.eup %17320  ;;  %16938 = vmatprep.subr.bf16.mxu0 %v17362_v3 }
0x123e   :  { %9587 = vrot.lane.b32.xlu1 %v17321_v7, %s17367_s23 }
0x123f   :  { %15981 = vmatmul.mubr.f32.vlgmr.msra.gmra.mrb[74].mxu0 %v10232_v55 }
0x1240   :  { %16940 = vmatpush3.bf16.msra.mxu0 %v17563_v2  ;;  %15994 = vmatprep.mubr.msk.f32.mxu0 %vm17363_vm0, %v17364_v6 }
0x1241   :  { %16944 = vmatprep.subr.bf16.mxu0 %v17362_v3 }
0x12b0   :  { %v9588_v8 = vpop.permute.xlu1 %9587 }
0x12b1   :  { %v9590_v12 = vmul.f32 %v9588_v8, %v9585_v49 }
0x12b3   :  { %v18469_v62 = vadd.f32 %v9591_v11, %v9590_v12 }
0x12b5   :  { %9594 = vrot.lane.b32.xlu0 %v18469_v62, %s17367_s23 }
0x1327   :  { %v9595_v15 = vpop.permute.xlu0 %9594 }
0x1328   :  { %v9596_v48 = vsel %vm1033_vm6, %v9595_v15, 0 }
0x1329   :  { %v18474_v21 = vand.u32 4294901760, %v9596_v48 }
0x132b   :  { %v18477_v22 = vsub.f32 %v9596_v48, %v18474_v21 }
0x132d   :  { %v18480_v35 = vand.u32 4294901760, %v18477_v22 }
0x132f   :  { %v9670_v31 = vsub.f32 %v18477_v22, %v18480_v35 }
0x1331   :  { %v18484_v16 = vand.u32 4294901760, %v9670_v31 }
0x1333   :  { %15891 = vmatmul.mubr.f32.vlgmr.msra.gmra.mrb[68].mxu1 %v18484_v16 }
0x1334   :  { %16892 = vmatpush3.bf16.msra.mxu1 %v17715_v26  ;;  %15901 = vmatprep.mubr.msk.f32.mxu1 %vm17363_vm0, %v17364_v6 }
0x1335   :  { %16893 = vmatprep.subr.bf16.mxu1 %v17362_v3 }
0x1338   :  { %16895 = vmatpush3.bf16.msra.mxu1 %v17721_v36 }
0x1339   :  { %16896 = vmatprep.subr.bf16.mxu1 %v17362_v3 }
0x133b   :  { %15902 = vmatmul.mubr.f32.vlgmr.msra.gmra.mrb[68].mxu1 %v18474_v21 }
0x133c   :  { %16898 = vmatpush3.bf16.msra.mxu1 %v17723_v43  ;;  %15912 = vmatprep.mubr.msk.f32.mxu1 %vm17363_vm0, %v17364_v6 }
0x133d   :  { %16899 = vmatprep.subr.bf16.mxu1 %v17362_v3 }
0x1340   :  { %16901 = vmatpush3.bf16.msra.mxu1 %v17725_v44 }
0x1341   :  { %16902 = vmatprep.subr.bf16.mxu1 %v17362_v3 }
0x1343   :  { %15913 = vmatmul.mubr.f32.vlgmr.msra.gmra.mrb[68].mxu1 %v18477_v22 }
0x1344   :  { %16904 = vmatpush3.bf16.msra.mxu1 %v17701_v56  ;;  %15923 = vmatprep.mubr.msk.f32.mxu1 %vm17363_vm0, %v17364_v6 }
0x1345   :  { %16905 = vmatprep.subr.bf16.mxu1 %v17362_v3 }
0x1348   :  { %16907 = vmatpush3.bf16.msra.mxu1 %v17711_v5 }
0x1349   :  { %16908 = vmatprep.subr.bf16.mxu1 %v17362_v3 }
0x134b   :  { %15924 = vmatmul.mubr.f32.vlgmr.msra.gmra.mrb[68].mxu1 %v18480_v35 }
0x134c   :  { %16910 = vmatpush3.bf16.msra.mxu1 %v17727_v45  ;;  %15934 = vmatprep.mubr.msk.f32.mxu1 %vm17363_vm0, %v17364_v6 }
0x134d   :  { %16911 = vmatprep.subr.bf16.mxu1 %v17362_v3 }
0x1350   :  { %16913 = vmatpush3.bf16.msra.mxu1 %v17729_v46 }
0x1351   :  { %16914 = vmatprep.subr.bf16.mxu1 %v17362_v3 }
0x1353   :  { %15935 = vmatmul.mubr.f32.vlgmr.msra.gmra.mrb[68].mxu1 %v18474_v21 }
0x1354   :  { %16916 = vmatpush3.bf16.msra.mxu1 %v17701_v56  ;;  %15945 = vmatprep.mubr.msk.f32.mxu1 %vm17363_vm0, %v17364_v6 }
0x1355   :  { %16917 = vmatprep.subr.bf16.mxu1 %v17362_v3 }
0x1358   :  { %16919 = vmatpush3.bf16.msra.mxu1 %v17711_v5 }
0x1359   :  { %16923 = vmatprep.subr.bf16.mxu1 %v17362_v3 }
0x135b   :  { %15946 = vmatmul.mubr.f32.vlgmr.msra.gmra.mrb[68].mxu1 %v18474_v21 }
0x135c   :  { %16925 = vmatpush3.bf16.msra.mxu1 %v17504_v42  ;;  %15959 = vmatprep.mubr.msk.f32.mxu1 %vm17363_vm0, %v17364_v6 }
0x135d   :  { %16929 = vmatprep.subr.bf16.mxu1 %v17362_v3 }
0x135f   :  { %15960 = vmatmul.mubr.f32.vlgmr.msra.gmra.mrb[70].mxu1 %v10232_v55 }
0x1360   :  { %16931 = vmatpush3.bf16.msra.mxu1 %v17440_v10  ;;  %15973 = vmatprep.mubr.msk.f32.mxu1 %vm17363_vm0, %v17364_v6 }
0x1361   :  { %16935 = vmatprep.subr.bf16.mxu1 %v17362_v3 }
0x1363   :  { %15974 = vmatmul.mubr.f32.vlgmr.msra.gmra.mrb[72].mxu1 %v10234_v57  ;;  %v10238_v57 = vpop.f32.mrb[70].mxu0 }
0x1364   :  { %16937 = vmatpush3.bf16.msra.mxu1 %v17440_v10  ;;  %15987 = vmatprep.mubr.msk.f32.mxu1 %vm17363_vm0, %v17364_v6 }
0x1365   :  { %16941 = vmatprep.subr.bf16.mxu1 %v17362_v3 }
0x1367   :  { %15988 = vmatmul.mubr.f32.vlgmr.msra.gmra.mrb[74].mxu1 %v10232_v55 }
0x1368   :  { %16943 = vmatpush3.bf16.msra.mxu1 %v17555_v0  ;;  %16001 = vmatprep.mubr.msk.f32.mxu1 %vm17363_vm0, %v17364_v6 }
0x1369   :  { %16947 = vmatprep.subr.bf16.mxu1 %v17362_v3 }
0x142e   :  { %v10079_v59 = vpop.f32.mrb[68].mxu1 }
0x142f   :  { %v17140_v25 = vadd.f32 %v18564_v61, %v10079_v59  ;;  %v15947_v63 = vpop.f32.mrb[69].mxu1  ;;  %v15954_v59 = vpop.f32.mrb[71].mxu0 }
0x1431   :  { %v10128_v4 = vrot.slane %v17140_v25, %v17475_v23  ;;  %v10154_v7 = vrot.slane %v17140_v25, 1  ;;  %v10157_v49 = vsel %vm10152_vm15, %v10148_v17, %v17140_v25  ;;  %v10395_v25 = vpop.f32.mrb[72].mxu0 }
0x1433   :  { %v10129_v8 = vcombine.high %v10128_v4, %v10128_v4  ;;  %v10136_v11 = vrot.slane %v10128_v4, %v17475_v23  ;;  %v10158_v12 = vsel %vm10153_vm3, %v10149_v1, %v10154_v7  ;;  %v15968_v1 = vpop.f32.mrb[73].mxu0 }
0x1434   :  { %v10626_v15 = vrot.slane %v10158_v12, 7  ;;  %v10547_v4 = vpop.f32.mrb[74].mxu0 }
0x1435   :  { %v10143_v48 = vrot.slane %v10129_v8, %v17475_v23  ;;  %10146 = vst.msk [vmem:[%s18977_s9 + $0x5] sm:$0x1] %vm83_vm5, %v10136_v11 }
0x1436   :  { %v10627_v31 = vsel %vm97_vm1, %v10626_v15, %v10157_v49  ;;  %v15982_v49 = vpop.f32.mrb[75].mxu0 }
0x1437   :  { %10147 = vst.msk [vmem:[%s18977_s9 + $0xd] sm:$0x1] %vm83_vm5, %v10143_v48  ;;  %v10628_v47 = vsel %vm99_vm2, %v10627_v31, 0 }
0x1438   :  { %v10697_v28 = vand.u32 4294901760, %v10628_v47 }
0x143a   :  { %16002 = vmatmul.mubr.f32.vlgmr.msra.gmra.mrb[76].mxu1 %v10697_v28  ;;  %v10698_v33 = vsub.f32 %v10628_v47, %v10697_v28 }
0x143b   :  { %16949 = vmatpush3.bf16.msra.mxu1 %v17563_v2  ;;  %16015 = vmatprep.mubr.msk.f32.mxu1 %vm17363_vm0, %v17364_v6 }
0x143c   :  { %v10699_v52 = vand.u32 4294901760, %v10698_v33  ;;  %16953 = vmatprep.subr.bf16.mxu1 %v17362_v3 }
0x143e   :  { %16016 = vmatmul.mubr.f32.vlgmr.msra.gmra.mrb[78].mxu1 %v10699_v52  ;;  %v10700_v51 = vsub.f32 %v10698_v33, %v10699_v52 }
0x143f   :  { %16955 = vmatpush3.bf16.msra.mxu1 %v17563_v2  ;;  %16029 = vmatprep.mubr.msk.f32.mxu1 %vm17363_vm0, %v17364_v6 }
0x1440   :  { %v10701_v55 = vand.u32 4294901760, %v10700_v51  ;;  %16992 = vmatprep.subr.bf16.mxu1 %v17362_v3 }
0x1442   :  { %15995 = vmatmul.mubr.f32.vlgmr.msra.gmra.mrb[76].mxu0 %v10701_v55  ;;  %16030 = vmatmul.mubr.f32.vlgmr.msra.gmra.mrb[80].mxu1 %v10697_v28 }
0x1443   :  { %16946 = vmatpush3.bf16.msra.mxu0 %v17583_v13  ;;  %16008 = vmatprep.mubr.msk.f32.mxu0 %vm17363_vm0, %v17364_v6 }
0x1444   :  { %16950 = vmatprep.subr.bf16.mxu0 %v17362_v3  ;;  %16994 = vmatpush3.bf16.msra.mxu1 %v17701_v56 }
0x1445   :  { %16995 = vmatprep.subr.bf16.mxu1 %v17362_v3  ;;  %16106 = vmatprep.mubr.msk.f32.mxu1 %vm17363_vm0, %v17364_v6 }
0x1446   :  { %16009 = vmatmul.mubr.f32.vlgmr.msra.gmra.mrb[78].mxu0 %v10698_v33 }
0x1447   :  { %16952 = vmatpush3.bf16.msra.mxu0 %v17596_v18  ;;  %16022 = vmatprep.mubr.msk.f32.mxu0 %vm17363_vm0, %v17364_v6 }
0x1448   :  { %16956 = vmatprep.subr.bf16.mxu0 %v17362_v3  ;;  %16997 = vmatpush3.bf16.msra.mxu1 %v17711_v5 }
0x1449   :  { %16998 = vmatprep.subr.bf16.mxu1 %v17362_v3 }
0x144a   :  { %16023 = vmatmul.mubr.f32.vlgmr.msra.gmra.mrb[80].mxu0 %v10697_v28 }
0x144b   :  { %16958 = vmatpush3.bf16.msra.mxu0 %v17608_v24  ;;  %16040 = vmatprep.mubr.msk.f32.mxu0 %vm17363_vm0, %v17364_v6 }
0x144c   :  { %16959 = vmatprep.subr.bf16.mxu0 %v17362_v3 }
0x144f   :  { %16961 = vmatpush3.bf16.msra.mxu0 %v17621_v29 }
0x1450   :  { %16962 = vmatprep.subr.bf16.mxu0 %v17362_v3 }
0x1452   :  { %16041 = vmatmul.mubr.f32.vlgmr.msra.gmra.mrb[82].mxu0 %v18484_v16 }
0x1453   :  { %16964 = vmatpush3.bf16.msra.mxu0 %v17628_v34  ;;  %16051 = vmatprep.mubr.msk.f32.mxu0 %vm17363_vm0, %v17364_v6 }
0x1454   :  { %16965 = vmatprep.subr.bf16.mxu0 %v17362_v3 }
0x1457   :  { %16967 = vmatpush3.bf16.msra.mxu0 %v17633_v37 }
0x1458   :  { %16968 = vmatprep.subr.bf16.mxu0 %v17362_v3 }
0x145a   :  { %16052 = vmatmul.mubr.f32.vlgmr.msra.gmra.mrb[82].mxu0 %v18474_v21 }
0x145b   :  { %16970 = vmatpush3.bf16.msra.mxu0 %v17641_v38  ;;  %16062 = vmatprep.mubr.msk.f32.mxu0 %vm17363_vm0, %v17364_v6 }
0x145c   :  { %16971 = vmatprep.subr.bf16.mxu0 %v17362_v3 }
0x145f   :  { %16973 = vmatpush3.bf16.msra.mxu0 %v17646_v39 }
0x1460   :  { %16974 = vmatprep.subr.bf16.mxu0 %v17362_v3 }
0x1462   :  { %16063 = vmatmul.mubr.f32.vlgmr.msra.gmra.mrb[82].mxu0 %v18477_v22  ;;  %v10319_v22 = vpop.f32.mrb[70].mxu1 }
0x1463   :  { %16976 = vmatpush3.bf16.msra.mxu0 %v17608_v24  ;;  %16073 = vmatprep.mubr.msk.f32.mxu0 %vm17363_vm0, %v17364_v6  ;;  %v10320_v19 = vadd.f32 %v10319_v22, %v10238_v57 }
0x1464   :  { %16977 = vmatprep.subr.bf16.mxu0 %v17362_v3 }
0x1465   :  { %v10396_v63 = vadd.f32 %v10395_v25, %v10320_v19 }
0x1467   :  { %16979 = vmatpush3.bf16.msra.mxu0 %v17621_v29 }
0x1468   :  { %16980 = vmatprep.subr.bf16.mxu0 %v17362_v3 }
0x146a   :  { %16074 = vmatmul.mubr.f32.vlgmr.msra.gmra.mrb[82].mxu0 %v18480_v35  ;;  %v15961_v35 = vpop.f32.mrb[71].mxu1 }
0x146b   :  { %16982 = vmatpush3.bf16.msra.mxu0 %v17659_v40  ;;  %16084 = vmatprep.mubr.msk.f32.mxu0 %vm17363_vm0, %v17364_v6  ;;  %v10470_v16 = vpop.f32.mrb[72].mxu1 }
0x146c   :  { %16983 = vmatprep.subr.bf16.mxu0 %v17362_v3  ;;  %v15975_v54 = vpop.f32.mrb[73].mxu1 }
0x146d   :  { %v10620_v58 = vpop.f32.mrb[74].mxu1 }
0x146e   :  { %v15989_v17 = vpop.f32.mrb[75].mxu1 }
0x146f   :  { %16985 = vmatpush3.bf16.msra.mxu0 %v17664_v41 }
0x1470   :  { %16986 = vmatprep.subr.bf16.mxu0 %v17362_v3 }
0x1472   :  { %16085 = vmatmul.mubr.f32.vlgmr.msra.gmra.mrb[82].mxu0 %v18474_v21 }
0x1473   :  { %16988 = vmatpush3.bf16.msra.mxu0 %v17608_v24  ;;  %16095 = vmatprep.mubr.msk.f32.mxu0 %vm17363_vm0, %v17364_v6 }
0x1474   :  { %16989 = vmatprep.subr.bf16.mxu0 %v17362_v3 }
0x1477   :  { %16991 = vmatpush3.bf16.msra.mxu0 %v17621_v29 }
0x1478   :  { %17028 = vmatprep.subr.bf16.mxu0 %v17362_v3 }
0x147a   :  { %16096 = vmatmul.mubr.f32.vlgmr.msra.gmra.mrb[82].mxu0 %v18474_v21  ;;  %v10471_v21 = vadd.f32 %v10470_v16, %v10396_v63 }
0x147b   :  { %17030 = vmatpush3.bf16.msra.mxu0 %v17440_v10  ;;  %16168 = vmatprep.mubr.msk.f32.mxu0 %vm17363_vm0, %v17364_v6 }
0x147c   :  { %17034 = vmatprep.subr.bf16.mxu0 %v17362_v3  ;;  %v10548_v7 = vadd.f32 %v10547_v4, %v10471_v21 }
0x147e   :  { %v10621_v8 = vadd.f32 %v10620_v58, %v10548_v7 }
0x150d   :  { %v10784_v11 = vpop.f32.mrb[76].mxu1 }
0x150e   :  { %v16003_v12 = vpop.f32.mrb[77].mxu1 }
0x1511   :  { %v10935_v15 = vpop.f32.mrb[78].mxu1 }
0x1512   :  { %v16017_v48 = vpop.f32.mrb[79].mxu1 }
0x1515   :  { %v10703_v31 = vpop.f32.mrb[76].mxu0  ;;  %v11085_v47 = vpop.f32.mrb[80].mxu1 }
0x1516   :  { %v10704_v28 = vadd.f32 %v10703_v31, %v10621_v8  ;;  %v15996_v33 = vpop.f32.mrb[77].mxu0  ;;  %v16031_v52 = vpop.f32.mrb[81].mxu1 }
0x1518   :  { %v10785_v51 = vadd.f32 %v10784_v11, %v10704_v28 }
0x1519   :  { %v10860_v55 = vpop.f32.mrb[78].mxu0 }
0x151a   :  { %v10861_v22 = vadd.f32 %v10860_v55, %v10785_v51  ;;  %v16010_v35 = vpop.f32.mrb[79].mxu0 }
0x151c   :  { %v10936_v54 = vadd.f32 %v10935_v15, %v10861_v22 }
0x151d   :  { %v11012_v57 = vpop.f32.mrb[80].mxu0 }
0x151e   :  { %v11013_v16 = vadd.f32 %v11012_v57, %v10936_v54  ;;  %v16024_v19 = vpop.f32.mrb[81].mxu0 }
0x1520   :  { %v11086_v59 = vadd.f32 %v11085_v47, %v11013_v16  ;;  %v12160_v16 = vld [vmem:[%s18969_s1 + $0xe] sm:$0x1] }
0x1521   :  { %v12170_v19 = vrot.slane %v12160_v16, 7  ;;  %vm12162_vm7 = vcmp.ne.f32.partialorder %v12160_v16, 0.0 }
0x1522   :  { %v11089_v63 = vadd.f32 %v18280_v50, %v11086_v59  ;;  %v12159_v59 = vld [vmem:[%s18969_s1 + $0x6] sm:$0x1] }
0x1523   :  { %vm12161_vm4 = vcmp.ne.f32.partialorder %v12159_v59, 0.0 }
0x154d   :  { %v11571_v17 = vpop.f32.mrb[82].mxu0 }
0x154e   :  { %v11582_v58 = vadd.f32 %v11571_v17, %v17683_v27  ;;  %v16097_v25 = vpop.f32.mrb[83].mxu0  ;;  %v11575_v1 = vadd.f32 %v11571_v17, %v11089_v63  ;;  %v12171_v17 = vsel %vm97_vm1, %v12170_v19, %v12159_v59 }
0x1550   :  { %11584 = vrot.lane.b32.xlu1 %v11582_v58, %s17366_s11  ;;  %v14194_v21 = vmul.f32 -1.442695, %v11575_v1  ;;  %v12172_v58 = vsel %vm99_vm2, %v12171_v17, 0 }
0x1551   :  { %v12241_v25 = vand.u32 4294901760, %v12172_v58 }
0x1552   :  { %17322 = vpow2.f32 %v14194_v21 }
0x155c   :  { %v17323_v4 = vpop.eup %17322 }
0x155d   :  { %v11579_v7 = vadd.f32 1.0, %v17323_v4  ;;  %v12158_v4 = vld [vmem:[%s18968_s0 + $0xe] sm:$0x1] }
0x155f   :  { %17324 = vrcp.f32 %v11579_v7 }
0x1569   :  { %v17325_v49 = vpop.eup %17324 }
0x156a   :  { %v11594_v31 = vsub.f32 1.0, %v17325_v49  ;;  %v11600_v50 = vmul.f32 %v17325_v49, %v18469_v62 }
0x15c2   :  { %v11585_v8 = vpop.permute.xlu1 %11584 }
0x15c3   :  { %v11587_v11 = vmul.f32 %v17325_v49, %v11585_v8 }
0x15c5   :  { %11589 = vrot.lane.b32.xlu0 %v11587_v11, %s17366_s11 }
0x1637   :  { %v11590_v12 = vpop.permute.xlu0 %11589 }
0x1638   :  { %v11592_v15 = vadd.f32 %v11590_v12, %v11089_v63 }
0x163a   :  { %17326 = vtanh.f32 %v11592_v15 }
0x1644   :  { %v17327_v48 = vpop.eup %17326 }
0x1645   :  { %11596 = vrot.lane.b32.xlu1 %v17327_v48, %s17367_s23 }
0x16b7   :  { %v11597_v47 = vpop.permute.xlu1 %11596 }
0x16b8   :  { %v11599_v28 = vmul.f32 %v11597_v47, %v11594_v31 }
0x16ba   :  { %v18657_v33 = vadd.f32 %v11600_v50, %v11599_v28 }
0x16bc   :  { %11603 = vrot.lane.b32.xlu0 %v18657_v33, %s17367_s23 }
0x172e   :  { %v11604_v52 = vpop.permute.xlu0 %11603 }
0x172f   :  { %v11605_v51 = vsel %vm1033_vm6, %v11604_v52, 0 }
0x1730   :  { %v18662_v55 = vand.u32 4294901760, %v11605_v51 }
0x1732   :  { %v18665_v22 = vsub.f32 %v11605_v51, %v18662_v55 }
0x1734   :  { %v18668_v35 = vand.u32 4294901760, %v18665_v22 }
0x1736   :  { %v11679_v54 = vsub.f32 %v18665_v22, %v18668_v35 }
0x1738   :  { %v18672_v57 = vand.u32 4294901760, %v11679_v54 }
0x173a   :  { %16107 = vmatmul.mubr.f32.vlgmr.msra.gmra.mrb[82].mxu1 %v18672_v57 }
0x173b   :  { %17000 = vmatpush3.bf16.msra.mxu1 %v17715_v26  ;;  %16117 = vmatprep.mubr.msk.f32.mxu1 %vm17363_vm0, %v17364_v6 }
0x173c   :  { %17001 = vmatprep.subr.bf16.mxu1 %v17362_v3 }
0x173f   :  { %17003 = vmatpush3.bf16.msra.mxu1 %v17721_v36 }
0x1740   :  { %17004 = vmatprep.subr.bf16.mxu1 %v17362_v3 }
0x1742   :  { %16118 = vmatmul.mubr.f32.vlgmr.msra.gmra.mrb[82].mxu1 %v18662_v55 }
0x1743   :  { %17006 = vmatpush3.bf16.msra.mxu1 %v17723_v43  ;;  %16128 = vmatprep.mubr.msk.f32.mxu1 %vm17363_vm0, %v17364_v6 }
0x1744   :  { %17007 = vmatprep.subr.bf16.mxu1 %v17362_v3 }
0x1747   :  { %17009 = vmatpush3.bf16.msra.mxu1 %v17725_v44 }
0x1748   :  { %17010 = vmatprep.subr.bf16.mxu1 %v17362_v3 }
0x174a   :  { %16129 = vmatmul.mubr.f32.vlgmr.msra.gmra.mrb[82].mxu1 %v18665_v22 }
0x174b   :  { %17012 = vmatpush3.bf16.msra.mxu1 %v17701_v56  ;;  %16139 = vmatprep.mubr.msk.f32.mxu1 %vm17363_vm0, %v17364_v6 }
0x174c   :  { %17013 = vmatprep.subr.bf16.mxu1 %v17362_v3 }
0x174f   :  { %17015 = vmatpush3.bf16.msra.mxu1 %v17711_v5 }
0x1750   :  { %17016 = vmatprep.subr.bf16.mxu1 %v17362_v3 }
0x1752   :  { %16140 = vmatmul.mubr.f32.vlgmr.msra.gmra.mrb[82].mxu1 %v18668_v35 }
0x1753   :  { %17018 = vmatpush3.bf16.msra.mxu1 %v17727_v45  ;;  %16150 = vmatprep.mubr.msk.f32.mxu1 %vm17363_vm0, %v17364_v6 }
0x1754   :  { %17019 = vmatprep.subr.bf16.mxu1 %v17362_v3 }
0x1757   :  { %17021 = vmatpush3.bf16.msra.mxu1 %v17729_v46 }
0x1758   :  { %17022 = vmatprep.subr.bf16.mxu1 %v17362_v3 }
0x175a   :  { %16151 = vmatmul.mubr.f32.vlgmr.msra.gmra.mrb[82].mxu1 %v18662_v55 }
0x175b   :  { %17024 = vmatpush3.bf16.msra.mxu1 %v17701_v56  ;;  %16161 = vmatprep.mubr.msk.f32.mxu1 %vm17363_vm0, %v17364_v6 }
0x175c   :  { %17025 = vmatprep.subr.bf16.mxu1 %v17362_v3 }
0x175f   :  { %17027 = vmatpush3.bf16.msra.mxu1 %v17711_v5 }
0x1760   :  { %17031 = vmatprep.subr.bf16.mxu1 %v17362_v3 }
0x1762   :  { %16162 = vmatmul.mubr.f32.vlgmr.msra.gmra.mrb[82].mxu1 %v18662_v55 }
0x1763   :  { %17033 = vmatpush3.bf16.msra.mxu1 %v17504_v42  ;;  %16175 = vmatprep.mubr.msk.f32.mxu1 %vm17363_vm0, %v17364_v6  ;;  %v12242_v42 = vsub.f32 %v12172_v58, %v12241_v25 }
0x1764   :  { %17037 = vmatprep.subr.bf16.mxu1 %v17362_v3 }
0x1765   :  { %v12243_v63 = vand.u32 4294901760, %v12242_v42 }
0x1766   :  { %16176 = vmatmul.mubr.f32.vlgmr.msra.gmra.mrb[84].mxu1 %v12241_v25 }
0x1767   :  { %17039 = vmatpush3.bf16.msra.mxu1 %v17440_v10  ;;  %16189 = vmatprep.mubr.msk.f32.mxu1 %vm17363_vm0, %v17364_v6  ;;  %v12244_v1 = vsub.f32 %v12242_v42, %v12243_v63 }
0x1768   :  { %17043 = vmatprep.subr.bf16.mxu1 %v17362_v3 }
0x1769   :  { %v12245_v21 = vand.u32 4294901760, %v12244_v1 }
0x176a   :  { %16190 = vmatmul.mubr.f32.vlgmr.msra.gmra.mrb[86].mxu1 %v12243_v63 }
0x176b   :  { %17045 = vmatpush3.bf16.msra.mxu1 %v17440_v10  ;;  %16203 = vmatprep.mubr.msk.f32.mxu1 %vm17363_vm0, %v17364_v6 }
0x176c   :  { %17049 = vmatprep.subr.bf16.mxu1 %v17362_v3  ;;  %16169 = vmatmul.mubr.f32.vlgmr.msra.gmra.mrb[84].mxu0 %v12245_v21 }
0x176d   :  { %17036 = vmatpush3.bf16.msra.mxu0 %v17529_v53  ;;  %16182 = vmatprep.mubr.msk.f32.mxu0 %vm17363_vm0, %v17364_v6  ;;  %v12157_v53 = vld [vmem:[%s18968_s0 + $0x6] sm:$0x1] }
0x176e   :  { %16204 = vmatmul.mubr.f32.vlgmr.msra.gmra.mrb[88].mxu1 %v12241_v25  ;;  %17040 = vmatprep.subr.bf16.mxu0 %v17362_v3 }
0x176f   :  { %17051 = vmatpush3.bf16.msra.mxu1 %v17555_v0  ;;  %16217 = vmatprep.mubr.msk.f32.mxu1 %vm17363_vm0, %v17364_v6 }
0x1770   :  { %17055 = vmatprep.subr.bf16.mxu1 %v17362_v3  ;;  %16183 = vmatmul.mubr.f32.vlgmr.msra.gmra.mrb[86].mxu0 %v12242_v42 }
0x1771   :  { %17042 = vmatpush3.bf16.msra.mxu0 %v17543_v60  ;;  %16196 = vmatprep.mubr.msk.f32.mxu0 %vm17363_vm0, %v17364_v6 }
0x1772   :  { %17046 = vmatprep.subr.bf16.mxu0 %v17362_v3 }
0x1774   :  { %16197 = vmatmul.mubr.f32.vlgmr.msra.gmra.mrb[88].mxu0 %v12241_v25 }
0x1775   :  { %17048 = vmatpush3.bf16.msra.mxu0 %v17563_v2  ;;  %16210 = vmatprep.mubr.msk.f32.mxu0 %vm17363_vm0, %v17364_v6 }
0x1776   :  { %17052 = vmatprep.subr.bf16.mxu0 %v17362_v3 }
0x1835   :  { %v12088_v10 = vpop.f32.mrb[82].mxu1 }
0x1836   :  { %v17141_v60 = vadd.f32 %v18564_v61, %v12088_v10  ;;  %v16163_v0 = vpop.f32.mrb[83].mxu1 }
0x1838   :  { %v12137_v7 = vrot.slane %v17141_v60, %v17475_v23  ;;  %v12163_v49 = vrot.slane %v17141_v60, 1  ;;  %v12166_v8 = vsel %vm12161_vm4, %v12157_v53, %v17141_v60 }
0x183a   :  { %v12138_v11 = vcombine.high %v12137_v7, %v12137_v7  ;;  %v12145_v12 = vrot.slane %v12137_v7, %v17475_v23  ;;  %v12167_v15 = vsel %vm12162_vm7, %v12158_v4, %v12163_v49 }
0x183b   :  { %v12635_v48 = vrot.slane %v12167_v15, 7 }
0x183c   :  { %v12152_v31 = vrot.slane %v12138_v11, %v17475_v23  ;;  %12155 = vst.msk [vmem:[%s18977_s9 + $0x6] sm:$0x1] %vm83_vm5, %v12145_v12 }
0x183d   :  { %v12636_v47 = vsel %vm97_vm1, %v12635_v48, %v12166_v8  ;;  %vm56_vm1 = vcmask 253952  }
0x183e   :  { %12156 = vst.msk [vmem:[%s18977_s9 + $0xe] sm:$0x1] %vm83_vm5, %v12152_v31  ;;  %v12637_v50 = vsel %vm99_vm2, %v12636_v47, 0 }
0x183f   :  { %v12706_v28 = vand.u32 4294901760, %v12637_v50  ;;  %57 = vst.msk [vmem:[#allocation2] sm:$0x1] %vm56_vm1, %v17364_v6  ;;  %58 = vst.msk [vmem:[#allocation2 + $0x8] sm:$0x1] %vm56_vm1, %v17364_v6 }
0x1841   :  { %16218 = vmatmul.mubr.f32.vlgmr.msra.gmra.mrb[90].mxu1 %v12706_v28  ;;  %v12707_v52 = vsub.f32 %v12637_v50, %v12706_v28  ;;  %v17337_v50 = vld [vmem:[%s18973_s5] ss:$0 sm:$0xff]  ;;  %s17368_s5 = smov [#allocation2]  }
0x1842   :  { %17057 = vmatpush3.bf16.msra.mxu1 %v17563_v2  ;;  %16231 = vmatprep.mubr.msk.f32.mxu1 %vm17363_vm0, %v17364_v6 }
0x1843   :  { %v12708_v51 = vand.u32 4294901760, %v12707_v52  ;;  %17061 = vmatprep.subr.bf16.mxu1 %v17362_v3 }
0x1845   :  { %16232 = vmatmul.mubr.f32.vlgmr.msra.gmra.mrb[92].mxu1 %v12708_v51  ;;  %v12709_v54 = vsub.f32 %v12707_v52, %v12708_v51 }
0x1846   :  { %17063 = vmatpush3.bf16.msra.mxu1 %v17563_v2  ;;  %16245 = vmatprep.mubr.msk.f32.mxu1 %vm17363_vm0, %v17364_v6  ;;  %v12328_v2 = vpop.f32.mrb[84].mxu1 }
0x1847   :  { %v12710_v16 = vand.u32 4294901760, %v12709_v54  ;;  %17100 = vmatprep.subr.bf16.mxu1 %v17362_v3 }
0x1849   :  { %16211 = vmatmul.mubr.f32.vlgmr.msra.gmra.mrb[90].mxu0 %v12710_v16  ;;  %16246 = vmatmul.mubr.f32.vlgmr.msra.gmra.mrb[94].mxu1 %v12706_v28 }
0x184a   :  { %17054 = vmatpush3.bf16.msra.mxu0 %v17583_v13  ;;  %16224 = vmatprep.mubr.msk.f32.mxu0 %vm17363_vm0, %v17364_v6  ;;  %v16177_v13 = vpop.f32.mrb[85].mxu1 }
0x184b   :  { %17058 = vmatprep.subr.bf16.mxu0 %v17362_v3  ;;  %17102 = vmatpush3.bf16.msra.mxu1 %v17701_v56 }
0x184c   :  { %17103 = vmatprep.subr.bf16.mxu1 %v17362_v3  ;;  %16322 = vmatprep.mubr.msk.f32.mxu1 %vm17363_vm0, %v17364_v6 }
0x184d   :  { %16225 = vmatmul.mubr.f32.vlgmr.msra.gmra.mrb[92].mxu0 %v12707_v52 }
0x184e   :  { %17060 = vmatpush3.bf16.msra.mxu0 %v17596_v18  ;;  %16238 = vmatprep.mubr.msk.f32.mxu0 %vm17363_vm0, %v17364_v6  ;;  %v12479_v18 = vpop.f32.mrb[86].mxu1 }
0x184f   :  { %17064 = vmatprep.subr.bf16.mxu0 %v17362_v3  ;;  %17105 = vmatpush3.bf16.msra.mxu1 %v17711_v5 }
0x1850   :  { %17106 = vmatprep.subr.bf16.mxu1 %v17362_v3 }
0x1851   :  { %16239 = vmatmul.mubr.f32.vlgmr.msra.gmra.mrb[94].mxu0 %v12706_v28 }
0x1852   :  { %17066 = vmatpush3.bf16.msra.mxu0 %v17608_v24  ;;  %16256 = vmatprep.mubr.msk.f32.mxu0 %vm17363_vm0, %v17364_v6 }
0x1853   :  { %17067 = vmatprep.subr.bf16.mxu0 %v17362_v3 }
0x1856   :  { %17069 = vmatpush3.bf16.msra.mxu0 %v17621_v29 }
0x1857   :  { %17070 = vmatprep.subr.bf16.mxu0 %v17362_v3 }
0x1859   :  { %16257 = vmatmul.mubr.f32.vlgmr.msra.gmra.mrb[96].mxu0 %v18672_v57 }
0x185a   :  { %17072 = vmatpush3.bf16.msra.mxu0 %v17628_v34  ;;  %16267 = vmatprep.mubr.msk.f32.mxu0 %vm17363_vm0, %v17364_v6  ;;  %v16191_v34 = vpop.f32.mrb[87].mxu1 }
0x185b   :  { %17073 = vmatprep.subr.bf16.mxu0 %v17362_v3 }
0x185e   :  { %17075 = vmatpush3.bf16.msra.mxu0 %v17633_v37  ;;  %v12247_v37 = vpop.f32.mrb[84].mxu0 }
0x185f   :  { %17076 = vmatprep.subr.bf16.mxu0 %v17362_v3 }
0x1861   :  { %16268 = vmatmul.mubr.f32.vlgmr.msra.gmra.mrb[96].mxu0 %v18662_v55 }
0x1862   :  { %17078 = vmatpush3.bf16.msra.mxu0 %v17641_v38  ;;  %16278 = vmatprep.mubr.msk.f32.mxu0 %vm17363_vm0, %v17364_v6  ;;  %v12629_v38 = vpop.f32.mrb[88].mxu1 }
0x1863   :  { %17079 = vmatprep.subr.bf16.mxu0 %v17362_v3 }
0x1866   :  { %17081 = vmatpush3.bf16.msra.mxu0 %v17646_v39  ;;  %v12329_v39 = vadd.f32 %v12328_v2, %v12247_v37  ;;  %v2053_v37 = vrot.slane %v17717_v30, %v17475_v23  ;;  %v8080_v30 = vrot.slane %v18286_v32, %v17475_v23 }
0x1867   :  { %17082 = vmatprep.subr.bf16.mxu0 %v17362_v3 }
0x1869   :  { %16279 = vmatmul.mubr.f32.vlgmr.msra.gmra.mrb[96].mxu0 %v18665_v22 }
0x186a   :  { %17084 = vmatpush3.bf16.msra.mxu0 %v17608_v24  ;;  %16289 = vmatprep.mubr.msk.f32.mxu0 %vm17363_vm0, %v17364_v6 }
0x186b   :  { %17085 = vmatprep.subr.bf16.mxu0 %v17362_v3 }
0x186e   :  { %17087 = vmatpush3.bf16.msra.mxu0 %v17621_v29 }
0x186f   :  { %17088 = vmatprep.subr.bf16.mxu0 %v17362_v3 }
0x1871   :  { %16290 = vmatmul.mubr.f32.vlgmr.msra.gmra.mrb[96].mxu0 %v18668_v35 }
0x1872   :  { %17090 = vmatpush3.bf16.msra.mxu0 %v17659_v40  ;;  %16300 = vmatprep.mubr.msk.f32.mxu0 %vm17363_vm0, %v17364_v6  ;;  %v16170_v40 = vpop.f32.mrb[85].mxu0 }
0x1873   :  { %17091 = vmatprep.subr.bf16.mxu0 %v17362_v3  ;;  %v12404_v22 = vpop.f32.mrb[86].mxu0  ;;  %v18845_v40 = vsub.s32 0, %v17436_v9 }
0x1874   :  { %v16184_v35 = vpop.f32.mrb[87].mxu0 }
0x1875   :  { %v12556_v19 = vpop.f32.mrb[88].mxu0 }
0x1876   :  { %17093 = vmatpush3.bf16.msra.mxu0 %v17664_v41  ;;  %v16205_v41 = vpop.f32.mrb[89].mxu1  ;;  %v16198_v17 = vpop.f32.mrb[89].mxu0 }
0x1877   :  { %17094 = vmatprep.subr.bf16.mxu0 %v17362_v3 }
0x1879   :  { %16301 = vmatmul.mubr.f32.vlgmr.msra.gmra.mrb[96].mxu0 %v18662_v55 }
0x187a   :  { %17096 = vmatpush3.bf16.msra.mxu0 %v17608_v24  ;;  %16311 = vmatprep.mubr.msk.f32.mxu0 %vm17363_vm0, %v17364_v6  ;;  %v12405_v24 = vadd.f32 %v12404_v22, %v12329_v39  ;;  %v2061_v39 = vrot.slane %v2053_v37, %v17475_v23  ;;  %v6071_v22 = vrot.slane %v18098_v14, %v17475_v23 }
0x187b   :  { %17097 = vmatprep.subr.bf16.mxu0 %v17362_v3 }
0x187c   :  { %v12480_v57 = vadd.f32 %v12479_v18, %v12405_v24  ;;  %v2072_v24 = vrot.slane %v2061_v39, %v18845_v40  ;;  %v6079_v9 = vrot.slane %v6071_v22, %v17475_v23 }
0x187e   :  { %17099 = vmatpush3.bf16.msra.mxu0 %v17621_v29  ;;  %v12557_v59 = vadd.f32 %v12556_v19, %v12480_v57  ;;  %v10089_v57 = vrot.slane %v18469_v62, %v17475_v23  ;;  %v6090_v14 = vrot.slane %v6079_v9, %v18845_v40  ;;  %v8088_v19 = vrot.slane %v8080_v30, %v17475_v23 }
0x1880   :  { %v12630_v58 = vadd.f32 %v12629_v38, %v12557_v59  ;;  %v4062_v38 = vrot.slane %v17910_v20, %v17475_v23  ;;  %v12098_v59 = vrot.slane %v18657_v33, %v17475_v23  ;;  %v8099_v32 = vrot.slane %v8088_v19, %v18845_v40 }
0x1881   :  { %16312 = vmatmul.mubr.f32.vlgmr.msra.gmra.mrb[96].mxu0 %v18662_v55  ;;  %v10097_v17 = vrot.slane %v10089_v57, %v17475_v23 }
0x1882   :  { %v4070_v35 = vrot.slane %v4062_v38, %v17475_v23 }
0x1884   :  { %v4081_v20 = vrot.slane %v4070_v35, %v18845_v40 }
0x1914   :  { %v12793_v29 = vpop.f32.mrb[90].mxu1 }
0x1915   :  { %v16219_v25 = vpop.f32.mrb[91].mxu1 }
0x1918   :  { %v12944_v55 = vpop.f32.mrb[92].mxu1 }
0x1919   :  { %v16233_v42 = vpop.f32.mrb[93].mxu1 }
0x191c   :  { %v12712_v63 = vpop.f32.mrb[90].mxu0  ;;  %v13094_v1 = vpop.f32.mrb[94].mxu1 }
0x191d   :  { %v12713_v21 = vadd.f32 %v12712_v63, %v12630_v58  ;;  %v16212_v10 = vpop.f32.mrb[91].mxu0  ;;  %v16247_v53 = vpop.f32.mrb[95].mxu1  ;;  %v10108_v58 = vrot.slane %v10097_v17, %v18845_v40 }
0x191e   :  { %v4063_v53 = vcombine.high %v4062_v38, %v4062_v38 }
0x191f   :  { %v12794_v60 = vadd.f32 %v12793_v29, %v12713_v21  ;;  %v12106_v29 = vrot.slane %v12098_v59, %v17475_v23 }
0x1920   :  { %v12869_v0 = vpop.f32.mrb[92].mxu0 }
0x1921   :  { %v12870_v4 = vadd.f32 %v12869_v0, %v12794_v60  ;;  %v16226_v7 = vpop.f32.mrb[93].mxu0  ;;  %v12117_v62 = vrot.slane %v12106_v29, %v18845_v40 }
0x1923   :  { %v12945_v49 = vadd.f32 %v12944_v55, %v12870_v4  ;;  %v2054_v55 = vcombine.high %v2053_v37, %v2053_v37 }
0x1924   :  { %v13021_v8 = vpop.f32.mrb[94].mxu0 }
0x1925   :  { %v13022_v11 = vadd.f32 %v13021_v8, %v12945_v49  ;;  %v16240_v12 = vpop.f32.mrb[95].mxu0  ;;  %v2068_v10 = vrot.slane %v2054_v55, %v17475_v23  ;;  %v4077_v49 = vrot.slane %v4063_v53, %v17475_v23  ;;  %v6072_v8 = vcombine.high %v6071_v22, %v6071_v22 }
0x1927   :  { %v13095_v15 = vadd.f32 %v13094_v1, %v13022_v11  ;;  %v2076_v4 = vrot.slane %v2068_v10, %v18845_v40  ;;  %v4085_v12 = vrot.slane %v4077_v49, %v18845_v40 }
0x1929   :  { %v13098_v28 = vadd.f32 %v17337_v50, %v13095_v15  ;;  %v6086_v15 = vrot.slane %v6072_v8, %v17475_v23 }
0x1954   :  { %v13580_v48 = vpop.f32.mrb[96].mxu0 }
0x1955   :  { %v13591_v31 = vadd.f32 %v13580_v48, %v17683_v27  ;;  %v16313_v47 = vpop.f32.mrb[97].mxu0  ;;  %v13584_v52 = vadd.f32 %v13580_v48, %v13098_v28  ;;  %v8081_v48 = vcombine.high %v8080_v30, %v8080_v30 }
0x1956   :  { %v6094_v47 = vrot.slane %v6086_v15, %v18845_v40 }
0x1957   :  { %13593 = vrot.lane.b32.xlu1 %v13591_v31, %s17366_s11  ;;  %v14195_v51 = vmul.f32 -1.442695, %v13584_v52  ;;  %v8095_v50 = vrot.slane %v8081_v48, %v17475_v23 }
0x1959   :  { %17328 = vpow2.f32 %v14195_v51  ;;  %v8103_v51 = vrot.slane %v8095_v50, %v18845_v40 }
0x1963   :  { %v17329_v54 = vpop.eup %17328 }
0x1964   :  { %v13588_v16 = vadd.f32 1.0, %v17329_v54 }
0x1966   :  { %17330 = vrcp.f32 %v13588_v16  ;;  %v12099_v16 = vcombine.high %v12098_v59, %v12098_v59 }
0x1970   :  { %v17331_v2 = vpop.eup %17330 }
0x1971   :  { %v13603_v25 = vsub.f32 1.0, %v17331_v2  ;;  %v13609_v63 = vmul.f32 %v17331_v2, %v18657_v33 }
0x19c9   :  { %v13594_v13 = vpop.permute.xlu1 %13593 }
0x19ca   :  { %v13596_v18 = vmul.f32 %v17331_v2, %v13594_v13 }
0x19cc   :  { %13598 = vrot.lane.b32.xlu0 %v13596_v18, %s17366_s11  ;;  %s14173_s11 = sshll.u32 %s17368_s5, 4  ;;  %s14174_s11 = int_to_ptr.vmem [resolvable:$true] %s14173_s11 }
0x19cd   :  { %p17343_p1 = scmp.lt.s32.totalorder %s14174_s11, %s14174_s11 }
0x1a3e   :  { %v13599_v27 = vpop.permute.xlu0 %13598 }
0x1a3f   :  { %v13601_v34 = vadd.f32 %v13599_v27, %v13098_v28  ;;  %v10090_v28 = vcombine.high %v10089_v57, %v10089_v57  ;;  %v12113_v27 = vrot.slane %v12099_v16, %v17475_v23 }
0x1a41   :  { %17332 = vtanh.f32 %v13601_v34  ;;  %v10104_v54 = vrot.slane %v10090_v28, %v17475_v23  ;;  %v12121_v37 = vrot.slane %v12113_v27, %v18845_v40 }
0x1a43   :  { %v10112_v18 = vrot.slane %v10104_v54, %v18845_v40 }
0x1a4b   :  { %v17333_v41 = vpop.eup %17332 }
0x1a4c   :  { %13605 = vrot.lane.b32.xlu1 %v17333_v41, %s17367_s23 }
0x1a50   :  { %2077 = vrot.lane.b32.xlu1 %v2072_v24, %s17367_s23 }
0x1a54   :  { %4086 = vrot.lane.b32.xlu1 %v4081_v20, %s17367_s23 }
0x1a58   :  { %6095 = vrot.lane.b32.xlu1 %v6090_v14, %s17367_s23 }
0x1a5c   :  { %8104 = vrot.lane.b32.xlu1 %v8099_v32, %s17367_s23 }
0x1a60   :  { %10113 = vrot.lane.b32.xlu1 %v10108_v58, %s17367_s23 }
0x1a64   :  { %12122 = vrot.lane.b32.xlu1 %v12117_v62, %s17367_s23 }
0x1abe   :  { %v13606_v42 = vpop.permute.xlu1 %13605 }
0x1abf   :  { %v13608_v1 = vmul.f32 %v13606_v42, %v13603_v25 }
0x1ac1   :  { %v13610_v21 = vadd.f32 %v13609_v63, %v13608_v1 }
0x1ac2   :  { %v2078_v60 = vpop.permute.xlu1 %2077 }
0x1ac3   :  { %v14107_v0 = vrot.slane %v13610_v21, %v17475_v23  ;;  %2083 = vst.msk [vmem:[#allocation2 + $0x1] sm:$0x1] %vm56_vm1, %v2078_v60  ;;  %13612 = vrot.lane.b32.xlu0 %v13610_v21, %s17367_s23 }
0x1ac5   :  { %v14115_v7 = vrot.slane %v14107_v0, %v17475_v23  ;;  %v14108_v13 = vcombine.high %v14107_v0, %v14107_v0 }
0x1ac6   :  { %v4087_v33 = vpop.permute.xlu1 %4086 }
0x1ac7   :  { %4092 = vst.msk [vmem:[#allocation2 + $0x2] sm:$0x1] %vm56_vm1, %v4087_v33  ;;  %2079 = vrot.lane.b32.xlu0 %v2076_v4, %s17367_s23  ;;  %v14126_v11 = vrot.slane %v14115_v7, %v18845_v40  ;;  %v14122_v38 = vrot.slane %v14108_v13, %v17475_v23 }
0x1ac9   :  { %14131 = vrot.lane.b32.xlu1 %v14126_v11, %s17367_s23  ;;  %v14130_v39 = vrot.slane %v14122_v38, %v18845_v40 }
0x1aca   :  { %v6096_v31 = vpop.permute.xlu1 %6095 }
0x1acb   :  { %6101 = vst.msk [vmem:[#allocation2 + $0x3] sm:$0x1] %vm56_vm1, %v6096_v31  ;;  %4088 = vrot.lane.b32.xlu0 %v4085_v12, %s17367_s23 }
0x1ace   :  { %v8105_v52 = vpop.permute.xlu1 %8104 }
0x1acf   :  { %8110 = vst.msk [vmem:[#allocation2 + $0x4] sm:$0x1] %vm56_vm1, %v8105_v52  ;;  %6097 = vrot.lane.b32.xlu0 %v6094_v47, %s17367_s23 }
0x1ad2   :  { %v10114_v2 = vpop.permute.xlu1 %10113 }
0x1ad3   :  { %10119 = vst.msk [vmem:[#allocation2 + $0x5] sm:$0x1] %vm56_vm1, %v10114_v2  ;;  %8106 = vrot.lane.b32.xlu0 %v8103_v51, %s17367_s23 }
0x1ad6   :  { %v12123_v34 = vpop.permute.xlu1 %12122 }
0x1ad7   :  { %12128 = vst.msk [vmem:[#allocation2 + $0x6] sm:$0x1] %vm56_vm1, %v12123_v34  ;;  %10115 = vrot.lane.b32.xlu0 %v10112_v18, %s17367_s23 }
0x1adb   :  { %12124 = vrot.lane.b32.xlu0 %v12121_v37, %s17367_s23 }
0x1adf   :  { %14133 = vrot.lane.b32.xlu0 %v14130_v39, %s17367_s23  ;;  %s17338_s23 = scalar_lea.vmem %s14174_s11, 256 }
0x1ae0   :  { %p17339_p0 = scmp.ne.s32.totalorder %s14174_s11, %s17338_s23  ;;  %p17344_p2 = scmp.lt.s32.totalorder %s17338_s23, %s17338_s23 }
0x1ae2   :  { %p17345_p3 = por %p17344_p2, %p17343_p1 }
0x1ae4   :  { %p17346_p4 = pnand %p17345_p3, %p17339_p0 }
0x1b35   :  { %v13613_v41 = vpop.permute.xlu0 %13612 }
0x1b36   :  { %v13614_v22 = vsel %vm1033_vm6, %v13613_v41, 0 }
0x1b37   :  { %v13685_v24 = vand.u32 4294901760, %v13614_v22 }
0x1b39   :  { %v13686_v35 = vsub.f32 %v13614_v22, %v13685_v24  ;;  %v2080_v30 = vpop.permute.xlu0 %2079 }
0x1b3a   :  { %2084 = vst.msk [vmem:[#allocation2 + $0x9] sm:$0x1] %vm56_vm1, %v2080_v30 }
0x1b3b   :  { %v13687_v20 = vand.u32 4294901760, %v13686_v35  ;;  %v14132_v9 = vpop.permute.xlu1 %14131 }
0x1b3c   :  { %14137 = vst.msk [vmem:[#allocation2 + $0x7] sm:$0x1] %vm56_vm1, %v14132_v9 }
0x1b3d   :  { %v13688_v57 = vsub.f32 %v13686_v35, %v13687_v20  ;;  %v4089_v14 = vpop.permute.xlu0 %4088 }
0x1b3e   :  { %4093 = vst.msk [vmem:[#allocation2 + $0xa] sm:$0x1] %vm56_vm1, %v4089_v14 }
0x1b3f   :  { %v13689_v19 = vand.u32 4294901760, %v13688_v57 }
0x1b41   :  { %16323 = vmatmul.mubr.f32.vlgmr.msra.gmra.mrb[96].mxu1 %v13689_v19  ;;  %v6098_v40 = vpop.permute.xlu0 %6097 }
0x1b42   :  { %6102 = vst.msk [vmem:[#allocation2 + $0xb] sm:$0x1] %vm56_vm1, %v6098_v40  ;;  %17108 = vmatpush3.bf16.msra.mxu1 %v17715_v26  ;;  %16333 = vmatprep.mubr.msk.f32.mxu1 %vm17363_vm0, %v17364_v6 }
0x1b43   :  { %17109 = vmatprep.subr.bf16.mxu1 %v17362_v3 }
0x1b45   :  { %v8107_v59 = vpop.permute.xlu0 %8106 }
0x1b46   :  { %8111 = vst.msk [vmem:[#allocation2 + $0xc] sm:$0x1] %vm56_vm1, %v8107_v59  ;;  %17111 = vmatpush3.bf16.msra.mxu1 %v17721_v36 }
0x1b47   :  { %17112 = vmatprep.subr.bf16.mxu1 %v17362_v3 }
0x1b49   :  { %16334 = vmatmul.mubr.f32.vlgmr.msra.gmra.mrb[96].mxu1 %v13685_v24  ;;  %v10116_v32 = vpop.permute.xlu0 %10115 }
0x1b4a   :  { %10120 = vst.msk [vmem:[#allocation2 + $0xd] sm:$0x1] %vm56_vm1, %v10116_v32  ;;  %17114 = vmatpush3.bf16.msra.mxu1 %v17723_v43  ;;  %16344 = vmatprep.mubr.msk.f32.mxu1 %vm17363_vm0, %v17364_v6 }
0x1b4b   :  { %17115 = vmatprep.subr.bf16.mxu1 %v17362_v3 }
0x1b4d   :  { %v12125_v26 = vpop.permute.xlu0 %12124 }
0x1b4e   :  { %12129 = vst.msk [vmem:[#allocation2 + $0xe] sm:$0x1] %vm56_vm1, %v12125_v26  ;;  %17117 = vmatpush3.bf16.msra.mxu1 %v17725_v44 }
0x1b4f   :  { %17118 = vmatprep.subr.bf16.mxu1 %v17362_v3 }
0x1b51   :  { %16345 = vmatmul.mubr.f32.vlgmr.msra.gmra.mrb[96].mxu1 %v13686_v35  ;;  %v14134_v36 = vpop.permute.xlu0 %14133 }
0x1b52   :  { %14138 = vst.msk [vmem:[#allocation2 + $0xf] sm:$0x1] %vm56_vm1, %v14134_v36  ;;  %17120 = vmatpush3.bf16.msra.mxu1 %v17701_v56  ;;  %16355 = vmatprep.mubr.msk.f32.mxu1 %vm17363_vm0, %v17364_v6 }
0x1b53   :  { %17121 = vmatprep.subr.bf16.mxu1 %v17362_v3 }
0x1b56   :  { %17123 = vmatpush3.bf16.msra.mxu1 %v17711_v5 }
0x1b57   :  { %17124 = vmatprep.subr.bf16.mxu1 %v17362_v3 }
0x1b59   :  { %16356 = vmatmul.mubr.f32.vlgmr.msra.gmra.mrb[96].mxu1 %v13687_v20 }
0x1b5a   :  { %17126 = vmatpush3.bf16.msra.mxu1 %v17727_v45  ;;  %16366 = vmatprep.mubr.msk.f32.mxu1 %vm17363_vm0, %v17364_v6 }
0x1b5b   :  { %17127 = vmatprep.subr.bf16.mxu1 %v17362_v3 }
0x1b5e   :  { %17129 = vmatpush3.bf16.msra.mxu1 %v17729_v46 }
0x1b5f   :  { %17130 = vmatprep.subr.bf16.mxu1 %v17362_v3 }
0x1b61   :  { %16367 = vmatmul.mubr.f32.vlgmr.msra.gmra.mrb[96].mxu1 %v13685_v24 }
0x1b62   :  { %17132 = vmatpush3.bf16.msra.mxu1 %v17701_v56  ;;  %16377 = vmatprep.mubr.msk.f32.mxu1 %vm17363_vm0, %v17364_v6 }
0x1b63   :  { %17133 = vmatprep.subr.bf16.mxu1 %v17362_v3 }
0x1b66   :  { %17135 = vmatpush3.bf16.msra.mxu1 %v17711_v5 }
0x1b69   :  { %16378 = vmatmul.mubr.f32.vlgmr.msra.gmra.mrb[96].mxu1 %v13685_v24 }
0x1b6a   :  { %17349 = shalt.err (!%p17346_p4)
}
0x1b6b   :  { %s17350_s19 = scalar_lea.hbm %s18978_s10, 256 }
0x1b6c   :  { %p17351_p5 = scmp.ne.s32.totalorder %s18978_s10, %s17350_s19  ;;  %p17354_p6 = scmp.lt.u32.totalorder %s17350_s19, %s18978_s10 }
0x1b6e   :  { %p17356_p7 = pnand %p17354_p6, %p17351_p5 }
0x1b70   :  { %17359 = shalt.err (!%p17356_p7)
}
0x1b71   :  { %s17369_s24 = smov 128   ;;  %s17370_s8 = smov 8  }
0x1b72   :  { %14179 = dma.vmem_to_hbm [thread:$0]  %s14174_s11, 256, %s18978_s10, [#allocation3], %s17369_s24, %s17369_s24, %s17370_s8  }
0x1c3c   :  { %v14097_v3 = vpop.f32.mrb[96].mxu1 }
0x1c3d   :  { %v17142_v6 = vadd.f32 %v18564_v61, %v14097_v3  ;;  %v16379_v56 = vpop.f32.mrb[97].mxu1 }
0x1c3f   :  { %v14146_v5 = vrot.slane %v17142_v6, %v17475_v23 }
0x1c41   :  { %v14147_v43 = vcombine.high %v14146_v5, %v14146_v5  ;;  %v14154_v44 = vrot.slane %v14146_v5, %v17475_v23 }
0x1c43   :  { %v14161_v45 = vrot.slane %v14147_v43, %v17475_v23  ;;  %14164 = vst.msk [vmem:[%s18977_s9 + $0x7] sm:$0x1] %vm83_vm5, %v14154_v44 }
0x1c45   :  { %14165 = vst.msk [vmem:[%s18977_s9 + $0xf] sm:$0x1] %vm83_vm5, %v14161_v45 }
0x1c46   :  { %17360 = dma.done.wait [#allocation3], 256  }
0x1c47   :  { %17361 = vsyncadd [#allocation3], 4294967040 }
0x1c48   :  { %14185 = vsyncpa [#allocation3], 1 }

</bundles_post_ra>
